<compile_context>
chip_gen: v7x
topology: tpu7x:2x2x1
jax: 0.10.0
libtpu: 0.0.40
codegen_flags: <defaults>
</compile_context>

<pallas_src>
import jax
import jax.numpy as jnp
from jax.experimental import pallas as pl
from jax.experimental.pallas import tpu as pltpu

LN_EPS = 1e-5


# ----------------------------------------------------------------------------
# helpers traced inside kernels
# ----------------------------------------------------------------------------
def _layernorm(y, gamma, beta):
    mu = jnp.mean(y, axis=-1, keepdims=True)
    var = jnp.mean((y - mu) ** 2, axis=-1, keepdims=True)
    return (y - mu) * jax.lax.rsqrt(var + LN_EPS) * gamma + beta


def _prelu(y, alpha):
    return jnp.where(y > 0, y, y * alpha)


# ----------------------------------------------------------------------------
# spec / compiler-param helpers
# ----------------------------------------------------------------------------
def _full_spec(shape):
    """Whole-array block, same block for every grid step (weights / biases)."""
    zeros = (0,) * len(shape)
    return pl.BlockSpec(shape, lambda *_: zeros)


def _arr_bytes(*arrs):
    return sum(int(a.size) * jnp.dtype(a.dtype).itemsize for a in arrs)


def _cparams(semantics, est_bytes):
    """Explicit VMEM budget per kernel (double-buffered blocks + weights +
    scratch, 2x headroom), clamped to sane bounds for v5e/v6e/v7x."""
    limit = int(min(max(2 * est_bytes + (2 << 20), 8 << 20), 100 << 20))
    return pltpu.CompilerParams(dimension_semantics=semantics,
                                vmem_limit_bytes=limit)


def _pick_tile_m(m, cap=512):
    """Row tile: prefer 256-multiples (v6e/v7x MXU width), then 128, then the
    largest divisor that still yields >=2 grid steps for pipelining."""
    divisors = [t for t in range(8, min(cap, m) + 1, 8) if m % t == 0]
    if not divisors:
        return m
    for pref in (256, 128):
        mult = [t for t in divisors if t % pref == 0]
        if mult:
            return max(mult)
    sub = [t for t in divisors if t < m] or divisors
    return max(sub)


# ----------------------------------------------------------------------------
# plain linear (speaker branch only), row-tiled parallel grid
# ----------------------------------------------------------------------------
def fused_linear(x, w, b):
    M, K = x.shape
    D = w.shape[1]
    tile_m = _pick_tile_m(M)

    def kernel(x_ref, w_ref, b_ref, o_ref):
        o_ref[...] = (jnp.dot(x_ref[...].astype(w_ref.dtype), w_ref[...],
                              preferred_element_type=jnp.float32)
                      + b_ref[...])

    est = _arr_bytes(w, b) + 2 * (tile_m * K * 4 + tile_m * D * 4)
    return pl.pallas_call(
        kernel,
        out_shape=jax.ShapeDtypeStruct((M, D), jnp.float32),
        grid=(M // tile_m,),
        in_specs=[pl.BlockSpec((tile_m, K), lambda i: (i, 0)),
                  _full_spec(w.shape), _full_spec(b.shape)],
        out_specs=pl.BlockSpec((tile_m, D), lambda i: (i, 0)),
        compiler_params=_cparams(("parallel",), est),
    )(x, w, b)


# ----------------------------------------------------------------------------
# fused front-end: encoder (Conv1d as framed matmul) + PReLU + LN
#                  + [x, e] fullyconnection + PReLU + LN, gridded over batch
# ----------------------------------------------------------------------------
def frontend_call(frames, e, p):
    """frames: (N, T, K) f32, e: (N, E) f32.
    Returns raw feature (N, T, F) f32 and activation x (N, T, LIN) bf16."""
    N, T, K = frames.shape
    F = p["w_enc"].shape[1]
    LIN = p["w_fx"].shape[1]

    def kernel(fr_ref, e_ref, wen_ref, ben_ref, aen_ref, gen_ref, been_ref,
               wfx_ref, wfe_ref, bfl_ref, afl_ref, gfl_ref, befl_ref,
               feat_ref, x_ref):
        # encoder: Conv1d(kernel=frame_len, stride=frame_hop) == framed matmul
        feat = jnp.dot(fr_ref[...].astype(wen_ref.dtype), wen_ref[...],
                       preferred_element_type=jnp.float32) + ben_ref[...]
        feat_ref[...] = feat                      # raw pre-activation feature
        xe = _layernorm(_prelu(feat, aen_ref[...]), gen_ref[...], been_ref[...])
        # speaker embedding folded into the fullyconnection matmul:
        #   cat([x, e], -1) @ W_full == x @ W_x + e @ W_e   (no repeat/concat)
        e_row = e_ref[pl.ds(pl.program_id(0), 1), :]                 # (1, E)
        e_proj = jnp.dot(e_row.astype(wfe_ref.dtype), wfe_ref[...],
                         preferred_element_type=jnp.float32)         # (1, LIN)
        y = (jnp.dot(xe.astype(wfx_ref.dtype), wfx_ref[...],
                     preferred_element_type=jnp.float32)
             + e_proj + bfl_ref[...])
        y = _layernorm(_prelu(y, afl_ref[...]), gfl_ref[...], befl_ref[...])
        x_ref[...] = y.astype(x_ref.dtype)        # LN/PReLU in f32, store bf16

    weights = (p["w_enc"], p["b_enc"], p["a_enc"], p["g_enc"], p["be_enc"],
               p["w_fx"], p["w_fe"], p["b_full"], p["a_full"],
               p["g_full"], p["be_full"])
    est = (_arr_bytes(*weights) + _arr_bytes(e)
           + 2 * (T * K * 4 + T * F * 4 + T * LIN * 2))

    return pl.pallas_call(
        kernel,
        out_shape=(jax.ShapeDtypeStruct((N, T, F), jnp.float32),
                   jax.ShapeDtypeStruct((N, T, LIN), jnp.bfloat16)),
        grid=(N,),
        in_specs=[pl.BlockSpec((None, T, K), lambda n: (n, 0, 0)),
                  _full_spec(e.shape)]
                 + [_full_spec(w.shape) for w in weights],
        out_specs=(pl.BlockSpec((None, T, F), lambda n: (n, 0, 0)),
                   pl.BlockSpec((None, T, LIN), lambda n: (n, 0, 0))),
        compiler_params=_cparams(("parallel",), est),
    )(frames, e, *weights)


# ----------------------------------------------------------------------------
# one fused LSTMBlock kernel, gridded (parallel) over the batch
# ----------------------------------------------------------------------------
def lstm_block_call(x, blk):
    """x: (N, T, D_in) (f32 or bf16) -> (N, T, H) f32.

    # TODO(synk): for N much larger than the TensorCore count, batch several
    # sequences per grid step ((NB,H) recurrent state) to amortize the
    # latency-bound per-step matmul; at N=2 one sequence per core is optimal.
    """
    N, T, D_in = x.shape
    H = blk["w2"].shape[1]

    def kernel(x_ref, w1_ref, b1_ref, a1_ref, w2_ref, b2_ref, a2_ref,
               gfc_ref, bfc_ref, wih_ref, bih_ref, whh_ref,
               g1_ref, be1_ref, g2_ref, be2_ref, y_ref,
               gates_ref, h_scr, c_scr):
        # ---- fullyconnection_block: Linear+PReLU, Linear+PReLU, LayerNorm ----
        xv = x_ref[...]                                              # (T, D_in)
        h1 = _prelu(jnp.dot(xv.astype(w1_ref.dtype), w1_ref[...],
                            preferred_element_type=jnp.float32) + b1_ref[...],
                    a1_ref[...])
        h2 = _prelu(jnp.dot(h1.astype(w2_ref.dtype), w2_ref[...],
                            preferred_element_type=jnp.float32) + b2_ref[...],
                    a2_ref[...])
        x_fc = _layernorm(h2, gfc_ref[...], bfc_ref[...])            # (T, H)

        # ---- hoisted LSTM input projection: one wide MXU pass over all t ----
        gates_ref[...] = jnp.dot(x_fc.astype(wih_ref.dtype), wih_ref[...],
                                 preferred_element_type=jnp.float32) + bih_ref[...]

        whh = whh_ref[...]                                           # (H,4H) bf16
        h_scr[...] = jnp.zeros_like(h_scr)
        c_scr[...] = jnp.zeros_like(c_scr)

        # ---- recurrence: ONE bf16 MXU push + 2 EUP passes per step ----------
        def step(t, carry):
            h = h_scr[...]                                           # (1, H) f32
            z = gates_ref[pl.ds(t, 1), :] + jnp.dot(
                h.astype(whh.dtype), whh, preferred_element_type=jnp.float32)
            sig = jax.nn.sigmoid(z)                                  # (1, 4H)
            tnh = jnp.tanh(z)
            i_g = sig[:, 0 * H:1 * H]                                # PyTorch order
            f_g = sig[:, 1 * H:2 * H]
            g_g = tnh[:, 2 * H:3 * H]
            o_g = sig[:, 3 * H:4 * H]
            c_new = f_g * c_scr[...] + i_g * g_g
            h_new = o_g * jnp.tanh(c_new)
            h_scr[...] = h_new
            c_scr[...] = c_new
            y_ref[pl.ds(t, 1), :] = h_new
            return carry

        # fully unrolled: scheduler can overlap gate matmul / EUP / stores
        jax.lax.fori_loop(0, T, step, 0, unroll=True)

        # ---- LN(lstm_out) + residual + LN -----------------------------------
        y = _layernorm(y_ref[...], g1_ref[...], be1_ref[...]) + x_fc
        y_ref[...] = _layernorm(y, g2_ref[...], be2_ref[...])

    weights = (blk["w1"], blk["b1"], blk["a1"], blk["w2"], blk["b2"], blk["a2"],
               blk["g_fc"], blk["be_fc"], blk["w_ih"], blk["b_lstm"],
               blk["w_hh"], blk["g_ln1"], blk["be_ln1"], blk["g_ln2"],
               blk["be_ln2"])
    est = (_arr_bytes(*weights)
           + 2 * (T * D_in * jnp.dtype(x.dtype).itemsize + T * H * 4)
           + T * 4 * H * 4 + 2 * H * 4)

    return pl.pallas_call(
        kernel,
        out_shape=jax.ShapeDtypeStruct((N, T, H), jnp.float32),
        grid=(N,),
        in_specs=[pl.BlockSpec((None, T, D_in), lambda n: (n, 0, 0))]
                 + [_full_spec(w.shape) for w in weights],
        out_specs=pl.BlockSpec((None, T, H), lambda n: (n, 0, 0)),
        scratch_shapes=[pltpu.VMEM((T, 4 * H), jnp.float32),   # gates (all t)
                        pltpu.VMEM((1, H), jnp.float32),       # h state
                        pltpu.VMEM((1, H), jnp.float32)],      # c state
        compiler_params=_cparams(("parallel",), est),
    )(x, *weights)


# ----------------------------------------------------------------------------
# fused mask head + decoder matmul + overlap-add (lane-dense waveform output)
# ----------------------------------------------------------------------------
def mask_decoder_call(x, w_mask, b_mask, feature, w_dec, b_dec, *, frame_hop):
    """x: (N,T,H), feature: (N,T,F) raw encoder output -> wav (N, L_out)."""
    N, T, H = x.shape
    F = w_mask.shape[1]
    K = w_dec.shape[1]
    hop = frame_hop
    L_out = (T - 1) * hop + K

    def kernel(x_ref, wm_ref, bm_ref, ft_ref, wd_ref, bd_ref, wav_ref):
        # mask multiplies the RAW pre-activation encoder feature (per reference)
        m = jax.nn.sigmoid(
            jnp.dot(x_ref[...].astype(wm_ref.dtype), wm_ref[...],
                    preferred_element_type=jnp.float32) + bm_ref[...])
        fres = ft_ref[...] * m                                       # (T, F)
        frames = jnp.dot(fres.astype(wd_ref.dtype), wd_ref[...],
                         preferred_element_type=jnp.float32)         # (T, K)
        # lane-dense overlap-add: shift each frame row to offset t*hop and sum
        # into a single (1, L_out) lane-major accumulator.
        # TODO(synk): chunk this static unroll at production T (thousands).
        acc = jnp.zeros((1, L_out), jnp.float32)
        for t in range(T):
            row = frames[t:t + 1, :]                                 # (1, K)
            left, right = t * hop, L_out - K - t * hop
            pieces = []
            if left:
                pieces.append(jnp.zeros((1, left), jnp.float32))
            pieces.append(row)
            if right:
                pieces.append(jnp.zeros((1, right), jnp.float32))
            shifted = (pieces[0] if len(pieces) == 1
                       else jnp.concatenate(pieces, axis=-1))
            acc = acc + shifted
        wav_ref[...] = acc + bd_ref[0, 0]

    est = (_arr_bytes(w_mask, b_mask, w_dec, b_dec)
           + 2 * (T * H * 4 + T * F * 4 + L_out * 4))
    wav = pl.pallas_call(
        kernel,
        out_shape=jax.ShapeDtypeStruct((N, 1, L_out), jnp.float32),
        grid=(N,),
        in_specs=[pl.BlockSpec((None, T, H), lambda n: (n, 0, 0)),
                  _full_spec(w_mask.shape), _full_spec(b_mask.shape),
                  pl.BlockSpec((None, T, F), lambda n: (n, 0, 0)),
                  _full_spec(w_dec.shape), _full_spec(b_dec.shape)],
        out_specs=pl.BlockSpec((None, 1, L_out), lambda n: (n, 0, 0)),
        compiler_params=_cparams(("parallel",), est),
    )(x, w_mask, b_mask, feature, w_dec, b_dec)
    return wav.reshape(N, L_out)                     # contiguous: free reshape


# ----------------------------------------------------------------------------
# model config (small synthetic sizes; same structure as the PyTorch module)
# ----------------------------------------------------------------------------
FRAME_LEN = 16     # frame_len
FRAME_HOP = 8      # frame_hop
FILTER_NUM = 64    # filter_num (2048 in the original)
LINEAR_DIM = 64    # linear_dim (1024)
EMBED_DIM = 32     # embedding_dim (256)
LSTM_DIM = 32      # lstm_dim (256)
SPEAKER_NUM = 16   # speaker_num (1955)
AUX_LEN = 48       # enrollment feature length for the stand-in Speaker()
BATCH = 2
MIX_LEN = 72       # -> T = (72 - 16) // 8 + 1 = 8 frames


def init_params(key):
    p = {}
    keys = iter(jax.random.split(key, 128))
    BF = jnp.bfloat16

    def rnd(shape, scale=0.1, dtype=jnp.float32):
        return (scale * jax.random.normal(next(keys), shape)).astype(dtype)

    def ln_pair(d):
        return (1.0 + rnd((1, d), 0.05), rnd((1, d), 0.02))

    # Speaker() stand-in + speaker classifier head (tiny, f32)
    p["w_spk"] = rnd((AUX_LEN, EMBED_DIM)); p["b_spk"] = rnd((1, EMBED_DIM))
    p["w_fc"] = rnd((EMBED_DIM, SPEAKER_NUM)); p["b_fc"] = rnd((1, SPEAKER_NUM))

    # encoder (Conv1d as framed matmul, bf16 weights) + PReLU + LN (f32)
    p["w_enc"] = rnd((FRAME_LEN, FILTER_NUM), dtype=BF)
    p["b_enc"] = rnd((1, FILTER_NUM))
    p["a_enc"] = jnp.full((1, 1), 0.25, jnp.float32)   # nn.PReLU() scalar alpha
    p["g_enc"], p["be_enc"] = ln_pair(FILTER_NUM)

    # fullyconnection: Linear(F+E, LIN) split into x-part and e-part
    p["w_fx"] = rnd((FILTER_NUM, LINEAR_DIM), dtype=BF)
    p["w_fe"] = rnd((EMBED_DIM, LINEAR_DIM), dtype=BF)
    p["b_full"] = rnd((1, LINEAR_DIM))
    p["a_full"] = jnp.full((1, 1), 0.25, jnp.float32)
    p["g_full"], p["be_full"] = ln_pair(LINEAR_DIM)

    # 4 LSTM blocks (bf16 matmul weights, f32 biases / LN / recurrent state)
    p["blocks"] = []
    for bi in range(4):
        in_dim = LINEAR_DIM if bi == 0 else LSTM_DIM
        blk = {
            "w1": rnd((in_dim, LINEAR_DIM), dtype=BF), "b1": rnd((1, LINEAR_DIM)),
            "a1": jnp.full((1, 1), 0.25, jnp.float32),
            "w2": rnd((LINEAR_DIM, LSTM_DIM), dtype=BF), "b2": rnd((1, LSTM_DIM)),
            "a2": jnp.full((1, 1), 0.25, jnp.float32),
            "w_ih": rnd((LSTM_DIM, 4 * LSTM_DIM), dtype=BF),
            "w_hh": rnd((LSTM_DIM, 4 * LSTM_DIM), dtype=BF),
            "b_lstm": rnd((1, 4 * LSTM_DIM)),           # b_ih + b_hh combined
        }
        blk["g_fc"], blk["be_fc"] = ln_pair(LSTM_DIM)
        blk["g_ln1"], blk["be_ln1"] = ln_pair(LSTM_DIM)
        blk["g_ln2"], blk["be_ln2"] = ln_pair(LSTM_DIM)
        p["blocks"].append(blk)

    # mask head + decoder (ConvTranspose1d as matmul + overlap-add)
    p["w_mask"] = rnd((LSTM_DIM, FILTER_NUM), dtype=BF)
    p["b_mask"] = rnd((1, FILTER_NUM))
    p["w_dec"] = rnd((FILTER_NUM, FRAME_LEN), dtype=BF)
    p["b_dec"] = rnd((1, 1))
    return p


# ----------------------------------------------------------------------------
# forward
# ----------------------------------------------------------------------------
def e3net_forward(params, mix, aux):
    N, L = mix.shape

    # ---- speaker branch (tiny; stand-in for ECAPA-TDNN Speaker()) ------------
    e = fused_linear(aux, params["w_spk"], params["b_spk"])          # (N, E)
    norm = jnp.sqrt(jnp.sum(e * e, axis=1, keepdims=True))
    e = e / jnp.maximum(norm, 1e-12)                 # eps guards zero embedding
    spk_pred = fused_linear(e, params["w_fc"], params["b_fc"])       # (N, SPK)

    # ---- framing (Conv1d windows) --------------------------------------------
    # TODO(synk): fold this gather into the front-end kernel with strided loads.
    T = (L - FRAME_LEN) // FRAME_HOP + 1
    idx = jnp.arange(T)[:, None] * FRAME_HOP + jnp.arange(FRAME_LEN)[None, :]
    frames = mix[:, idx]                                             # (N, T, K)

    # ---- fused encoder + encoder_norm + fullyconnection ----------------------
    feature, x = frontend_call(frames, e, params)   # (N,T,F) f32, (N,T,LIN) bf16

    # ---- 4 fused LSTM blocks --------------------------------------------------
    mid_layers_feat = []
    for blk in params["blocks"]:
        x = lstm_block_call(x, blk)                                  # (N, T, H)
        mid_layers_feat.append(x)

    # ---- fused mask + decoder matmul + lane-dense overlap-add -----------------
    wav = mask_decoder_call(x, params["w_mask"], params["b_mask"],
                            feature, params["w_dec"], params["b_dec"],
                            frame_hop=FRAME_HOP)                     # (N, L)

    return {"wav": wav, "spk_pred": spk_pred,
            "mid_layers_feat": mid_layers_feat}


# ----------------------------------------------------------------------------
if __name__ == "__main__":
    root = jax.random.PRNGKey(0)
    k_params, k_mix, k_aux = jax.random.split(root, 3)

    params = init_params(k_params)
    mix = jax.random.normal(k_mix, (BATCH, MIX_LEN), jnp.float32)
    aux = jax.random.normal(k_aux, (BATCH, AUX_LEN), jnp.float32)

    fwd = jax.jit(e3net_forward)
    est = fwd(params, mix, aux)

    jax.block_until_ready(est["wav"])
    jax.block_until_ready(est["spk_pred"])
    for f in est["mid_layers_feat"]:
        jax.block_until_ready(f)

    assert est["wav"].shape == (BATCH, MIX_LEN)
    assert est["spk_pred"].shape == (BATCH, SPEAKER_NUM)
    assert all(f.shape == (BATCH, 8, LSTM_DIM) for f in est["mid_layers_feat"])
    assert bool(jnp.all(jnp.isfinite(est["wav"])))
    print("KERNEL_OK")
</pallas_src>

<mosaic_0001>
module attributes {stable_mosaic.version = 11 : i64} {
  func.func @kernel(%arg0: i32, %arg1: memref<2x48xf32, #tpu.memory_space<vmem>>, %arg2: memref<48x32xf32, #tpu.memory_space<vmem>>, %arg3: memref<1x32xf32, #tpu.memory_space<vmem>>, %arg4: memref<2x32xf32, #tpu.memory_space<vmem>>) attributes {dimension_semantics = [#tpu.dimension_semantics<parallel>], iteration_bounds = array<i64: 1>, scalar_prefetch = 0 : i64, scratch_operands = 0 : i64, tpu.core_type = #tpu.core_type<tc>, window_params = [{transform_indices = @transform_0, window_bounds = array<i64: 2, 48>}, {pipeline_mode = #tpu.pipeline_mode<synchronous>, transform_indices = @transform_1, window_bounds = array<i64: 48, 32>}, {pipeline_mode = #tpu.pipeline_mode<synchronous>, transform_indices = @transform_2, window_bounds = array<i64: 1, 32>}, {transform_indices = @transform_3, window_bounds = array<i64: 2, 32>}]} {
    %c0 = arith.constant 0 : index
    %c0_0 = arith.constant 0 : index
    %0 = vector.load %arg1[%c0, %c0_0] : memref<2x48xf32, #tpu.memory_space<vmem>>, vector<2x48xf32>
    %c0_1 = arith.constant 0 : index
    %c0_2 = arith.constant 0 : index
    %1 = vector.load %arg2[%c0_1, %c0_2] : memref<48x32xf32, #tpu.memory_space<vmem>>, vector<48x32xf32>
    %cst = arith.constant dense<0.000000e+00> : vector<2x32xf32>
    %2 = tpu.matmul %0, %1, %cst {dimension_numbers = #tpu.dot_dimension_numbers<[1], [0], [0], [1], [0, 0, 1, 1], [], []>} : vector<2x48xf32>, vector<48x32xf32>, vector<2x32xf32> -> vector<2x32xf32>
    %c0_3 = arith.constant 0 : index
    %c0_4 = arith.constant 0 : index
    %3 = vector.load %arg3[%c0_3, %c0_4] : memref<1x32xf32, #tpu.memory_space<vmem>>, vector<1x32xf32>
    %4 = vector.broadcast %3 : vector<1x32xf32> to vector<2x32xf32>
    %5 = arith.addf %2, %4 : vector<2x32xf32>
    %c0_5 = arith.constant 0 : index
    %c0_6 = arith.constant 0 : index
    %6 = vector.load %arg4[%c0_5, %c0_6] : memref<2x32xf32, #tpu.memory_space<vmem>>, vector<2x32xf32>
    tpu.vector_store %arg4[%c0_5, %c0_6], %5 {strides = array<i32>} : memref<2x32xf32, #tpu.memory_space<vmem>>, vector<2x32xf32>,
    return
  }
  func.func @transform_0(%arg0: i32) -> (i32, i32) {
    %c0_i32 = arith.constant 0 : i32
    %c0_i32_0 = arith.constant 0 : i32
    return %arg0, %c0_i32 : i32, i32
  }
  func.func @transform_1(%arg0: i32) -> (i32, i32) {
    %c0_i32 = arith.constant 0 : i32
    %c0_i32_0 = arith.constant 0 : i32
    %c0_i32_1 = arith.constant 0 : i32
    return %c0_i32, %c0_i32_0 : i32, i32
  }
  func.func @transform_2(%arg0: i32) -> (i32, i32) {
    %c0_i32 = arith.constant 0 : i32
    %c0_i32_0 = arith.constant 0 : i32
    %c0_i32_1 = arith.constant 0 : i32
    return %c0_i32, %c0_i32_0 : i32, i32
  }
  func.func @transform_3(%arg0: i32) -> (i32, i32) {
    %c0_i32 = arith.constant 0 : i32
    %c0_i32_0 = arith.constant 0 : i32
    return %arg0, %c0_i32 : i32, i32
  }
}

module attributes {stable_mosaic.version = 11 : i64} {
  func.func @kernel(%arg0: i32, %arg1: memref<1x8x16xf32, #tpu.memory_space<vmem>>, %arg2: memref<2x32xf32, #tpu.memory_space<vmem>>, %arg3: memref<16x64xbf16, #tpu.memory_space<vmem>>, %arg4: memref<1x64xf32, #tpu.memory_space<vmem>>, %arg5: memref<1x1xf32, #tpu.memory_space<vmem>>, %arg6: memref<1x64xf32, #tpu.memory_space<vmem>>, %arg7: memref<1x64xf32, #tpu.memory_space<vmem>>, %arg8: memref<64x64xbf16, #tpu.memory_space<vmem>>, %arg9: memref<32x64xbf16, #tpu.memory_space<vmem>>, %arg10: memref<1x64xf32, #tpu.memory_space<vmem>>, %arg11: memref<1x1xf32, #tpu.memory_space<vmem>>, %arg12: memref<1x64xf32, #tpu.memory_space<vmem>>, %arg13: memref<1x64xf32, #tpu.memory_space<vmem>>, %arg14: memref<1x8x64xf32, #tpu.memory_space<vmem>>, %arg15: memref<1x8x64xbf16, #tpu.memory_space<vmem>>) attributes {dimension_semantics = [#tpu.dimension_semantics<parallel>], iteration_bounds = array<i64: 2>, scalar_prefetch = 0 : i64, scratch_operands = 0 : i64, tpu.core_type = #tpu.core_type<tc>, window_params = [{transform_indices = @transform_0, window_bounds = array<i64: 1, 8, 16>}, {pipeline_mode = #tpu.pipeline_mode<synchronous>, transform_indices = @transform_1, window_bounds = array<i64: 2, 32>}, {pipeline_mode = #tpu.pipeline_mode<synchronous>, transform_indices = @transform_2, window_bounds = array<i64: 16, 64>}, {pipeline_mode = #tpu.pipeline_mode<synchronous>, transform_indices = @transform_3, window_bounds = array<i64: 1, 64>}, {pipeline_mode = #tpu.pipeline_mode<synchronous>, transform_indices = @transform_4, window_bounds = array<i64: 1, 1>}, {pipeline_mode = #tpu.pipeline_mode<synchronous>, transform_indices = @transform_5, window_bounds = array<i64: 1, 64>}, {pipeline_mode = #tpu.pipeline_mode<synchronous>, transform_indices = @transform_6, window_bounds = array<i64: 1, 64>}, {pipeline_mode = #tpu.pipeline_mode<synchronous>, transform_indices = @transform_7, window_bounds = array<i64: 64, 64>}, {pipeline_mode = #tpu.pipeline_mode<synchronous>, transform_indices = @transform_8, window_bounds = array<i64: 32, 64>}, {pipeline_mode = #tpu.pipeline_mode<synchronous>, transform_indices = @transform_9, window_bounds = array<i64: 1, 64>}, {pipeline_mode = #tpu.pipeline_mode<synchronous>, transform_indices = @transform_10, window_bounds = array<i64: 1, 1>}, {pipeline_mode = #tpu.pipeline_mode<synchronous>, transform_indices = @transform_11, window_bounds = array<i64: 1, 64>}, {pipeline_mode = #tpu.pipeline_mode<synchronous>, transform_indices = @transform_12, window_bounds = array<i64: 1, 64>}, {transform_indices = @transform_13, window_bounds = array<i64: 1, 8, 64>}, {transform_indices = @transform_14, window_bounds = array<i64: 1, 8, 64>}]} {
    %c0 = arith.constant 0 : index
    %c0_0 = arith.constant 0 : index
    %c0_1 = arith.constant 0 : index
    %0 = vector.load %arg1[%c0, %c0_0, %c0_1] : memref<1x8x16xf32, #tpu.memory_space<vmem>>, vector<1x8x16xf32>
    %1 = vector.shape_cast %0 : vector<1x8x16xf32> to vector<8x16xf32>
    %2 = arith.truncf %1 : vector<8x16xf32> to vector<8x16xbf16>
    %c0_2 = arith.constant 0 : index
    %c0_3 = arith.constant 0 : index
    %3 = vector.load %arg3[%c0_2, %c0_3] : memref<16x64xbf16, #tpu.memory_space<vmem>>, vector<16x64xbf16>
    %cst = arith.constant dense<0.000000e+00> : vector<8x64xf32>
    %4 = tpu.matmul %2, %3, %cst {dimension_numbers = #tpu.dot_dimension_numbers<[1], [0], [0], [1], [0, 0, 1, 1], [], []>} : vector<8x16xbf16>, vector<16x64xbf16>, vector<8x64xf32> -> vector<8x64xf32>
    %c0_4 = arith.constant 0 : index
    %c0_5 = arith.constant 0 : index
    %5 = vector.load %arg4[%c0_4, %c0_5] : memref<1x64xf32, #tpu.memory_space<vmem>>, vector<1x64xf32>
    %6 = vector.broadcast %5 : vector<1x64xf32> to vector<8x64xf32>
    %7 = arith.addf %4, %6 : vector<8x64xf32>
    %c0_6 = arith.constant 0 : index
    %c0_7 = arith.constant 0 : index
    %c0_8 = arith.constant 0 : index
    %8 = vector.load %arg14[%c0_6, %c0_7, %c0_8] : memref<1x8x64xf32, #tpu.memory_space<vmem>>, vector<1x8x64xf32>
    %9 = vector.shape_cast %8 : vector<1x8x64xf32> to vector<8x64xf32>
    %10 = vector.shape_cast %7 : vector<8x64xf32> to vector<1x8x64xf32>
    tpu.vector_store %arg14[%c0_6, %c0_7, %c0_8], %10 {strides = array<i32>} : memref<1x8x64xf32, #tpu.memory_space<vmem>>, vector<1x8x64xf32>,
    %c0_9 = arith.constant 0 : index
    %c0_10 = arith.constant 0 : index
    %11 = vector.load %arg5[%c0_9, %c0_10] : memref<1x1xf32, #tpu.memory_space<vmem>>, vector<1x1xf32>
    %cst_11 = arith.constant 0.000000e+00 : f32
    %12 = vector.broadcast %cst_11 : f32 to vector<8x64xf32>
    %13 = arith.cmpf ogt, %7, %12 : vector<8x64xf32>
    %14 = vector.broadcast %11 : vector<1x1xf32> to vector<8x64xf32>
    %15 = arith.mulf %7, %14 : vector<8x64xf32>
    %16 = arith.select %13, %7, %15 : vector<8x64xi1>, vector<8x64xf32>
    %c0_12 = arith.constant 0 : index
    %c0_13 = arith.constant 0 : index
    %17 = vector.load %arg6[%c0_12, %c0_13] : memref<1x64xf32, #tpu.memory_space<vmem>>, vector<1x64xf32>
    %c0_14 = arith.constant 0 : index
    %c0_15 = arith.constant 0 : index
    %18 = vector.load %arg7[%c0_14, %c0_15] : memref<1x64xf32, #tpu.memory_space<vmem>>, vector<1x64xf32>
    %cst_16 = arith.constant dense<0.000000e+00> : vector<8xf32>
    %19 = vector.multi_reduction <add>, %16, %cst_16 [1] : vector<8x64xf32> to vector<8xf32>
    %20 = vector.shape_cast %19 : vector<8xf32> to vector<8x1xf32>
    %cst_17 = arith.constant 6.400000e+01 : f32
    %21 = vector.broadcast %cst_17 : f32 to vector<8x1xf32>
    %22 = arith.divf %20, %21 : vector<8x1xf32>
    %23 = vector.broadcast %22 : vector<8x1xf32> to vector<8x64xf32>
    %24 = arith.subf %16, %23 : vector<8x64xf32>
    %25 = arith.mulf %24, %24 : vector<8x64xf32>
    %cst_18 = arith.constant dense<0.000000e+00> : vector<8xf32>
    %26 = vector.multi_reduction <add>, %25, %cst_18 [1] : vector<8x64xf32> to vector<8xf32>
    %27 = vector.shape_cast %26 : vector<8xf32> to vector<8x1xf32>
    %cst_19 = arith.constant 6.400000e+01 : f32
    %28 = vector.broadcast %cst_19 : f32 to vector<8x1xf32>
    %29 = arith.divf %27, %28 : vector<8x1xf32>
    %30 = vector.broadcast %22 : vector<8x1xf32> to vector<8x64xf32>
    %31 = arith.subf %16, %30 : vector<8x64xf32>
    %cst_20 = arith.constant 9.99999974E-6 : f32
    %32 = vector.broadcast %cst_20 : f32 to vector<8x1xf32>
    %33 = arith.addf %29, %32 : vector<8x1xf32>
    %34 = math.rsqrt %33 : vector<8x1xf32>
    %35 = vector.broadcast %34 : vector<8x1xf32> to vector<8x64xf32>
    %36 = arith.mulf %31, %35 : vector<8x64xf32>
    %37 = vector.broadcast %17 : vector<1x64xf32> to vector<8x64xf32>
    %38 = arith.mulf %36, %37 : vector<8x64xf32>
    %39 = vector.broadcast %18 : vector<1x64xf32> to vector<8x64xf32>
    %40 = arith.addf %38, %39 : vector<8x64xf32>
    %41 = arith.index_cast %arg0 : i32 to index
    %c0_21 = arith.constant 0 : index
    %42 = vector.load %arg2[%41, %c0_21] : memref<2x32xf32, #tpu.memory_space<vmem>>, vector<1x32xf32>
    %43 = arith.truncf %42 : vector<1x32xf32> to vector<1x32xbf16>
    %c0_22 = arith.constant 0 : index
    %c0_23 = arith.constant 0 : index
    %44 = vector.load %arg9[%c0_22, %c0_23] : memref<32x64xbf16, #tpu.memory_space<vmem>>, vector<32x64xbf16>
    %cst_24 = arith.constant dense<0.000000e+00> : vector<1x64xf32>
    %45 = tpu.matmul %43, %44, %cst_24 {dimension_numbers = #tpu.dot_dimension_numbers<[1], [0], [0], [1], [0, 0, 1, 1], [], []>} : vector<1x32xbf16>, vector<32x64xbf16>, vector<1x64xf32> -> vector<1x64xf32>
    %46 = arith.truncf %40 : vector<8x64xf32> to vector<8x64xbf16>
    %c0_25 = arith.constant 0 : index
    %c0_26 = arith.constant 0 : index
    %47 = vector.load %arg8[%c0_25, %c0_26] : memref<64x64xbf16, #tpu.memory_space<vmem>>, vector<64x64xbf16>
    %cst_27 = arith.constant dense<0.000000e+00> : vector<8x64xf32>
    %48 = tpu.matmul %46, %47, %cst_27 {dimension_numbers = #tpu.dot_dimension_numbers<[1], [0], [0], [1], [0, 0, 1, 1], [], []>} : vector<8x64xbf16>, vector<64x64xbf16>, vector<8x64xf32> -> vector<8x64xf32>
    %49 = vector.broadcast %45 : vector<1x64xf32> to vector<8x64xf32>
    %50 = arith.addf %48, %49 : vector<8x64xf32>
    %c0_28 = arith.constant 0 : index
    %c0_29 = arith.constant 0 : index
    %51 = vector.load %arg10[%c0_28, %c0_29] : memref<1x64xf32, #tpu.memory_space<vmem>>, vector<1x64xf32>
    %52 = vector.broadcast %51 : vector<1x64xf32> to vector<8x64xf32>
    %53 = arith.addf %50, %52 : vector<8x64xf32>
    %c0_30 = arith.constant 0 : index
    %c0_31 = arith.constant 0 : index
    %54 = vector.load %arg11[%c0_30, %c0_31] : memref<1x1xf32, #tpu.memory_space<vmem>>, vector<1x1xf32>
    %cst_32 = arith.constant 0.000000e+00 : f32
    %55 = vector.broadcast %cst_32 : f32 to vector<8x64xf32>
    %56 = arith.cmpf ogt, %53, %55 : vector<8x64xf32>
    %57 = vector.broadcast %54 : vector<1x1xf32> to vector<8x64xf32>
    %58 = arith.mulf %53, %57 : vector<8x64xf32>
    %59 = arith.select %56, %53, %58 : vector<8x64xi1>, vector<8x64xf32>
    %c0_33 = arith.constant 0 : index
    %c0_34 = arith.constant 0 : index
    %60 = vector.load %arg12[%c0_33, %c0_34] : memref<1x64xf32, #tpu.memory_space<vmem>>, vector<1x64xf32>
    %c0_35 = arith.constant 0 : index
    %c0_36 = arith.constant 0 : index
    %61 = vector.load %arg13[%c0_35, %c0_36] : memref<1x64xf32, #tpu.memory_space<vmem>>, vector<1x64xf32>
    %cst_37 = arith.constant dense<0.000000e+00> : vector<8xf32>
    %62 = vector.multi_reduction <add>, %59, %cst_37 [1] : vector<8x64xf32> to vector<8xf32>
    %63 = vector.shape_cast %62 : vector<8xf32> to vector<8x1xf32>
    %cst_38 = arith.constant 6.400000e+01 : f32
    %64 = vector.broadcast %cst_38 : f32 to vector<8x1xf32>
    %65 = arith.divf %63, %64 : vector<8x1xf32>
    %66 = vector.broadcast %65 : vector<8x1xf32> to vector<8x64xf32>
    %67 = arith.subf %59, %66 : vector<8x64xf32>
    %68 = arith.mulf %67, %67 : vector<8x64xf32>
    %cst_39 = arith.constant dense<0.000000e+00> : vector<8xf32>
    %69 = vector.multi_reduction <add>, %68, %cst_39 [1] : vector<8x64xf32> to vector<8xf32>
    %70 = vector.shape_cast %69 : vector<8xf32> to vector<8x1xf32>
    %cst_40 = arith.constant 6.400000e+01 : f32
    %71 = vector.broadcast %cst_40 : f32 to vector<8x1xf32>
    %72 = arith.divf %70, %71 : vector<8x1xf32>
    %73 = vector.broadcast %65 : vector<8x1xf32> to vector<8x64xf32>
    %74 = arith.subf %59, %73 : vector<8x64xf32>
    %cst_41 = arith.constant 9.99999974E-6 : f32
    %75 = vector.broadcast %cst_41 : f32 to vector<8x1xf32>
    %76 = arith.addf %72, %75 : vector<8x1xf32>
    %77 = math.rsqrt %76 : vector<8x1xf32>
    %78 = vector.broadcast %77 : vector<8x1xf32> to vector<8x64xf32>
    %79 = arith.mulf %74, %78 : vector<8x64xf32>
    %80 = vector.broadcast %60 : vector<1x64xf32> to vector<8x64xf32>
    %81 = arith.mulf %79, %80 : vector<8x64xf32>
    %82 = vector.broadcast %61 : vector<1x64xf32> to vector<8x64xf32>
    %83 = arith.addf %81, %82 : vector<8x64xf32>
    %84 = arith.truncf %83 : vector<8x64xf32> to vector<8x64xbf16>
    %c0_42 = arith.constant 0 : index
    %c0_43 = arith.constant 0 : index
    %c0_44 = arith.constant 0 : index
    %85 = vector.load %arg15[%c0_42, %c0_43, %c0_44] : memref<1x8x64xbf16, #tpu.memory_space<vmem>>, vector<1x8x64xbf16>
    %86 = vector.shape_cast %85 : vector<1x8x64xbf16> to vector<8x64xbf16>
    %87 = vector.shape_cast %84 : vector<8x64xbf16> to vector<1x8x64xbf16>
    tpu.vector_store %arg15[%c0_42, %c0_43, %c0_44], %87 {strides = array<i32>} : memref<1x8x64xbf16, #tpu.memory_space<vmem>>, vector<1x8x64xbf16>,
    return
  }
  func.func @transform_0(%arg0: i32) -> (i32, i32, i32) {
    %c0_i32 = arith.constant 0 : i32
    %c0_i32_0 = arith.constant 0 : i32
    %c0_i32_1 = arith.constant 0 : i32
    return %arg0, %c0_i32, %c0_i32_0 : i32, i32, i32
  }
  func.func @transform_1(%arg0: i32) -> (i32, i32) {
    %c0_i32 = arith.constant 0 : i32
    %c0_i32_0 = arith.constant 0 : i32
    %c0_i32_1 = arith.constant 0 : i32
    return %c0_i32, %c0_i32_0 : i32, i32
  }
  func.func @transform_2(%arg0: i32) -> (i32, i32) {
    %c0_i32 = arith.constant 0 : i32
    %c0_i32_0 = arith.constant 0 : i32
    %c0_i32_1 = arith.constant 0 : i32
    return %c0_i32, %c0_i32_0 : i32, i32
  }
  func.func @transform_3(%arg0: i32) -> (i32, i32) {
    %c0_i32 = arith.constant 0 : i32
    %c0_i32_0 = arith.constant 0 : i32
    %c0_i32_1 = arith.constant 0 : i32
    return %c0_i32, %c0_i32_0 : i32, i32
  }
  func.func @transform_4(%arg0: i32) -> (i32, i32) {
    %c0_i32 = arith.constant 0 : i32
    %c0_i32_0 = arith.constant 0 : i32
    %c0_i32_1 = arith.constant 0 : i32
    return %c0_i32, %c0_i32_0 : i32, i32
  }
  func.func @transform_5(%arg0: i32) -> (i32, i32) {
    %c0_i32 = arith.constant 0 : i32
    %c0_i32_0 = arith.constant 0 : i32
    %c0_i32_1 = arith.constant 0 : i32
    return %c0_i32, %c0_i32_0 : i32, i32
  }
  func.func @transform_6(%arg0: i32) -> (i32, i32) {
    %c0_i32 = arith.constant 0 : i32
    %c0_i32_0 = arith.constant 0 : i32
    %c0_i32_1 = arith.constant 0 : i32
    return %c0_i32, %c0_i32_0 : i32, i32
  }
  func.func @transform_7(%arg0: i32) -> (i32, i32) {
    %c0_i32 = arith.constant 0 : i32
    %c0_i32_0 = arith.constant 0 : i32
    %c0_i32_1 = arith.constant 0 : i32
    return %c0_i32, %c0_i32_0 : i32, i32
  }
  func.func @transform_8(%arg0: i32) -> (i32, i32) {
    %c0_i32 = arith.constant 0 : i32
    %c0_i32_0 = arith.constant 0 : i32
    %c0_i32_1 = arith.constant 0 : i32
    return %c0_i32, %c0_i32_0 : i32, i32
  }
  func.func @transform_9(%arg0: i32) -> (i32, i32) {
    %c0_i32 = arith.constant 0 : i32
    %c0_i32_0 = arith.constant 0 : i32
    %c0_i32_1 = arith.constant 0 : i32
    return %c0_i32, %c0_i32_0 : i32, i32
  }
  func.func @transform_10(%arg0: i32) -> (i32, i32) {
    %c0_i32 = arith.constant 0 : i32
    %c0_i32_0 = arith.constant 0 : i32
    %c0_i32_1 = arith.constant 0 : i32
    return %c0_i32, %c0_i32_0 : i32, i32
  }
  func.func @transform_11(%arg0: i32) -> (i32, i32) {
    %c0_i32 = arith.constant 0 : i32
    %c0_i32_0 = arith.constant 0 : i32
    %c0_i32_1 = arith.constant 0 : i32
    return %c0_i32, %c0_i32_0 : i32, i32
  }
  func.func @transform_12(%arg0: i32) -> (i32, i32) {
    %c0_i32 = arith.constant 0 : i32
    %c0_i32_0 = arith.constant 0 : i32
    %c0_i32_1 = arith.constant 0 : i32
    return %c0_i32, %c0_i32_0 : i32, i32
  }
  func.func @transform_13(%arg0: i32) -> (i32, i32, i32) {
    %c0_i32 = arith.constant 0 : i32
    %c0_i32_0 = arith.constant 0 : i32
    %c0_i32_1 = arith.constant 0 : i32
    return %arg0, %c0_i32, %c0_i32_0 : i32, i32, i32
  }
  func.func @transform_14(%arg0: i32) -> (i32, i32, i32) {
    %c0_i32 = arith.constant 0 : i32
    %c0_i32_0 = arith.constant 0 : i32
    %c0_i32_1 = arith.constant 0 : i32
    return %arg0, %c0_i32, %c0_i32_0 : i32, i32, i32
  }
}

module attributes {stable_mosaic.version = 11 : i64} {
  func.func @kernel(%arg0: i32, %arg1: memref<1x8x64xbf16, #tpu.memory_space<vmem>>, %arg2: memref<64x64xbf16, #tpu.memory_space<vmem>>, %arg3: memref<1x64xf32, #tpu.memory_space<vmem>>, %arg4: memref<1x1xf32, #tpu.memory_space<vmem>>, %arg5: memref<64x32xbf16, #tpu.memory_space<vmem>>, %arg6: memref<1x32xf32, #tpu.memory_space<vmem>>, %arg7: memref<1x1xf32, #tpu.memory_space<vmem>>, %arg8: memref<1x32xf32, #tpu.memory_space<vmem>>, %arg9: memref<1x32xf32, #tpu.memory_space<vmem>>, %arg10: memref<32x128xbf16, #tpu.memory_space<vmem>>, %arg11: memref<1x128xf32, #tpu.memory_space<vmem>>, %arg12: memref<32x128xbf16, #tpu.memory_space<vmem>>, %arg13: memref<1x32xf32, #tpu.memory_space<vmem>>, %arg14: memref<1x32xf32, #tpu.memory_space<vmem>>, %arg15: memref<1x32xf32, #tpu.memory_space<vmem>>, %arg16: memref<1x32xf32, #tpu.memory_space<vmem>>, %arg17: memref<1x8x32xf32, #tpu.memory_space<vmem>>, %arg18: memref<8x128xf32, #tpu.memory_space<vmem>>, %arg19: memref<1x32xf32, #tpu.memory_space<vmem>>, %arg20: memref<1x32xf32, #tpu.memory_space<vmem>>) attributes {dimension_semantics = [#tpu.dimension_semantics<parallel>], iteration_bounds = array<i64: 2>, scalar_prefetch = 0 : i64, scratch_operands = 3 : i64, tpu.core_type = #tpu.core_type<tc>, window_params = [{transform_indices = @transform_0, window_bounds = array<i64: 1, 8, 64>}, {pipeline_mode = #tpu.pipeline_mode<synchronous>, transform_indices = @transform_1, window_bounds = array<i64: 64, 64>}, {pipeline_mode = #tpu.pipeline_mode<synchronous>, transform_indices = @transform_2, window_bounds = array<i64: 1, 64>}, {pipeline_mode = #tpu.pipeline_mode<synchronous>, transform_indices = @transform_3, window_bounds = array<i64: 1, 1>}, {pipeline_mode = #tpu.pipeline_mode<synchronous>, transform_indices = @transform_4, window_bounds = array<i64: 64, 32>}, {pipeline_mode = #tpu.pipeline_mode<synchronous>, transform_indices = @transform_5, window_bounds = array<i64: 1, 32>}, {pipeline_mode = #tpu.pipeline_mode<synchronous>, transform_indices = @transform_6, window_bounds = array<i64: 1, 1>}, {pipeline_mode = #tpu.pipeline_mode<synchronous>, transform_indices = @transform_7, window_bounds = array<i64: 1, 32>}, {pipeline_mode = #tpu.pipeline_mode<synchronous>, transform_indices = @transform_8, window_bounds = array<i64: 1, 32>}, {pipeline_mode = #tpu.pipeline_mode<synchronous>, transform_indices = @transform_9, window_bounds = array<i64: 32, 128>}, {pipeline_mode = #tpu.pipeline_mode<synchronous>, transform_indices = @transform_10, window_bounds = array<i64: 1, 128>}, {pipeline_mode = #tpu.pipeline_mode<synchronous>, transform_indices = @transform_11, window_bounds = array<i64: 32, 128>}, {pipeline_mode = #tpu.pipeline_mode<synchronous>, transform_indices = @transform_12, window_bounds = array<i64: 1, 32>}, {pipeline_mode = #tpu.pipeline_mode<synchronous>, transform_indices = @transform_13, window_bounds = array<i64: 1, 32>}, {pipeline_mode = #tpu.pipeline_mode<synchronous>, transform_indices = @transform_14, window_bounds = array<i64: 1, 32>}, {pipeline_mode = #tpu.pipeline_mode<synchronous>, transform_indices = @transform_15, window_bounds = array<i64: 1, 32>}, {transform_indices = @transform_16, window_bounds = array<i64: 1, 8, 32>}]} {
    %c0 = arith.constant 0 : index
    %c0_0 = arith.constant 0 : index
    %c0_1 = arith.constant 0 : index
    %0 = vector.load %arg1[%c0, %c0_0, %c0_1] : memref<1x8x64xbf16, #tpu.memory_space<vmem>>, vector<1x8x64xbf16>
    %1 = vector.shape_cast %0 : vector<1x8x64xbf16> to vector<8x64xbf16>
    %c0_2 = arith.constant 0 : index
    %c0_3 = arith.constant 0 : index
    %2 = vector.load %arg2[%c0_2, %c0_3] : memref<64x64xbf16, #tpu.memory_space<vmem>>, vector<64x64xbf16>
    %cst = arith.constant dense<0.000000e+00> : vector<8x64xf32>
    %3 = tpu.matmul %1, %2, %cst {dimension_numbers = #tpu.dot_dimension_numbers<[1], [0], [0], [1], [0, 0, 1, 1], [], []>} : vector<8x64xbf16>, vector<64x64xbf16>, vector<8x64xf32> -> vector<8x64xf32>
    %c0_4 = arith.constant 0 : index
    %c0_5 = arith.constant 0 : index
    %4 = vector.load %arg3[%c0_4, %c0_5] : memref<1x64xf32, #tpu.memory_space<vmem>>, vector<1x64xf32>
    %5 = vector.broadcast %4 : vector<1x64xf32> to vector<8x64xf32>
    %6 = arith.addf %3, %5 : vector<8x64xf32>
    %c0_6 = arith.constant 0 : index
    %c0_7 = arith.constant 0 : index
    %7 = vector.load %arg4[%c0_6, %c0_7] : memref<1x1xf32, #tpu.memory_space<vmem>>, vector<1x1xf32>
    %cst_8 = arith.constant 0.000000e+00 : f32
    %8 = vector.broadcast %cst_8 : f32 to vector<8x64xf32>
    %9 = arith.cmpf ogt, %6, %8 : vector<8x64xf32>
    %10 = vector.broadcast %7 : vector<1x1xf32> to vector<8x64xf32>
    %11 = arith.mulf %6, %10 : vector<8x64xf32>
    %12 = arith.select %9, %6, %11 : vector<8x64xi1>, vector<8x64xf32>
    %13 = arith.truncf %12 : vector<8x64xf32> to vector<8x64xbf16>
    %c0_9 = arith.constant 0 : index
    %c0_10 = arith.constant 0 : index
    %14 = vector.load %arg5[%c0_9, %c0_10] : memref<64x32xbf16, #tpu.memory_space<vmem>>, vector<64x32xbf16>
    %cst_11 = arith.constant dense<0.000000e+00> : vector<8x32xf32>
    %15 = tpu.matmul %13, %14, %cst_11 {dimension_numbers = #tpu.dot_dimension_numbers<[1], [0], [0], [1], [0, 0, 1, 1], [], []>} : vector<8x64xbf16>, vector<64x32xbf16>, vector<8x32xf32> -> vector<8x32xf32>
    %c0_12 = arith.constant 0 : index
    %c0_13 = arith.constant 0 : index
    %16 = vector.load %arg6[%c0_12, %c0_13] : memref<1x32xf32, #tpu.memory_space<vmem>>, vector<1x32xf32>
    %17 = vector.broadcast %16 : vector<1x32xf32> to vector<8x32xf32>
    %18 = arith.addf %15, %17 : vector<8x32xf32>
    %c0_14 = arith.constant 0 : index
    %c0_15 = arith.constant 0 : index
    %19 = vector.load %arg7[%c0_14, %c0_15] : memref<1x1xf32, #tpu.memory_space<vmem>>, vector<1x1xf32>
    %cst_16 = arith.constant 0.000000e+00 : f32
    %20 = vector.broadcast %cst_16 : f32 to vector<8x32xf32>
    %21 = arith.cmpf ogt, %18, %20 : vector<8x32xf32>
    %22 = vector.broadcast %19 : vector<1x1xf32> to vector<8x32xf32>
    %23 = arith.mulf %18, %22 : vector<8x32xf32>
    %24 = arith.select %21, %18, %23 : vector<8x32xi1>, vector<8x32xf32>
    %c0_17 = arith.constant 0 : index
    %c0_18 = arith.constant 0 : index
    %25 = vector.load %arg8[%c0_17, %c0_18] : memref<1x32xf32, #tpu.memory_space<vmem>>, vector<1x32xf32>
    %c0_19 = arith.constant 0 : index
    %c0_20 = arith.constant 0 : index
    %26 = vector.load %arg9[%c0_19, %c0_20] : memref<1x32xf32, #tpu.memory_space<vmem>>, vector<1x32xf32>
    %cst_21 = arith.constant dense<0.000000e+00> : vector<8xf32>
    %27 = vector.multi_reduction <add>, %24, %cst_21 [1] : vector<8x32xf32> to vector<8xf32>
    %28 = vector.shape_cast %27 : vector<8xf32> to vector<8x1xf32>
    %cst_22 = arith.constant 3.200000e+01 : f32
    %29 = vector.broadcast %cst_22 : f32 to vector<8x1xf32>
    %30 = arith.divf %28, %29 : vector<8x1xf32>
    %31 = vector.broadcast %30 : vector<8x1xf32> to vector<8x32xf32>
    %32 = arith.subf %24, %31 : vector<8x32xf32>
    %33 = arith.mulf %32, %32 : vector<8x32xf32>
    %cst_23 = arith.constant dense<0.000000e+00> : vector<8xf32>
    %34 = vector.multi_reduction <add>, %33, %cst_23 [1] : vector<8x32xf32> to vector<8xf32>
    %35 = vector.shape_cast %34 : vector<8xf32> to vector<8x1xf32>
    %cst_24 = arith.constant 3.200000e+01 : f32
    %36 = vector.broadcast %cst_24 : f32 to vector<8x1xf32>
    %37 = arith.divf %35, %36 : vector<8x1xf32>
    %38 = vector.broadcast %30 : vector<8x1xf32> to vector<8x32xf32>
    %39 = arith.subf %24, %38 : vector<8x32xf32>
    %cst_25 = arith.constant 9.99999974E-6 : f32
    %40 = vector.broadcast %cst_25 : f32 to vector<8x1xf32>
    %41 = arith.addf %37, %40 : vector<8x1xf32>
    %42 = math.rsqrt %41 : vector<8x1xf32>
    %43 = vector.broadcast %42 : vector<8x1xf32> to vector<8x32xf32>
    %44 = arith.mulf %39, %43 : vector<8x32xf32>
    %45 = vector.broadcast %25 : vector<1x32xf32> to vector<8x32xf32>
    %46 = arith.mulf %44, %45 : vector<8x32xf32>
    %47 = vector.broadcast %26 : vector<1x32xf32> to vector<8x32xf32>
    %48 = arith.addf %46, %47 : vector<8x32xf32>
    %49 = arith.truncf %48 : vector<8x32xf32> to vector<8x32xbf16>
    %c0_26 = arith.constant 0 : index
    %c0_27 = arith.constant 0 : index
    %50 = vector.load %arg10[%c0_26, %c0_27] : memref<32x128xbf16, #tpu.memory_space<vmem>>, vector<32x128xbf16>
    %cst_28 = arith.constant dense<0.000000e+00> : vector<8x128xf32>
    %51 = tpu.matmul %49, %50, %cst_28 {dimension_numbers = #tpu.dot_dimension_numbers<[1], [0], [0], [1], [0, 0, 1, 1], [], []>} : vector<8x32xbf16>, vector<32x128xbf16>, vector<8x128xf32> -> vector<8x128xf32>
    %c0_29 = arith.constant 0 : index
    %c0_30 = arith.constant 0 : index
    %52 = vector.load %arg11[%c0_29, %c0_30] : memref<1x128xf32, #tpu.memory_space<vmem>>, vector<1x128xf32>
    %53 = vector.broadcast %52 : vector<1x128xf32> to vector<8x128xf32>
    %54 = arith.addf %51, %53 : vector<8x128xf32>
    %c0_31 = arith.constant 0 : index
    %c0_32 = arith.constant 0 : index
    %55 = vector.load %arg18[%c0_31, %c0_32] : memref<8x128xf32, #tpu.memory_space<vmem>>, vector<8x128xf32>
    tpu.vector_store %arg18[%c0_31, %c0_32], %54 {strides = array<i32>} : memref<8x128xf32, #tpu.memory_space<vmem>>, vector<8x128xf32>,
    %c0_33 = arith.constant 0 : index
    %c0_34 = arith.constant 0 : index
    %56 = vector.load %arg12[%c0_33, %c0_34] : memref<32x128xbf16, #tpu.memory_space<vmem>>, vector<32x128xbf16>
    %cst_35 = arith.constant 0.000000e+00 : f32
    %57 = vector.broadcast %cst_35 : f32 to vector<1x32xf32>
    %c0_36 = arith.constant 0 : index
    %c0_37 = arith.constant 0 : index
    %58 = vector.load %arg19[%c0_36, %c0_37] : memref<1x32xf32, #tpu.memory_space<vmem>>, vector<1x32xf32>
    tpu.vector_store %arg19[%c0_36, %c0_37], %57 {strides = array<i32>} : memref<1x32xf32, #tpu.memory_space<vmem>>, vector<1x32xf32>,
    %cst_38 = arith.constant 0.000000e+00 : f32
    %59 = vector.broadcast %cst_38 : f32 to vector<1x32xf32>
    %c0_39 = arith.constant 0 : index
    %c0_40 = arith.constant 0 : index
    %60 = vector.load %arg20[%c0_39, %c0_40] : memref<1x32xf32, #tpu.memory_space<vmem>>, vector<1x32xf32>
    tpu.vector_store %arg20[%c0_39, %c0_40], %59 {strides = array<i32>} : memref<1x32xf32, #tpu.memory_space<vmem>>, vector<1x32xf32>,
    %c0_i32 = arith.constant 0 : i32
    %c0_41 = arith.constant 0 : index
    %c0_42 = arith.constant 0 : index
    %61 = vector.load %arg19[%c0_41, %c0_42] : memref<1x32xf32, #tpu.memory_space<vmem>>, vector<1x32xf32>
    %62 = arith.index_cast %c0_i32 : i32 to index
    %c0_43 = arith.constant 0 : index
    %63 = vector.load %arg18[%62, %c0_43] : memref<8x128xf32, #tpu.memory_space<vmem>>, vector<1x128xf32>
    %64 = arith.truncf %61 : vector<1x32xf32> to vector<1x32xbf16>
    %cst_44 = arith.constant dense<0.000000e+00> : vector<1x128xf32>
    %65 = tpu.matmul %64, %56, %cst_44 {dimension_numbers = #tpu.dot_dimension_numbers<[1], [0], [0], [1], [0, 0, 1, 1], [], []>} : vector<1x32xbf16>, vector<32x128xbf16>, vector<1x128xf32> -> vector<1x128xf32>
    %66 = arith.addf %63, %65 : vector<1x128xf32>
    %67 = arith.negf %66 : vector<1x128xf32>
    %68 = math.exp %67 : vector<1x128xf32>
    %cst_45 = arith.constant 1.000000e+00 : f32
    %69 = vector.broadcast %cst_45 : f32 to vector<1x128xf32>
    %70 = arith.addf %69, %68 : vector<1x128xf32>
    %71 = arith.divf %69, %70 : vector<1x128xf32>
    %72 = math.tanh %66 : vector<1x128xf32>
    %73 = vector.extract_strided_slice %71 {offsets = [0, 0], sizes = [1, 32], strides = [1, 1]} : vector<1x128xf32> to vector<1x32xf32>
    %74 = vector.extract_strided_slice %71 {offsets = [0, 32], sizes = [1, 32], strides = [1, 1]} : vector<1x128xf32> to vector<1x32xf32>
    %75 = vector.extract_strided_slice %72 {offsets = [0, 64], sizes = [1, 32], strides = [1, 1]} : vector<1x128xf32> to vector<1x32xf32>
    %76 = vector.extract_strided_slice %71 {offsets = [0, 96], sizes = [1, 32], strides = [1, 1]} : vector<1x128xf32> to vector<1x32xf32>
    %c0_46 = arith.constant 0 : index
    %c0_47 = arith.constant 0 : index
    %77 = vector.load %arg20[%c0_46, %c0_47] : memref<1x32xf32, #tpu.memory_space<vmem>>, vector<1x32xf32>
    %78 = arith.mulf %74, %77 : vector<1x32xf32>
    %79 = arith.mulf %73, %75 : vector<1x32xf32>
    %80 = arith.addf %78, %79 : vector<1x32xf32>
    %81 = math.tanh %80 : vector<1x32xf32>
    %82 = arith.mulf %76, %81 : vector<1x32xf32>
    %c0_48 = arith.constant 0 : index
    %c0_49 = arith.constant 0 : index
    %83 = vector.load %arg19[%c0_48, %c0_49] : memref<1x32xf32, #tpu.memory_space<vmem>>, vector<1x32xf32>
    tpu.vector_store %arg19[%c0_48, %c0_49], %82 {strides = array<i32>} : memref<1x32xf32, #tpu.memory_space<vmem>>, vector<1x32xf32>,
    %c0_50 = arith.constant 0 : index
    %c0_51 = arith.constant 0 : index
    %84 = vector.load %arg20[%c0_50, %c0_51] : memref<1x32xf32, #tpu.memory_space<vmem>>, vector<1x32xf32>
    tpu.vector_store %arg20[%c0_50, %c0_51], %80 {strides = array<i32>} : memref<1x32xf32, #tpu.memory_space<vmem>>, vector<1x32xf32>,
    %c0_52 = arith.constant 0 : index
    %85 = arith.index_cast %c0_i32 : i32 to index
    %c0_53 = arith.constant 0 : index
    %86 = vector.load %arg17[%c0_52, %85, %c0_53] : memref<1x8x32xf32, #tpu.memory_space<vmem>>, vector<1x1x32xf32>
    %87 = vector.shape_cast %86 : vector<1x1x32xf32> to vector<1x32xf32>
    %88 = vector.shape_cast %82 : vector<1x32xf32> to vector<1x1x32xf32>
    tpu.vector_store %arg17[%c0_52, %85, %c0_53], %88 {strides = array<i32>} : memref<1x8x32xf32, #tpu.memory_space<vmem>>, vector<1x1x32xf32>,
    %c1_i32 = arith.constant 1 : i32
    %c0_54 = arith.constant 0 : index
    %c0_55 = arith.constant 0 : index
    %89 = vector.load %arg19[%c0_54, %c0_55] : memref<1x32xf32, #tpu.memory_space<vmem>>, vector<1x32xf32>
    %90 = arith.index_cast %c1_i32 : i32 to index
    %c0_56 = arith.constant 0 : index
    %91 = vector.load %arg18[%90, %c0_56] : memref<8x128xf32, #tpu.memory_space<vmem>>, vector<1x128xf32>
    %92 = arith.truncf %89 : vector<1x32xf32> to vector<1x32xbf16>
    %cst_57 = arith.constant dense<0.000000e+00> : vector<1x128xf32>
    %93 = tpu.matmul %92, %56, %cst_57 {dimension_numbers = #tpu.dot_dimension_numbers<[1], [0], [0], [1], [0, 0, 1, 1], [], []>} : vector<1x32xbf16>, vector<32x128xbf16>, vector<1x128xf32> -> vector<1x128xf32>
    %94 = arith.addf %91, %93 : vector<1x128xf32>
    %95 = arith.negf %94 : vector<1x128xf32>
    %96 = math.exp %95 : vector<1x128xf32>
    %cst_58 = arith.constant 1.000000e+00 : f32
    %97 = vector.broadcast %cst_58 : f32 to vector<1x128xf32>
    %98 = arith.addf %97, %96 : vector<1x128xf32>
    %99 = arith.divf %97, %98 : vector<1x128xf32>
    %100 = math.tanh %94 : vector<1x128xf32>
    %101 = vector.extract_strided_slice %99 {offsets = [0, 0], sizes = [1, 32], strides = [1, 1]} : vector<1x128xf32> to vector<1x32xf32>
    %102 = vector.extract_strided_slice %99 {offsets = [0, 32], sizes = [1, 32], strides = [1, 1]} : vector<1x128xf32> to vector<1x32xf32>
    %103 = vector.extract_strided_slice %100 {offsets = [0, 64], sizes = [1, 32], strides = [1, 1]} : vector<1x128xf32> to vector<1x32xf32>
    %104 = vector.extract_strided_slice %99 {offsets = [0, 96], sizes = [1, 32], strides = [1, 1]} : vector<1x128xf32> to vector<1x32xf32>
    %c0_59 = arith.constant 0 : index
    %c0_60 = arith.constant 0 : index
    %105 = vector.load %arg20[%c0_59, %c0_60] : memref<1x32xf32, #tpu.memory_space<vmem>>, vector<1x32xf32>
    %106 = arith.mulf %102, %105 : vector<1x32xf32>
    %107 = arith.mulf %101, %103 : vector<1x32xf32>
    %108 = arith.addf %106, %107 : vector<1x32xf32>
    %109 = math.tanh %108 : vector<1x32xf32>
    %110 = arith.mulf %104, %109 : vector<1x32xf32>
    %c0_61 = arith.constant 0 : index
    %c0_62 = arith.constant 0 : index
    %111 = vector.load %arg19[%c0_61, %c0_62] : memref<1x32xf32, #tpu.memory_space<vmem>>, vector<1x32xf32>
    tpu.vector_store %arg19[%c0_61, %c0_62], %110 {strides = array<i32>} : memref<1x32xf32, #tpu.memory_space<vmem>>, vector<1x32xf32>,
    %c0_63 = arith.constant 0 : index
    %c0_64 = arith.constant 0 : index
    %112 = vector.load %arg20[%c0_63, %c0_64] : memref<1x32xf32, #tpu.memory_space<vmem>>, vector<1x32xf32>
    tpu.vector_store %arg20[%c0_63, %c0_64], %108 {strides = array<i32>} : memref<1x32xf32, #tpu.memory_space<vmem>>, vector<1x32xf32>,
    %c0_65 = arith.constant 0 : index
    %113 = arith.index_cast %c1_i32 : i32 to index
    %c0_66 = arith.constant 0 : index
    %114 = vector.load %arg17[%c0_65, %113, %c0_66] : memref<1x8x32xf32, #tpu.memory_space<vmem>>, vector<1x1x32xf32>
    %115 = vector.shape_cast %114 : vector<1x1x32xf32> to vector<1x32xf32>
    %116 = vector.shape_cast %110 : vector<1x32xf32> to vector<1x1x32xf32>
    tpu.vector_store %arg17[%c0_65, %113, %c0_66], %116 {strides = array<i32>} : memref<1x8x32xf32, #tpu.memory_space<vmem>>, vector<1x1x32xf32>,
    %c2_i32 = arith.constant 2 : i32
    %c0_67 = arith.constant 0 : index
    %c0_68 = arith.constant 0 : index
    %117 = vector.load %arg19[%c0_67, %c0_68] : memref<1x32xf32, #tpu.memory_space<vmem>>, vector<1x32xf32>
    %118 = arith.index_cast %c2_i32 : i32 to index
    %c0_69 = arith.constant 0 : index
    %119 = vector.load %arg18[%118, %c0_69] : memref<8x128xf32, #tpu.memory_space<vmem>>, vector<1x128xf32>
    %120 = arith.truncf %117 : vector<1x32xf32> to vector<1x32xbf16>
    %cst_70 = arith.constant dense<0.000000e+00> : vector<1x128xf32>
    %121 = tpu.matmul %120, %56, %cst_70 {dimension_numbers = #tpu.dot_dimension_numbers<[1], [0], [0], [1], [0, 0, 1, 1], [], []>} : vector<1x32xbf16>, vector<32x128xbf16>, vector<1x128xf32> -> vector<1x128xf32>
    %122 = arith.addf %119, %121 : vector<1x128xf32>
    %123 = arith.negf %122 : vector<1x128xf32>
    %124 = math.exp %123 : vector<1x128xf32>
    %cst_71 = arith.constant 1.000000e+00 : f32
    %125 = vector.broadcast %cst_71 : f32 to vector<1x128xf32>
    %126 = arith.addf %125, %124 : vector<1x128xf32>
    %127 = arith.divf %125, %126 : vector<1x128xf32>
    %128 = math.tanh %122 : vector<1x128xf32>
    %129 = vector.extract_strided_slice %127 {offsets = [0, 0], sizes = [1, 32], strides = [1, 1]} : vector<1x128xf32> to vector<1x32xf32>
    %130 = vector.extract_strided_slice %127 {offsets = [0, 32], sizes = [1, 32], strides = [1, 1]} : vector<1x128xf32> to vector<1x32xf32>
    %131 = vector.extract_strided_slice %128 {offsets = [0, 64], sizes = [1, 32], strides = [1, 1]} : vector<1x128xf32> to vector<1x32xf32>
    %132 = vector.extract_strided_slice %127 {offsets = [0, 96], sizes = [1, 32], strides = [1, 1]} : vector<1x128xf32> to vector<1x32xf32>
    %c0_72 = arith.constant 0 : index
    %c0_73 = arith.constant 0 : index
    %133 = vector.load %arg20[%c0_72, %c0_73] : memref<1x32xf32, #tpu.memory_space<vmem>>, vector<1x32xf32>
    %134 = arith.mulf %130, %133 : vector<1x32xf32>
    %135 = arith.mulf %129, %131 : vector<1x32xf32>
    %136 = arith.addf %134, %135 : vector<1x32xf32>
    %137 = math.tanh %136 : vector<1x32xf32>
    %138 = arith.mulf %132, %137 : vector<1x32xf32>
    %c0_74 = arith.constant 0 : index
    %c0_75 = arith.constant 0 : index
    %139 = vector.load %arg19[%c0_74, %c0_75] : memref<1x32xf32, #tpu.memory_space<vmem>>, vector<1x32xf32>
    tpu.vector_store %arg19[%c0_74, %c0_75], %138 {strides = array<i32>} : memref<1x32xf32, #tpu.memory_space<vmem>>, vector<1x32xf32>,
    %c0_76 = arith.constant 0 : index
    %c0_77 = arith.constant 0 : index
    %140 = vector.load %arg20[%c0_76, %c0_77] : memref<1x32xf32, #tpu.memory_space<vmem>>, vector<1x32xf32>
    tpu.vector_store %arg20[%c0_76, %c0_77], %136 {strides = array<i32>} : memref<1x32xf32, #tpu.memory_space<vmem>>, vector<1x32xf32>,
    %c0_78 = arith.constant 0 : index
    %141 = arith.index_cast %c2_i32 : i32 to index
    %c0_79 = arith.constant 0 : index
    %142 = vector.load %arg17[%c0_78, %141, %c0_79] : memref<1x8x32xf32, #tpu.memory_space<vmem>>, vector<1x1x32xf32>
    %143 = vector.shape_cast %142 : vector<1x1x32xf32> to vector<1x32xf32>
    %144 = vector.shape_cast %138 : vector<1x32xf32> to vector<1x1x32xf32>
    tpu.vector_store %arg17[%c0_78, %141, %c0_79], %144 {strides = array<i32>} : memref<1x8x32xf32, #tpu.memory_space<vmem>>, vector<1x1x32xf32>,
    %c3_i32 = arith.constant 3 : i32
    %c0_80 = arith.constant 0 : index
    %c0_81 = arith.constant 0 : index
    %145 = vector.load %arg19[%c0_80, %c0_81] : memref<1x32xf32, #tpu.memory_space<vmem>>, vector<1x32xf32>
    %146 = arith.index_cast %c3_i32 : i32 to index
    %c0_82 = arith.constant 0 : index
    %147 = vector.load %arg18[%146, %c0_82] : memref<8x128xf32, #tpu.memory_space<vmem>>, vector<1x128xf32>
    %148 = arith.truncf %145 : vector<1x32xf32> to vector<1x32xbf16>
    %cst_83 = arith.constant dense<0.000000e+00> : vector<1x128xf32>
    %149 = tpu.matmul %148, %56, %cst_83 {dimension_numbers = #tpu.dot_dimension_numbers<[1], [0], [0], [1], [0, 0, 1, 1], [], []>} : vector<1x32xbf16>, vector<32x128xbf16>, vector<1x128xf32> -> vector<1x128xf32>
    %150 = arith.addf %147, %149 : vector<1x128xf32>
    %151 = arith.negf %150 : vector<1x128xf32>
    %152 = math.exp %151 : vector<1x128xf32>
    %cst_84 = arith.constant 1.000000e+00 : f32
    %153 = vector.broadcast %cst_84 : f32 to vector<1x128xf32>
    %154 = arith.addf %153, %152 : vector<1x128xf32>
    %155 = arith.divf %153, %154 : vector<1x128xf32>
    %156 = math.tanh %150 : vector<1x128xf32>
    %157 = vector.extract_strided_slice %155 {offsets = [0, 0], sizes = [1, 32], strides = [1, 1]} : vector<1x128xf32> to vector<1x32xf32>
    %158 = vector.extract_strided_slice %155 {offsets = [0, 32], sizes = [1, 32], strides = [1, 1]} : vector<1x128xf32> to vector<1x32xf32>
    %159 = vector.extract_strided_slice %156 {offsets = [0, 64], sizes = [1, 32], strides = [1, 1]} : vector<1x128xf32> to vector<1x32xf32>
    %160 = vector.extract_strided_slice %155 {offsets = [0, 96], sizes = [1, 32], strides = [1, 1]} : vector<1x128xf32> to vector<1x32xf32>
    %c0_85 = arith.constant 0 : index
    %c0_86 = arith.constant 0 : index
    %161 = vector.load %arg20[%c0_85, %c0_86] : memref<1x32xf32, #tpu.memory_space<vmem>>, vector<1x32xf32>
    %162 = arith.mulf %158, %161 : vector<1x32xf32>
    %163 = arith.mulf %157, %159 : vector<1x32xf32>
    %164 = arith.addf %162, %163 : vector<1x32xf32>
    %165 = math.tanh %164 : vector<1x32xf32>
    %166 = arith.mulf %160, %165 : vector<1x32xf32>
    %c0_87 = arith.constant 0 : index
    %c0_88 = arith.constant 0 : index
    %167 = vector.load %arg19[%c0_87, %c0_88] : memref<1x32xf32, #tpu.memory_space<vmem>>, vector<1x32xf32>
    tpu.vector_store %arg19[%c0_87, %c0_88], %166 {strides = array<i32>} : memref<1x32xf32, #tpu.memory_space<vmem>>, vector<1x32xf32>,
    %c0_89 = arith.constant 0 : index
    %c0_90 = arith.constant 0 : index
    %168 = vector.load %arg20[%c0_89, %c0_90] : memref<1x32xf32, #tpu.memory_space<vmem>>, vector<1x32xf32>
    tpu.vector_store %arg20[%c0_89, %c0_90], %164 {strides = array<i32>} : memref<1x32xf32, #tpu.memory_space<vmem>>, vector<1x32xf32>,
    %c0_91 = arith.constant 0 : index
    %169 = arith.index_cast %c3_i32 : i32 to index
    %c0_92 = arith.constant 0 : index
    %170 = vector.load %arg17[%c0_91, %169, %c0_92] : memref<1x8x32xf32, #tpu.memory_space<vmem>>, vector<1x1x32xf32>
    %171 = vector.shape_cast %170 : vector<1x1x32xf32> to vector<1x32xf32>
    %172 = vector.shape_cast %166 : vector<1x32xf32> to vector<1x1x32xf32>
    tpu.vector_store %arg17[%c0_91, %169, %c0_92], %172 {strides = array<i32>} : memref<1x8x32xf32, #tpu.memory_space<vmem>>, vector<1x1x32xf32>,
    %c4_i32 = arith.constant 4 : i32
    %c0_93 = arith.constant 0 : index
    %c0_94 = arith.constant 0 : index
    %173 = vector.load %arg19[%c0_93, %c0_94] : memref<1x32xf32, #tpu.memory_space<vmem>>, vector<1x32xf32>
    %174 = arith.index_cast %c4_i32 : i32 to index
    %c0_95 = arith.constant 0 : index
    %175 = vector.load %arg18[%174, %c0_95] : memref<8x128xf32, #tpu.memory_space<vmem>>, vector<1x128xf32>
    %176 = arith.truncf %173 : vector<1x32xf32> to vector<1x32xbf16>
    %cst_96 = arith.constant dense<0.000000e+00> : vector<1x128xf32>
    %177 = tpu.matmul %176, %56, %cst_96 {dimension_numbers = #tpu.dot_dimension_numbers<[1], [0], [0], [1], [0, 0, 1, 1], [], []>} : vector<1x32xbf16>, vector<32x128xbf16>, vector<1x128xf32> -> vector<1x128xf32>
    %178 = arith.addf %175, %177 : vector<1x128xf32>
    %179 = arith.negf %178 : vector<1x128xf32>
    %180 = math.exp %179 : vector<1x128xf32>
    %cst_97 = arith.constant 1.000000e+00 : f32
    %181 = vector.broadcast %cst_97 : f32 to vector<1x128xf32>
    %182 = arith.addf %181, %180 : vector<1x128xf32>
    %183 = arith.divf %181, %182 : vector<1x128xf32>
    %184 = math.tanh %178 : vector<1x128xf32>
    %185 = vector.extract_strided_slice %183 {offsets = [0, 0], sizes = [1, 32], strides = [1, 1]} : vector<1x128xf32> to vector<1x32xf32>
    %186 = vector.extract_strided_slice %183 {offsets = [0, 32], sizes = [1, 32], strides = [1, 1]} : vector<1x128xf32> to vector<1x32xf32>
    %187 = vector.extract_strided_slice %184 {offsets = [0, 64], sizes = [1, 32], strides = [1, 1]} : vector<1x128xf32> to vector<1x32xf32>
    %188 = vector.extract_strided_slice %183 {offsets = [0, 96], sizes = [1, 32], strides = [1, 1]} : vector<1x128xf32> to vector<1x32xf32>
    %c0_98 = arith.constant 0 : index
    %c0_99 = arith.constant 0 : index
    %189 = vector.load %arg20[%c0_98, %c0_99] : memref<1x32xf32, #tpu.memory_space<vmem>>, vector<1x32xf32>
    %190 = arith.mulf %186, %189 : vector<1x32xf32>
    %191 = arith.mulf %185, %187 : vector<1x32xf32>
    %192 = arith.addf %190, %191 : vector<1x32xf32>
    %193 = math.tanh %192 : vector<1x32xf32>
    %194 = arith.mulf %188, %193 : vector<1x32xf32>
    %c0_100 = arith.constant 0 : index
    %c0_101 = arith.constant 0 : index
    %195 = vector.load %arg19[%c0_100, %c0_101] : memref<1x32xf32, #tpu.memory_space<vmem>>, vector<1x32xf32>
    tpu.vector_store %arg19[%c0_100, %c0_101], %194 {strides = array<i32>} : memref<1x32xf32, #tpu.memory_space<vmem>>, vector<1x32xf32>,
    %c0_102 = arith.constant 0 : index
    %c0_103 = arith.constant 0 : index
    %196 = vector.load %arg20[%c0_102, %c0_103] : memref<1x32xf32, #tpu.memory_space<vmem>>, vector<1x32xf32>
    tpu.vector_store %arg20[%c0_102, %c0_103], %192 {strides = array<i32>} : memref<1x32xf32, #tpu.memory_space<vmem>>, vector<1x32xf32>,
    %c0_104 = arith.constant 0 : index
    %197 = arith.index_cast %c4_i32 : i32 to index
    %c0_105 = arith.constant 0 : index
    %198 = vector.load %arg17[%c0_104, %197, %c0_105] : memref<1x8x32xf32, #tpu.memory_space<vmem>>, vector<1x1x32xf32>
    %199 = vector.shape_cast %198 : vector<1x1x32xf32> to vector<1x32xf32>
    %200 = vector.shape_cast %194 : vector<1x32xf32> to vector<1x1x32xf32>
    tpu.vector_store %arg17[%c0_104, %197, %c0_105], %200 {strides = array<i32>} : memref<1x8x32xf32, #tpu.memory_space<vmem>>, vector<1x1x32xf32>,
    %c5_i32 = arith.constant 5 : i32
    %c0_106 = arith.constant 0 : index
    %c0_107 = arith.constant 0 : index
    %201 = vector.load %arg19[%c0_106, %c0_107] : memref<1x32xf32, #tpu.memory_space<vmem>>, vector<1x32xf32>
    %202 = arith.index_cast %c5_i32 : i32 to index
    %c0_108 = arith.constant 0 : index
    %203 = vector.load %arg18[%202, %c0_108] : memref<8x128xf32, #tpu.memory_space<vmem>>, vector<1x128xf32>
    %204 = arith.truncf %201 : vector<1x32xf32> to vector<1x32xbf16>
    %cst_109 = arith.constant dense<0.000000e+00> : vector<1x128xf32>
    %205 = tpu.matmul %204, %56, %cst_109 {dimension_numbers = #tpu.dot_dimension_numbers<[1], [0], [0], [1], [0, 0, 1, 1], [], []>} : vector<1x32xbf16>, vector<32x128xbf16>, vector<1x128xf32> -> vector<1x128xf32>
    %206 = arith.addf %203, %205 : vector<1x128xf32>
    %207 = arith.negf %206 : vector<1x128xf32>
    %208 = math.exp %207 : vector<1x128xf32>
    %cst_110 = arith.constant 1.000000e+00 : f32
    %209 = vector.broadcast %cst_110 : f32 to vector<1x128xf32>
    %210 = arith.addf %209, %208 : vector<1x128xf32>
    %211 = arith.divf %209, %210 : vector<1x128xf32>
    %212 = math.tanh %206 : vector<1x128xf32>
    %213 = vector.extract_strided_slice %211 {offsets = [0, 0], sizes = [1, 32], strides = [1, 1]} : vector<1x128xf32> to vector<1x32xf32>
    %214 = vector.extract_strided_slice %211 {offsets = [0, 32], sizes = [1, 32], strides = [1, 1]} : vector<1x128xf32> to vector<1x32xf32>
    %215 = vector.extract_strided_slice %212 {offsets = [0, 64], sizes = [1, 32], strides = [1, 1]} : vector<1x128xf32> to vector<1x32xf32>
    %216 = vector.extract_strided_slice %211 {offsets = [0, 96], sizes = [1, 32], strides = [1, 1]} : vector<1x128xf32> to vector<1x32xf32>
    %c0_111 = arith.constant 0 : index
    %c0_112 = arith.constant 0 : index
    %217 = vector.load %arg20[%c0_111, %c0_112] : memref<1x32xf32, #tpu.memory_space<vmem>>, vector<1x32xf32>
    %218 = arith.mulf %214, %217 : vector<1x32xf32>
    %219 = arith.mulf %213, %215 : vector<1x32xf32>
    %220 = arith.addf %218, %219 : vector<1x32xf32>
    %221 = math.tanh %220 : vector<1x32xf32>
    %222 = arith.mulf %216, %221 : vector<1x32xf32>
    %c0_113 = arith.constant 0 : index
    %c0_114 = arith.constant 0 : index
    %223 = vector.load %arg19[%c0_113, %c0_114] : memref<1x32xf32, #tpu.memory_space<vmem>>, vector<1x32xf32>
    tpu.vector_store %arg19[%c0_113, %c0_114], %222 {strides = array<i32>} : memref<1x32xf32, #tpu.memory_space<vmem>>, vector<1x32xf32>,
    %c0_115 = arith.constant 0 : index
    %c0_116 = arith.constant 0 : index
    %224 = vector.load %arg20[%c0_115, %c0_116] : memref<1x32xf32, #tpu.memory_space<vmem>>, vector<1x32xf32>
    tpu.vector_store %arg20[%c0_115, %c0_116], %220 {strides = array<i32>} : memref<1x32xf32, #tpu.memory_space<vmem>>, vector<1x32xf32>,
    %c0_117 = arith.constant 0 : index
    %225 = arith.index_cast %c5_i32 : i32 to index
    %c0_118 = arith.constant 0 : index
    %226 = vector.load %arg17[%c0_117, %225, %c0_118] : memref<1x8x32xf32, #tpu.memory_space<vmem>>, vector<1x1x32xf32>
    %227 = vector.shape_cast %226 : vector<1x1x32xf32> to vector<1x32xf32>
    %228 = vector.shape_cast %222 : vector<1x32xf32> to vector<1x1x32xf32>
    tpu.vector_store %arg17[%c0_117, %225, %c0_118], %228 {strides = array<i32>} : memref<1x8x32xf32, #tpu.memory_space<vmem>>, vector<1x1x32xf32>,
    %c6_i32 = arith.constant 6 : i32
    %c0_119 = arith.constant 0 : index
    %c0_120 = arith.constant 0 : index
    %229 = vector.load %arg19[%c0_119, %c0_120] : memref<1x32xf32, #tpu.memory_space<vmem>>, vector<1x32xf32>
    %230 = arith.index_cast %c6_i32 : i32 to index
    %c0_121 = arith.constant 0 : index
    %231 = vector.load %arg18[%230, %c0_121] : memref<8x128xf32, #tpu.memory_space<vmem>>, vector<1x128xf32>
    %232 = arith.truncf %229 : vector<1x32xf32> to vector<1x32xbf16>
    %cst_122 = arith.constant dense<0.000000e+00> : vector<1x128xf32>
    %233 = tpu.matmul %232, %56, %cst_122 {dimension_numbers = #tpu.dot_dimension_numbers<[1], [0], [0], [1], [0, 0, 1, 1], [], []>} : vector<1x32xbf16>, vector<32x128xbf16>, vector<1x128xf32> -> vector<1x128xf32>
    %234 = arith.addf %231, %233 : vector<1x128xf32>
    %235 = arith.negf %234 : vector<1x128xf32>
    %236 = math.exp %235 : vector<1x128xf32>
    %cst_123 = arith.constant 1.000000e+00 : f32
    %237 = vector.broadcast %cst_123 : f32 to vector<1x128xf32>
    %238 = arith.addf %237, %236 : vector<1x128xf32>
    %239 = arith.divf %237, %238 : vector<1x128xf32>
    %240 = math.tanh %234 : vector<1x128xf32>
    %241 = vector.extract_strided_slice %239 {offsets = [0, 0], sizes = [1, 32], strides = [1, 1]} : vector<1x128xf32> to vector<1x32xf32>
    %242 = vector.extract_strided_slice %239 {offsets = [0, 32], sizes = [1, 32], strides = [1, 1]} : vector<1x128xf32> to vector<1x32xf32>
    %243 = vector.extract_strided_slice %240 {offsets = [0, 64], sizes = [1, 32], strides = [1, 1]} : vector<1x128xf32> to vector<1x32xf32>
    %244 = vector.extract_strided_slice %239 {offsets = [0, 96], sizes = [1, 32], strides = [1, 1]} : vector<1x128xf32> to vector<1x32xf32>
    %c0_124 = arith.constant 0 : index
    %c0_125 = arith.constant 0 : index
    %245 = vector.load %arg20[%c0_124, %c0_125] : memref<1x32xf32, #tpu.memory_space<vmem>>, vector<1x32xf32>
    %246 = arith.mulf %242, %245 : vector<1x32xf32>
    %247 = arith.mulf %241, %243 : vector<1x32xf32>
    %248 = arith.addf %246, %247 : vector<1x32xf32>
    %249 = math.tanh %248 : vector<1x32xf32>
    %250 = arith.mulf %244, %249 : vector<1x32xf32>
    %c0_126 = arith.constant 0 : index
    %c0_127 = arith.constant 0 : index
    %251 = vector.load %arg19[%c0_126, %c0_127] : memref<1x32xf32, #tpu.memory_space<vmem>>, vector<1x32xf32>
    tpu.vector_store %arg19[%c0_126, %c0_127], %250 {strides = array<i32>} : memref<1x32xf32, #tpu.memory_space<vmem>>, vector<1x32xf32>,
    %c0_128 = arith.constant 0 : index
    %c0_129 = arith.constant 0 : index
    %252 = vector.load %arg20[%c0_128, %c0_129] : memref<1x32xf32, #tpu.memory_space<vmem>>, vector<1x32xf32>
    tpu.vector_store %arg20[%c0_128, %c0_129], %248 {strides = array<i32>} : memref<1x32xf32, #tpu.memory_space<vmem>>, vector<1x32xf32>,
    %c0_130 = arith.constant 0 : index
    %253 = arith.index_cast %c6_i32 : i32 to index
    %c0_131 = arith.constant 0 : index
    %254 = vector.load %arg17[%c0_130, %253, %c0_131] : memref<1x8x32xf32, #tpu.memory_space<vmem>>, vector<1x1x32xf32>
    %255 = vector.shape_cast %254 : vector<1x1x32xf32> to vector<1x32xf32>
    %256 = vector.shape_cast %250 : vector<1x32xf32> to vector<1x1x32xf32>
    tpu.vector_store %arg17[%c0_130, %253, %c0_131], %256 {strides = array<i32>} : memref<1x8x32xf32, #tpu.memory_space<vmem>>, vector<1x1x32xf32>,
    %c7_i32 = arith.constant 7 : i32
    %c0_132 = arith.constant 0 : index
    %c0_133 = arith.constant 0 : index
    %257 = vector.load %arg19[%c0_132, %c0_133] : memref<1x32xf32, #tpu.memory_space<vmem>>, vector<1x32xf32>
    %258 = arith.index_cast %c7_i32 : i32 to index
    %c0_134 = arith.constant 0 : index
    %259 = vector.load %arg18[%258, %c0_134] : memref<8x128xf32, #tpu.memory_space<vmem>>, vector<1x128xf32>
    %260 = arith.truncf %257 : vector<1x32xf32> to vector<1x32xbf16>
    %cst_135 = arith.constant dense<0.000000e+00> : vector<1x128xf32>
    %261 = tpu.matmul %260, %56, %cst_135 {dimension_numbers = #tpu.dot_dimension_numbers<[1], [0], [0], [1], [0, 0, 1, 1], [], []>} : vector<1x32xbf16>, vector<32x128xbf16>, vector<1x128xf32> -> vector<1x128xf32>
    %262 = arith.addf %259, %261 : vector<1x128xf32>
    %263 = arith.negf %262 : vector<1x128xf32>
    %264 = math.exp %263 : vector<1x128xf32>
    %cst_136 = arith.constant 1.000000e+00 : f32
    %265 = vector.broadcast %cst_136 : f32 to vector<1x128xf32>
    %266 = arith.addf %265, %264 : vector<1x128xf32>
    %267 = arith.divf %265, %266 : vector<1x128xf32>
    %268 = math.tanh %262 : vector<1x128xf32>
    %269 = vector.extract_strided_slice %267 {offsets = [0, 0], sizes = [1, 32], strides = [1, 1]} : vector<1x128xf32> to vector<1x32xf32>
    %270 = vector.extract_strided_slice %267 {offsets = [0, 32], sizes = [1, 32], strides = [1, 1]} : vector<1x128xf32> to vector<1x32xf32>
    %271 = vector.extract_strided_slice %268 {offsets = [0, 64], sizes = [1, 32], strides = [1, 1]} : vector<1x128xf32> to vector<1x32xf32>
    %272 = vector.extract_strided_slice %267 {offsets = [0, 96], sizes = [1, 32], strides = [1, 1]} : vector<1x128xf32> to vector<1x32xf32>
    %c0_137 = arith.constant 0 : index
    %c0_138 = arith.constant 0 : index
    %273 = vector.load %arg20[%c0_137, %c0_138] : memref<1x32xf32, #tpu.memory_space<vmem>>, vector<1x32xf32>
    %274 = arith.mulf %270, %273 : vector<1x32xf32>
    %275 = arith.mulf %269, %271 : vector<1x32xf32>
    %276 = arith.addf %274, %275 : vector<1x32xf32>
    %277 = math.tanh %276 : vector<1x32xf32>
    %278 = arith.mulf %272, %277 : vector<1x32xf32>
    %c0_139 = arith.constant 0 : index
    %c0_140 = arith.constant 0 : index
    %279 = vector.load %arg19[%c0_139, %c0_140] : memref<1x32xf32, #tpu.memory_space<vmem>>, vector<1x32xf32>
    tpu.vector_store %arg19[%c0_139, %c0_140], %278 {strides = array<i32>} : memref<1x32xf32, #tpu.memory_space<vmem>>, vector<1x32xf32>,
    %c0_141 = arith.constant 0 : index
    %c0_142 = arith.constant 0 : index
    %280 = vector.load %arg20[%c0_141, %c0_142] : memref<1x32xf32, #tpu.memory_space<vmem>>, vector<1x32xf32>
    tpu.vector_store %arg20[%c0_141, %c0_142], %276 {strides = array<i32>} : memref<1x32xf32, #tpu.memory_space<vmem>>, vector<1x32xf32>,
    %c0_143 = arith.constant 0 : index
    %281 = arith.index_cast %c7_i32 : i32 to index
    %c0_144 = arith.constant 0 : index
    %282 = vector.load %arg17[%c0_143, %281, %c0_144] : memref<1x8x32xf32, #tpu.memory_space<vmem>>, vector<1x1x32xf32>
    %283 = vector.shape_cast %282 : vector<1x1x32xf32> to vector<1x32xf32>
    %284 = vector.shape_cast %278 : vector<1x32xf32> to vector<1x1x32xf32>
    tpu.vector_store %arg17[%c0_143, %281, %c0_144], %284 {strides = array<i32>} : memref<1x8x32xf32, #tpu.memory_space<vmem>>, vector<1x1x32xf32>,
    %c8_i32 = arith.constant 8 : i32
    %c0_145 = arith.constant 0 : index
    %c0_146 = arith.constant 0 : index
    %c0_147 = arith.constant 0 : index
    %285 = vector.load %arg17[%c0_145, %c0_146, %c0_147] : memref<1x8x32xf32, #tpu.memory_space<vmem>>, vector<1x8x32xf32>
    %286 = vector.shape_cast %285 : vector<1x8x32xf32> to vector<8x32xf32>
    %c0_148 = arith.constant 0 : index
    %c0_149 = arith.constant 0 : index
    %287 = vector.load %arg13[%c0_148, %c0_149] : memref<1x32xf32, #tpu.memory_space<vmem>>, vector<1x32xf32>
    %c0_150 = arith.constant 0 : index
    %c0_151 = arith.constant 0 : index
    %288 = vector.load %arg14[%c0_150, %c0_151] : memref<1x32xf32, #tpu.memory_space<vmem>>, vector<1x32xf32>
    %cst_152 = arith.constant dense<0.000000e+00> : vector<8xf32>
    %289 = vector.multi_reduction <add>, %286, %cst_152 [1] : vector<8x32xf32> to vector<8xf32>
    %290 = vector.shape_cast %289 : vector<8xf32> to vector<8x1xf32>
    %cst_153 = arith.constant 3.200000e+01 : f32
    %291 = vector.broadcast %cst_153 : f32 to vector<8x1xf32>
    %292 = arith.divf %290, %291 : vector<8x1xf32>
    %293 = vector.broadcast %292 : vector<8x1xf32> to vector<8x32xf32>
    %294 = arith.subf %286, %293 : vector<8x32xf32>
    %295 = arith.mulf %294, %294 : vector<8x32xf32>
    %cst_154 = arith.constant dense<0.000000e+00> : vector<8xf32>
    %296 = vector.multi_reduction <add>, %295, %cst_154 [1] : vector<8x32xf32> to vector<8xf32>
    %297 = vector.shape_cast %296 : vector<8xf32> to vector<8x1xf32>
    %cst_155 = arith.constant 3.200000e+01 : f32
    %298 = vector.broadcast %cst_155 : f32 to vector<8x1xf32>
    %299 = arith.divf %297, %298 : vector<8x1xf32>
    %300 = vector.broadcast %292 : vector<8x1xf32> to vector<8x32xf32>
    %301 = arith.subf %286, %300 : vector<8x32xf32>
    %cst_156 = arith.constant 9.99999974E-6 : f32
    %302 = vector.broadcast %cst_156 : f32 to vector<8x1xf32>
    %303 = arith.addf %299, %302 : vector<8x1xf32>
    %304 = math.rsqrt %303 : vector<8x1xf32>
    %305 = vector.broadcast %304 : vector<8x1xf32> to vector<8x32xf32>
    %306 = arith.mulf %301, %305 : vector<8x32xf32>
    %307 = vector.broadcast %287 : vector<1x32xf32> to vector<8x32xf32>
    %308 = arith.mulf %306, %307 : vector<8x32xf32>
    %309 = vector.broadcast %288 : vector<1x32xf32> to vector<8x32xf32>
    %310 = arith.addf %308, %309 : vector<8x32xf32>
    %311 = arith.addf %310, %48 : vector<8x32xf32>
    %c0_157 = arith.constant 0 : index
    %c0_158 = arith.constant 0 : index
    %312 = vector.load %arg15[%c0_157, %c0_158] : memref<1x32xf32, #tpu.memory_space<vmem>>, vector<1x32xf32>
    %c0_159 = arith.constant 0 : index
    %c0_160 = arith.constant 0 : index
    %313 = vector.load %arg16[%c0_159, %c0_160] : memref<1x32xf32, #tpu.memory_space<vmem>>, vector<1x32xf32>
    %cst_161 = arith.constant dense<0.000000e+00> : vector<8xf32>
    %314 = vector.multi_reduction <add>, %311, %cst_161 [1] : vector<8x32xf32> to vector<8xf32>
    %315 = vector.shape_cast %314 : vector<8xf32> to vector<8x1xf32>
    %cst_162 = arith.constant 3.200000e+01 : f32
    %316 = vector.broadcast %cst_162 : f32 to vector<8x1xf32>
    %317 = arith.divf %315, %316 : vector<8x1xf32>
    %318 = vector.broadcast %317 : vector<8x1xf32> to vector<8x32xf32>
    %319 = arith.subf %311, %318 : vector<8x32xf32>
    %320 = arith.mulf %319, %319 : vector<8x32xf32>
    %cst_163 = arith.constant dense<0.000000e+00> : vector<8xf32>
    %321 = vector.multi_reduction <add>, %320, %cst_163 [1] : vector<8x32xf32> to vector<8xf32>
    %322 = vector.shape_cast %321 : vector<8xf32> to vector<8x1xf32>
    %cst_164 = arith.constant 3.200000e+01 : f32
    %323 = vector.broadcast %cst_164 : f32 to vector<8x1xf32>
    %324 = arith.divf %322, %323 : vector<8x1xf32>
    %325 = vector.broadcast %317 : vector<8x1xf32> to vector<8x32xf32>
    %326 = arith.subf %311, %325 : vector<8x32xf32>
    %cst_165 = arith.constant 9.99999974E-6 : f32
    %327 = vector.broadcast %cst_165 : f32 to vector<8x1xf32>
    %328 = arith.addf %324, %327 : vector<8x1xf32>
    %329 = math.rsqrt %328 : vector<8x1xf32>
    %330 = vector.broadcast %329 : vector<8x1xf32> to vector<8x32xf32>
    %331 = arith.mulf %326, %330 : vector<8x32xf32>
    %332 = vector.broadcast %312 : vector<1x32xf32> to vector<8x32xf32>
    %333 = arith.mulf %331, %332 : vector<8x32xf32>
    %334 = vector.broadcast %313 : vector<1x32xf32> to vector<8x32xf32>
    %335 = arith.addf %333, %334 : vector<8x32xf32>
    %c0_166 = arith.constant 0 : index
    %c0_167 = arith.constant 0 : index
    %c0_168 = arith.constant 0 : index
    %336 = vector.load %arg17[%c0_166, %c0_167, %c0_168] : memref<1x8x32xf32, #tpu.memory_space<vmem>>, vector<1x8x32xf32>
    %337 = vector.shape_cast %336 : vector<1x8x32xf32> to vector<8x32xf32>
    %338 = vector.shape_cast %335 : vector<8x32xf32> to vector<1x8x32xf32>
    tpu.vector_store %arg17[%c0_166, %c0_167, %c0_168], %338 {strides = array<i32>} : memref<1x8x32xf32, #tpu.memory_space<vmem>>, vector<1x8x32xf32>,
    return
  }
  func.func @transform_0(%arg0: i32) -> (i32, i32, i32) {
    %c0_i32 = arith.constant 0 : i32
    %c0_i32_0 = arith.constant 0 : i32
    %c0_i32_1 = arith.constant 0 : i32
    return %arg0, %c0_i32, %c0_i32_0 : i32, i32, i32
  }
  func.func @transform_1(%arg0: i32) -> (i32, i32) {
    %c0_i32 = arith.constant 0 : i32
    %c0_i32_0 = arith.constant 0 : i32
    %c0_i32_1 = arith.constant 0 : i32
    return %c0_i32, %c0_i32_0 : i32, i32
  }
  func.func @transform_2(%arg0: i32) -> (i32, i32) {
    %c0_i32 = arith.constant 0 : i32
    %c0_i32_0 = arith.constant 0 : i32
    %c0_i32_1 = arith.constant 0 : i32
    return %c0_i32, %c0_i32_0 : i32, i32
  }
  func.func @transform_3(%arg0: i32) -> (i32, i32) {
    %c0_i32 = arith.constant 0 : i32
    %c0_i32_0 = arith.constant 0 : i32
    %c0_i32_1 = arith.constant 0 : i32
    return %c0_i32, %c0_i32_0 : i32, i32
  }
  func.func @transform_4(%arg0: i32) -> (i32, i32) {
    %c0_i32 = arith.constant 0 : i32
    %c0_i32_0 = arith.constant 0 : i32
    %c0_i32_1 = arith.constant 0 : i32
    return %c0_i32, %c0_i32_0 : i32, i32
  }
  func.func @transform_5(%arg0: i32) -> (i32, i32) {
    %c0_i32 = arith.constant 0 : i32
    %c0_i32_0 = arith.constant 0 : i32
    %c0_i32_1 = arith.constant 0 : i32
    return %c0_i32, %c0_i32_0 : i32, i32
  }
  func.func @transform_6(%arg0: i32) -> (i32, i32) {
    %c0_i32 = arith.constant 0 : i32
    %c0_i32_0 = arith.constant 0 : i32
    %c0_i32_1 = arith.constant 0 : i32
    return %c0_i32, %c0_i32_0 : i32, i32
  }
  func.func @transform_7(%arg0: i32) -> (i32, i32) {
    %c0_i32 = arith.constant 0 : i32
    %c0_i32_0 = arith.constant 0 : i32
    %c0_i32_1 = arith.constant 0 : i32
    return %c0_i32, %c0_i32_0 : i32, i32
  }
  func.func @transform_8(%arg0: i32) -> (i32, i32) {
    %c0_i32 = arith.constant 0 : i32
    %c0_i32_0 = arith.constant 0 : i32
    %c0_i32_1 = arith.constant 0 : i32
    return %c0_i32, %c0_i32_0 : i32, i32
  }
  func.func @transform_9(%arg0: i32) -> (i32, i32) {
    %c0_i32 = arith.constant 0 : i32
    %c0_i32_0 = arith.constant 0 : i32
    %c0_i32_1 = arith.constant 0 : i32
    return %c0_i32, %c0_i32_0 : i32, i32
  }
  func.func @transform_10(%arg0: i32) -> (i32, i32) {
    %c0_i32 = arith.constant 0 : i32
    %c0_i32_0 = arith.constant 0 : i32
    %c0_i32_1 = arith.constant 0 : i32
    return %c0_i32, %c0_i32_0 : i32, i32
  }
  func.func @transform_11(%arg0: i32) -> (i32, i32) {
    %c0_i32 = arith.constant 0 : i32
    %c0_i32_0 = arith.constant 0 : i32
    %c0_i32_1 = arith.constant 0 : i32
    return %c0_i32, %c0_i32_0 : i32, i32
  }
  func.func @transform_12(%arg0: i32) -> (i32, i32) {
    %c0_i32 = arith.constant 0 : i32
    %c0_i32_0 = arith.constant 0 : i32
    %c0_i32_1 = arith.constant 0 : i32
    return %c0_i32, %c0_i32_0 : i32, i32
  }
  func.func @transform_13(%arg0: i32) -> (i32, i32) {
    %c0_i32 = arith.constant 0 : i32
    %c0_i32_0 = arith.constant 0 : i32
    %c0_i32_1 = arith.constant 0 : i32
    return %c0_i32, %c0_i32_0 : i32, i32
  }
  func.func @transform_14(%arg0: i32) -> (i32, i32) {
    %c0_i32 = arith.constant 0 : i32
    %c0_i32_0 = arith.constant 0 : i32
    %c0_i32_1 = arith.constant 0 : i32
    return %c0_i32, %c0_i32_0 : i32, i32
  }
  func.func @transform_15(%arg0: i32) -> (i32, i32) {
    %c0_i32 = arith.constant 0 : i32
    %c0_i32_0 = arith.constant 0 : i32
    %c0_i32_1 = arith.constant 0 : i32
    return %c0_i32, %c0_i32_0 : i32, i32
  }
  func.func @transform_16(%arg0: i32) -> (i32, i32, i32) {
    %c0_i32 = arith.constant 0 : i32
    %c0_i32_0 = arith.constant 0 : i32
    %c0_i32_1 = arith.constant 0 : i32
    return %arg0, %c0_i32, %c0_i32_0 : i32, i32, i32
  }
}

module attributes {stable_mosaic.version = 11 : i64} {
  func.func @kernel(%arg0: i32, %arg1: memref<1x8x32xf32, #tpu.memory_space<vmem>>, %arg2: memref<32x64xbf16, #tpu.memory_space<vmem>>, %arg3: memref<1x64xf32, #tpu.memory_space<vmem>>, %arg4: memref<1x1xf32, #tpu.memory_space<vmem>>, %arg5: memref<64x32xbf16, #tpu.memory_space<vmem>>, %arg6: memref<1x32xf32, #tpu.memory_space<vmem>>, %arg7: memref<1x1xf32, #tpu.memory_space<vmem>>, %arg8: memref<1x32xf32, #tpu.memory_space<vmem>>, %arg9: memref<1x32xf32, #tpu.memory_space<vmem>>, %arg10: memref<32x128xbf16, #tpu.memory_space<vmem>>, %arg11: memref<1x128xf32, #tpu.memory_space<vmem>>, %arg12: memref<32x128xbf16, #tpu.memory_space<vmem>>, %arg13: memref<1x32xf32, #tpu.memory_space<vmem>>, %arg14: memref<1x32xf32, #tpu.memory_space<vmem>>, %arg15: memref<1x32xf32, #tpu.memory_space<vmem>>, %arg16: memref<1x32xf32, #tpu.memory_space<vmem>>, %arg17: memref<1x8x32xf32, #tpu.memory_space<vmem>>, %arg18: memref<8x128xf32, #tpu.memory_space<vmem>>, %arg19: memref<1x32xf32, #tpu.memory_space<vmem>>, %arg20: memref<1x32xf32, #tpu.memory_space<vmem>>) attributes {dimension_semantics = [#tpu.dimension_semantics<parallel>], iteration_bounds = array<i64: 2>, scalar_prefetch = 0 : i64, scratch_operands = 3 : i64, tpu.core_type = #tpu.core_type<tc>, window_params = [{transform_indices = @transform_0, window_bounds = array<i64: 1, 8, 32>}, {pipeline_mode = #tpu.pipeline_mode<synchronous>, transform_indices = @transform_1, window_bounds = array<i64: 32, 64>}, {pipeline_mode = #tpu.pipeline_mode<synchronous>, transform_indices = @transform_2, window_bounds = array<i64: 1, 64>}, {pipeline_mode = #tpu.pipeline_mode<synchronous>, transform_indices = @transform_3, window_bounds = array<i64: 1, 1>}, {pipeline_mode = #tpu.pipeline_mode<synchronous>, transform_indices = @transform_4, window_bounds = array<i64: 64, 32>}, {pipeline_mode = #tpu.pipeline_mode<synchronous>, transform_indices = @transform_5, window_bounds = array<i64: 1, 32>}, {pipeline_mode = #tpu.pipeline_mode<synchronous>, transform_indices = @transform_6, window_bounds = array<i64: 1, 1>}, {pipeline_mode = #tpu.pipeline_mode<synchronous>, transform_indices = @transform_7, window_bounds = array<i64: 1, 32>}, {pipeline_mode = #tpu.pipeline_mode<synchronous>, transform_indices = @transform_8, window_bounds = array<i64: 1, 32>}, {pipeline_mode = #tpu.pipeline_mode<synchronous>, transform_indices = @transform_9, window_bounds = array<i64: 32, 128>}, {pipeline_mode = #tpu.pipeline_mode<synchronous>, transform_indices = @transform_10, window_bounds = array<i64: 1, 128>}, {pipeline_mode = #tpu.pipeline_mode<synchronous>, transform_indices = @transform_11, window_bounds = array<i64: 32, 128>}, {pipeline_mode = #tpu.pipeline_mode<synchronous>, transform_indices = @transform_12, window_bounds = array<i64: 1, 32>}, {pipeline_mode = #tpu.pipeline_mode<synchronous>, transform_indices = @transform_13, window_bounds = array<i64: 1, 32>}, {pipeline_mode = #tpu.pipeline_mode<synchronous>, transform_indices = @transform_14, window_bounds = array<i64: 1, 32>}, {pipeline_mode = #tpu.pipeline_mode<synchronous>, transform_indices = @transform_15, window_bounds = array<i64: 1, 32>}, {transform_indices = @transform_16, window_bounds = array<i64: 1, 8, 32>}]} {
    %c0 = arith.constant 0 : index
    %c0_0 = arith.constant 0 : index
    %c0_1 = arith.constant 0 : index
    %0 = vector.load %arg1[%c0, %c0_0, %c0_1] : memref<1x8x32xf32, #tpu.memory_space<vmem>>, vector<1x8x32xf32>
    %1 = vector.shape_cast %0 : vector<1x8x32xf32> to vector<8x32xf32>
    %2 = arith.truncf %1 : vector<8x32xf32> to vector<8x32xbf16>
    %c0_2 = arith.constant 0 : index
    %c0_3 = arith.constant 0 : index
    %3 = vector.load %arg2[%c0_2, %c0_3] : memref<32x64xbf16, #tpu.memory_space<vmem>>, vector<32x64xbf16>
    %cst = arith.constant dense<0.000000e+00> : vector<8x64xf32>
    %4 = tpu.matmul %2, %3, %cst {dimension_numbers = #tpu.dot_dimension_numbers<[1], [0], [0], [1], [0, 0, 1, 1], [], []>} : vector<8x32xbf16>, vector<32x64xbf16>, vector<8x64xf32> -> vector<8x64xf32>
    %c0_4 = arith.constant 0 : index
    %c0_5 = arith.constant 0 : index
    %5 = vector.load %arg3[%c0_4, %c0_5] : memref<1x64xf32, #tpu.memory_space<vmem>>, vector<1x64xf32>
    %6 = vector.broadcast %5 : vector<1x64xf32> to vector<8x64xf32>
    %7 = arith.addf %4, %6 : vector<8x64xf32>
    %c0_6 = arith.constant 0 : index
    %c0_7 = arith.constant 0 : index
    %8 = vector.load %arg4[%c0_6, %c0_7] : memref<1x1xf32, #tpu.memory_space<vmem>>, vector<1x1xf32>
    %cst_8 = arith.constant 0.000000e+00 : f32
    %9 = vector.broadcast %cst_8 : f32 to vector<8x64xf32>
    %10 = arith.cmpf ogt, %7, %9 : vector<8x64xf32>
    %11 = vector.broadcast %8 : vector<1x1xf32> to vector<8x64xf32>
    %12 = arith.mulf %7, %11 : vector<8x64xf32>
    %13 = arith.select %10, %7, %12 : vector<8x64xi1>, vector<8x64xf32>
    %14 = arith.truncf %13 : vector<8x64xf32> to vector<8x64xbf16>
    %c0_9 = arith.constant 0 : index
    %c0_10 = arith.constant 0 : index
    %15 = vector.load %arg5[%c0_9, %c0_10] : memref<64x32xbf16, #tpu.memory_space<vmem>>, vector<64x32xbf16>
    %cst_11 = arith.constant dense<0.000000e+00> : vector<8x32xf32>
    %16 = tpu.matmul %14, %15, %cst_11 {dimension_numbers = #tpu.dot_dimension_numbers<[1], [0], [0], [1], [0, 0, 1, 1], [], []>} : vector<8x64xbf16>, vector<64x32xbf16>, vector<8x32xf32> -> vector<8x32xf32>
    %c0_12 = arith.constant 0 : index
    %c0_13 = arith.constant 0 : index
    %17 = vector.load %arg6[%c0_12, %c0_13] : memref<1x32xf32, #tpu.memory_space<vmem>>, vector<1x32xf32>
    %18 = vector.broadcast %17 : vector<1x32xf32> to vector<8x32xf32>
    %19 = arith.addf %16, %18 : vector<8x32xf32>
    %c0_14 = arith.constant 0 : index
    %c0_15 = arith.constant 0 : index
    %20 = vector.load %arg7[%c0_14, %c0_15] : memref<1x1xf32, #tpu.memory_space<vmem>>, vector<1x1xf32>
    %cst_16 = arith.constant 0.000000e+00 : f32
    %21 = vector.broadcast %cst_16 : f32 to vector<8x32xf32>
    %22 = arith.cmpf ogt, %19, %21 : vector<8x32xf32>
    %23 = vector.broadcast %20 : vector<1x1xf32> to vector<8x32xf32>
    %24 = arith.mulf %19, %23 : vector<8x32xf32>
    %25 = arith.select %22, %19, %24 : vector<8x32xi1>, vector<8x32xf32>
    %c0_17 = arith.constant 0 : index
    %c0_18 = arith.constant 0 : index
    %26 = vector.load %arg8[%c0_17, %c0_18] : memref<1x32xf32, #tpu.memory_space<vmem>>, vector<1x32xf32>
    %c0_19 = arith.constant 0 : index
    %c0_20 = arith.constant 0 : index
    %27 = vector.load %arg9[%c0_19, %c0_20] : memref<1x32xf32, #tpu.memory_space<vmem>>, vector<1x32xf32>
    %cst_21 = arith.constant dense<0.000000e+00> : vector<8xf32>
    %28 = vector.multi_reduction <add>, %25, %cst_21 [1] : vector<8x32xf32> to vector<8xf32>
    %29 = vector.shape_cast %28 : vector<8xf32> to vector<8x1xf32>
    %cst_22 = arith.constant 3.200000e+01 : f32
    %30 = vector.broadcast %cst_22 : f32 to vector<8x1xf32>
    %31 = arith.divf %29, %30 : vector<8x1xf32>
    %32 = vector.broadcast %31 : vector<8x1xf32> to vector<8x32xf32>
    %33 = arith.subf %25, %32 : vector<8x32xf32>
    %34 = arith.mulf %33, %33 : vector<8x32xf32>
    %cst_23 = arith.constant dense<0.000000e+00> : vector<8xf32>
    %35 = vector.multi_reduction <add>, %34, %cst_23 [1] : vector<8x32xf32> to vector<8xf32>
    %36 = vector.shape_cast %35 : vector<8xf32> to vector<8x1xf32>
    %cst_24 = arith.constant 3.200000e+01 : f32
    %37 = vector.broadcast %cst_24 : f32 to vector<8x1xf32>
    %38 = arith.divf %36, %37 : vector<8x1xf32>
    %39 = vector.broadcast %31 : vector<8x1xf32> to vector<8x32xf32>
    %40 = arith.subf %25, %39 : vector<8x32xf32>
    %cst_25 = arith.constant 9.99999974E-6 : f32
    %41 = vector.broadcast %cst_25 : f32 to vector<8x1xf32>
    %42 = arith.addf %38, %41 : vector<8x1xf32>
    %43 = math.rsqrt %42 : vector<8x1xf32>
    %44 = vector.broadcast %43 : vector<8x1xf32> to vector<8x32xf32>
    %45 = arith.mulf %40, %44 : vector<8x32xf32>
    %46 = vector.broadcast %26 : vector<1x32xf32> to vector<8x32xf32>
    %47 = arith.mulf %45, %46 : vector<8x32xf32>
    %48 = vector.broadcast %27 : vector<1x32xf32> to vector<8x32xf32>
    %49 = arith.addf %47, %48 : vector<8x32xf32>
    %50 = arith.truncf %49 : vector<8x32xf32> to vector<8x32xbf16>
    %c0_26 = arith.constant 0 : index
    %c0_27 = arith.constant 0 : index
    %51 = vector.load %arg10[%c0_26, %c0_27] : memref<32x128xbf16, #tpu.memory_space<vmem>>, vector<32x128xbf16>
    %cst_28 = arith.constant dense<0.000000e+00> : vector<8x128xf32>
    %52 = tpu.matmul %50, %51, %cst_28 {dimension_numbers = #tpu.dot_dimension_numbers<[1], [0], [0], [1], [0, 0, 1, 1], [], []>} : vector<8x32xbf16>, vector<32x128xbf16>, vector<8x128xf32> -> vector<8x128xf32>
    %c0_29 = arith.constant 0 : index
    %c0_30 = arith.constant 0 : index
    %53 = vector.load %arg11[%c0_29, %c0_30] : memref<1x128xf32, #tpu.memory_space<vmem>>, vector<1x128xf32>
    %54 = vector.broadcast %53 : vector<1x128xf32> to vector<8x128xf32>
    %55 = arith.addf %52, %54 : vector<8x128xf32>
    %c0_31 = arith.constant 0 : index
    %c0_32 = arith.constant 0 : index
    %56 = vector.load %arg18[%c0_31, %c0_32] : memref<8x128xf32, #tpu.memory_space<vmem>>, vector<8x128xf32>
    tpu.vector_store %arg18[%c0_31, %c0_32], %55 {strides = array<i32>} : memref<8x128xf32, #tpu.memory_space<vmem>>, vector<8x128xf32>,
    %c0_33 = arith.constant 0 : index
    %c0_34 = arith.constant 0 : index
    %57 = vector.load %arg12[%c0_33, %c0_34] : memref<32x128xbf16, #tpu.memory_space<vmem>>, vector<32x128xbf16>
    %cst_35 = arith.constant 0.000000e+00 : f32
    %58 = vector.broadcast %cst_35 : f32 to vector<1x32xf32>
    %c0_36 = arith.constant 0 : index
    %c0_37 = arith.constant 0 : index
    %59 = vector.load %arg19[%c0_36, %c0_37] : memref<1x32xf32, #tpu.memory_space<vmem>>, vector<1x32xf32>
    tpu.vector_store %arg19[%c0_36, %c0_37], %58 {strides = array<i32>} : memref<1x32xf32, #tpu.memory_space<vmem>>, vector<1x32xf32>,
    %cst_38 = arith.constant 0.000000e+00 : f32
    %60 = vector.broadcast %cst_38 : f32 to vector<1x32xf32>
    %c0_39 = arith.constant 0 : index
    %c0_40 = arith.constant 0 : index
    %61 = vector.load %arg20[%c0_39, %c0_40] : memref<1x32xf32, #tpu.memory_space<vmem>>, vector<1x32xf32>
    tpu.vector_store %arg20[%c0_39, %c0_40], %60 {strides = array<i32>} : memref<1x32xf32, #tpu.memory_space<vmem>>, vector<1x32xf32>,
    %c0_i32 = arith.constant 0 : i32
    %c0_41 = arith.constant 0 : index
    %c0_42 = arith.constant 0 : index
    %62 = vector.load %arg19[%c0_41, %c0_42] : memref<1x32xf32, #tpu.memory_space<vmem>>, vector<1x32xf32>
    %63 = arith.index_cast %c0_i32 : i32 to index
    %c0_43 = arith.constant 0 : index
    %64 = vector.load %arg18[%63, %c0_43] : memref<8x128xf32, #tpu.memory_space<vmem>>, vector<1x128xf32>
    %65 = arith.truncf %62 : vector<1x32xf32> to vector<1x32xbf16>
    %cst_44 = arith.constant dense<0.000000e+00> : vector<1x128xf32>
    %66 = tpu.matmul %65, %57, %cst_44 {dimension_numbers = #tpu.dot_dimension_numbers<[1], [0], [0], [1], [0, 0, 1, 1], [], []>} : vector<1x32xbf16>, vector<32x128xbf16>, vector<1x128xf32> -> vector<1x128xf32>
    %67 = arith.addf %64, %66 : vector<1x128xf32>
    %68 = arith.negf %67 : vector<1x128xf32>
    %69 = math.exp %68 : vector<1x128xf32>
    %cst_45 = arith.constant 1.000000e+00 : f32
    %70 = vector.broadcast %cst_45 : f32 to vector<1x128xf32>
    %71 = arith.addf %70, %69 : vector<1x128xf32>
    %72 = arith.divf %70, %71 : vector<1x128xf32>
    %73 = math.tanh %67 : vector<1x128xf32>
    %74 = vector.extract_strided_slice %72 {offsets = [0, 0], sizes = [1, 32], strides = [1, 1]} : vector<1x128xf32> to vector<1x32xf32>
    %75 = vector.extract_strided_slice %72 {offsets = [0, 32], sizes = [1, 32], strides = [1, 1]} : vector<1x128xf32> to vector<1x32xf32>
    %76 = vector.extract_strided_slice %73 {offsets = [0, 64], sizes = [1, 32], strides = [1, 1]} : vector<1x128xf32> to vector<1x32xf32>
    %77 = vector.extract_strided_slice %72 {offsets = [0, 96], sizes = [1, 32], strides = [1, 1]} : vector<1x128xf32> to vector<1x32xf32>
    %c0_46 = arith.constant 0 : index
    %c0_47 = arith.constant 0 : index
    %78 = vector.load %arg20[%c0_46, %c0_47] : memref<1x32xf32, #tpu.memory_space<vmem>>, vector<1x32xf32>
    %79 = arith.mulf %75, %78 : vector<1x32xf32>
    %80 = arith.mulf %74, %76 : vector<1x32xf32>
    %81 = arith.addf %79, %80 : vector<1x32xf32>
    %82 = math.tanh %81 : vector<1x32xf32>
    %83 = arith.mulf %77, %82 : vector<1x32xf32>
    %c0_48 = arith.constant 0 : index
    %c0_49 = arith.constant 0 : index
    %84 = vector.load %arg19[%c0_48, %c0_49] : memref<1x32xf32, #tpu.memory_space<vmem>>, vector<1x32xf32>
    tpu.vector_store %arg19[%c0_48, %c0_49], %83 {strides = array<i32>} : memref<1x32xf32, #tpu.memory_space<vmem>>, vector<1x32xf32>,
    %c0_50 = arith.constant 0 : index
    %c0_51 = arith.constant 0 : index
    %85 = vector.load %arg20[%c0_50, %c0_51] : memref<1x32xf32, #tpu.memory_space<vmem>>, vector<1x32xf32>
    tpu.vector_store %arg20[%c0_50, %c0_51], %81 {strides = array<i32>} : memref<1x32xf32, #tpu.memory_space<vmem>>, vector<1x32xf32>,
    %c0_52 = arith.constant 0 : index
    %86 = arith.index_cast %c0_i32 : i32 to index
    %c0_53 = arith.constant 0 : index
    %87 = vector.load %arg17[%c0_52, %86, %c0_53] : memref<1x8x32xf32, #tpu.memory_space<vmem>>, vector<1x1x32xf32>
    %88 = vector.shape_cast %87 : vector<1x1x32xf32> to vector<1x32xf32>
    %89 = vector.shape_cast %83 : vector<1x32xf32> to vector<1x1x32xf32>
    tpu.vector_store %arg17[%c0_52, %86, %c0_53], %89 {strides = array<i32>} : memref<1x8x32xf32, #tpu.memory_space<vmem>>, vector<1x1x32xf32>,
    %c1_i32 = arith.constant 1 : i32
    %c0_54 = arith.constant 0 : index
    %c0_55 = arith.constant 0 : index
    %90 = vector.load %arg19[%c0_54, %c0_55] : memref<1x32xf32, #tpu.memory_space<vmem>>, vector<1x32xf32>
    %91 = arith.index_cast %c1_i32 : i32 to index
    %c0_56 = arith.constant 0 : index
    %92 = vector.load %arg18[%91, %c0_56] : memref<8x128xf32, #tpu.memory_space<vmem>>, vector<1x128xf32>
    %93 = arith.truncf %90 : vector<1x32xf32> to vector<1x32xbf16>
    %cst_57 = arith.constant dense<0.000000e+00> : vector<1x128xf32>
    %94 = tpu.matmul %93, %57, %cst_57 {dimension_numbers = #tpu.dot_dimension_numbers<[1], [0], [0], [1], [0, 0, 1, 1], [], []>} : vector<1x32xbf16>, vector<32x128xbf16>, vector<1x128xf32> -> vector<1x128xf32>
    %95 = arith.addf %92, %94 : vector<1x128xf32>
    %96 = arith.negf %95 : vector<1x128xf32>
    %97 = math.exp %96 : vector<1x128xf32>
    %cst_58 = arith.constant 1.000000e+00 : f32
    %98 = vector.broadcast %cst_58 : f32 to vector<1x128xf32>
    %99 = arith.addf %98, %97 : vector<1x128xf32>
    %100 = arith.divf %98, %99 : vector<1x128xf32>
    %101 = math.tanh %95 : vector<1x128xf32>
    %102 = vector.extract_strided_slice %100 {offsets = [0, 0], sizes = [1, 32], strides = [1, 1]} : vector<1x128xf32> to vector<1x32xf32>
    %103 = vector.extract_strided_slice %100 {offsets = [0, 32], sizes = [1, 32], strides = [1, 1]} : vector<1x128xf32> to vector<1x32xf32>
    %104 = vector.extract_strided_slice %101 {offsets = [0, 64], sizes = [1, 32], strides = [1, 1]} : vector<1x128xf32> to vector<1x32xf32>
    %105 = vector.extract_strided_slice %100 {offsets = [0, 96], sizes = [1, 32], strides = [1, 1]} : vector<1x128xf32> to vector<1x32xf32>
    %c0_59 = arith.constant 0 : index
    %c0_60 = arith.constant 0 : index
    %106 = vector.load %arg20[%c0_59, %c0_60] : memref<1x32xf32, #tpu.memory_space<vmem>>, vector<1x32xf32>
    %107 = arith.mulf %103, %106 : vector<1x32xf32>
    %108 = arith.mulf %102, %104 : vector<1x32xf32>
    %109 = arith.addf %107, %108 : vector<1x32xf32>
    %110 = math.tanh %109 : vector<1x32xf32>
    %111 = arith.mulf %105, %110 : vector<1x32xf32>
    %c0_61 = arith.constant 0 : index
    %c0_62 = arith.constant 0 : index
    %112 = vector.load %arg19[%c0_61, %c0_62] : memref<1x32xf32, #tpu.memory_space<vmem>>, vector<1x32xf32>
    tpu.vector_store %arg19[%c0_61, %c0_62], %111 {strides = array<i32>} : memref<1x32xf32, #tpu.memory_space<vmem>>, vector<1x32xf32>,
    %c0_63 = arith.constant 0 : index
    %c0_64 = arith.constant 0 : index
    %113 = vector.load %arg20[%c0_63, %c0_64] : memref<1x32xf32, #tpu.memory_space<vmem>>, vector<1x32xf32>
    tpu.vector_store %arg20[%c0_63, %c0_64], %109 {strides = array<i32>} : memref<1x32xf32, #tpu.memory_space<vmem>>, vector<1x32xf32>,
    %c0_65 = arith.constant 0 : index
    %114 = arith.index_cast %c1_i32 : i32 to index
    %c0_66 = arith.constant 0 : index
    %115 = vector.load %arg17[%c0_65, %114, %c0_66] : memref<1x8x32xf32, #tpu.memory_space<vmem>>, vector<1x1x32xf32>
    %116 = vector.shape_cast %115 : vector<1x1x32xf32> to vector<1x32xf32>
    %117 = vector.shape_cast %111 : vector<1x32xf32> to vector<1x1x32xf32>
    tpu.vector_store %arg17[%c0_65, %114, %c0_66], %117 {strides = array<i32>} : memref<1x8x32xf32, #tpu.memory_space<vmem>>, vector<1x1x32xf32>,
    %c2_i32 = arith.constant 2 : i32
    %c0_67 = arith.constant 0 : index
    %c0_68 = arith.constant 0 : index
    %118 = vector.load %arg19[%c0_67, %c0_68] : memref<1x32xf32, #tpu.memory_space<vmem>>, vector<1x32xf32>
    %119 = arith.index_cast %c2_i32 : i32 to index
    %c0_69 = arith.constant 0 : index
    %120 = vector.load %arg18[%119, %c0_69] : memref<8x128xf32, #tpu.memory_space<vmem>>, vector<1x128xf32>
    %121 = arith.truncf %118 : vector<1x32xf32> to vector<1x32xbf16>
    %cst_70 = arith.constant dense<0.000000e+00> : vector<1x128xf32>
    %122 = tpu.matmul %121, %57, %cst_70 {dimension_numbers = #tpu.dot_dimension_numbers<[1], [0], [0], [1], [0, 0, 1, 1], [], []>} : vector<1x32xbf16>, vector<32x128xbf16>, vector<1x128xf32> -> vector<1x128xf32>
    %123 = arith.addf %120, %122 : vector<1x128xf32>
    %124 = arith.negf %123 : vector<1x128xf32>
    %125 = math.exp %124 : vector<1x128xf32>
    %cst_71 = arith.constant 1.000000e+00 : f32
    %126 = vector.broadcast %cst_71 : f32 to vector<1x128xf32>
    %127 = arith.addf %126, %125 : vector<1x128xf32>
    %128 = arith.divf %126, %127 : vector<1x128xf32>
    %129 = math.tanh %123 : vector<1x128xf32>
    %130 = vector.extract_strided_slice %128 {offsets = [0, 0], sizes = [1, 32], strides = [1, 1]} : vector<1x128xf32> to vector<1x32xf32>
    %131 = vector.extract_strided_slice %128 {offsets = [0, 32], sizes = [1, 32], strides = [1, 1]} : vector<1x128xf32> to vector<1x32xf32>
    %132 = vector.extract_strided_slice %129 {offsets = [0, 64], sizes = [1, 32], strides = [1, 1]} : vector<1x128xf32> to vector<1x32xf32>
    %133 = vector.extract_strided_slice %128 {offsets = [0, 96], sizes = [1, 32], strides = [1, 1]} : vector<1x128xf32> to vector<1x32xf32>
    %c0_72 = arith.constant 0 : index
    %c0_73 = arith.constant 0 : index
    %134 = vector.load %arg20[%c0_72, %c0_73] : memref<1x32xf32, #tpu.memory_space<vmem>>, vector<1x32xf32>
    %135 = arith.mulf %131, %134 : vector<1x32xf32>
    %136 = arith.mulf %130, %132 : vector<1x32xf32>
    %137 = arith.addf %135, %136 : vector<1x32xf32>
    %138 = math.tanh %137 : vector<1x32xf32>
    %139 = arith.mulf %133, %138 : vector<1x32xf32>
    %c0_74 = arith.constant 0 : index
    %c0_75 = arith.constant 0 : index
    %140 = vector.load %arg19[%c0_74, %c0_75] : memref<1x32xf32, #tpu.memory_space<vmem>>, vector<1x32xf32>
    tpu.vector_store %arg19[%c0_74, %c0_75], %139 {strides = array<i32>} : memref<1x32xf32, #tpu.memory_space<vmem>>, vector<1x32xf32>,
    %c0_76 = arith.constant 0 : index
    %c0_77 = arith.constant 0 : index
    %141 = vector.load %arg20[%c0_76, %c0_77] : memref<1x32xf32, #tpu.memory_space<vmem>>, vector<1x32xf32>
    tpu.vector_store %arg20[%c0_76, %c0_77], %137 {strides = array<i32>} : memref<1x32xf32, #tpu.memory_space<vmem>>, vector<1x32xf32>,
    %c0_78 = arith.constant 0 : index
    %142 = arith.index_cast %c2_i32 : i32 to index
    %c0_79 = arith.constant 0 : index
    %143 = vector.load %arg17[%c0_78, %142, %c0_79] : memref<1x8x32xf32, #tpu.memory_space<vmem>>, vector<1x1x32xf32>
    %144 = vector.shape_cast %143 : vector<1x1x32xf32> to vector<1x32xf32>
    %145 = vector.shape_cast %139 : vector<1x32xf32> to vector<1x1x32xf32>
    tpu.vector_store %arg17[%c0_78, %142, %c0_79], %145 {strides = array<i32>} : memref<1x8x32xf32, #tpu.memory_space<vmem>>, vector<1x1x32xf32>,
    %c3_i32 = arith.constant 3 : i32
    %c0_80 = arith.constant 0 : index
    %c0_81 = arith.constant 0 : index
    %146 = vector.load %arg19[%c0_80, %c0_81] : memref<1x32xf32, #tpu.memory_space<vmem>>, vector<1x32xf32>
    %147 = arith.index_cast %c3_i32 : i32 to index
    %c0_82 = arith.constant 0 : index
    %148 = vector.load %arg18[%147, %c0_82] : memref<8x128xf32, #tpu.memory_space<vmem>>, vector<1x128xf32>
    %149 = arith.truncf %146 : vector<1x32xf32> to vector<1x32xbf16>
    %cst_83 = arith.constant dense<0.000000e+00> : vector<1x128xf32>
    %150 = tpu.matmul %149, %57, %cst_83 {dimension_numbers = #tpu.dot_dimension_numbers<[1], [0], [0], [1], [0, 0, 1, 1], [], []>} : vector<1x32xbf16>, vector<32x128xbf16>, vector<1x128xf32> -> vector<1x128xf32>
    %151 = arith.addf %148, %150 : vector<1x128xf32>
    %152 = arith.negf %151 : vector<1x128xf32>
    %153 = math.exp %152 : vector<1x128xf32>
    %cst_84 = arith.constant 1.000000e+00 : f32
    %154 = vector.broadcast %cst_84 : f32 to vector<1x128xf32>
    %155 = arith.addf %154, %153 : vector<1x128xf32>
    %156 = arith.divf %154, %155 : vector<1x128xf32>
    %157 = math.tanh %151 : vector<1x128xf32>
    %158 = vector.extract_strided_slice %156 {offsets = [0, 0], sizes = [1, 32], strides = [1, 1]} : vector<1x128xf32> to vector<1x32xf32>
    %159 = vector.extract_strided_slice %156 {offsets = [0, 32], sizes = [1, 32], strides = [1, 1]} : vector<1x128xf32> to vector<1x32xf32>
    %160 = vector.extract_strided_slice %157 {offsets = [0, 64], sizes = [1, 32], strides = [1, 1]} : vector<1x128xf32> to vector<1x32xf32>
    %161 = vector.extract_strided_slice %156 {offsets = [0, 96], sizes = [1, 32], strides = [1, 1]} : vector<1x128xf32> to vector<1x32xf32>
    %c0_85 = arith.constant 0 : index
    %c0_86 = arith.constant 0 : index
    %162 = vector.load %arg20[%c0_85, %c0_86] : memref<1x32xf32, #tpu.memory_space<vmem>>, vector<1x32xf32>
    %163 = arith.mulf %159, %162 : vector<1x32xf32>
    %164 = arith.mulf %158, %160 : vector<1x32xf32>
    %165 = arith.addf %163, %164 : vector<1x32xf32>
    %166 = math.tanh %165 : vector<1x32xf32>
    %167 = arith.mulf %161, %166 : vector<1x32xf32>
    %c0_87 = arith.constant 0 : index
    %c0_88 = arith.constant 0 : index
    %168 = vector.load %arg19[%c0_87, %c0_88] : memref<1x32xf32, #tpu.memory_space<vmem>>, vector<1x32xf32>
    tpu.vector_store %arg19[%c0_87, %c0_88], %167 {strides = array<i32>} : memref<1x32xf32, #tpu.memory_space<vmem>>, vector<1x32xf32>,
    %c0_89 = arith.constant 0 : index
    %c0_90 = arith.constant 0 : index
    %169 = vector.load %arg20[%c0_89, %c0_90] : memref<1x32xf32, #tpu.memory_space<vmem>>, vector<1x32xf32>
    tpu.vector_store %arg20[%c0_89, %c0_90], %165 {strides = array<i32>} : memref<1x32xf32, #tpu.memory_space<vmem>>, vector<1x32xf32>,
    %c0_91 = arith.constant 0 : index
    %170 = arith.index_cast %c3_i32 : i32 to index
    %c0_92 = arith.constant 0 : index
    %171 = vector.load %arg17[%c0_91, %170, %c0_92] : memref<1x8x32xf32, #tpu.memory_space<vmem>>, vector<1x1x32xf32>
    %172 = vector.shape_cast %171 : vector<1x1x32xf32> to vector<1x32xf32>
    %173 = vector.shape_cast %167 : vector<1x32xf32> to vector<1x1x32xf32>
    tpu.vector_store %arg17[%c0_91, %170, %c0_92], %173 {strides = array<i32>} : memref<1x8x32xf32, #tpu.memory_space<vmem>>, vector<1x1x32xf32>,
    %c4_i32 = arith.constant 4 : i32
    %c0_93 = arith.constant 0 : index
    %c0_94 = arith.constant 0 : index
    %174 = vector.load %arg19[%c0_93, %c0_94] : memref<1x32xf32, #tpu.memory_space<vmem>>, vector<1x32xf32>
    %175 = arith.index_cast %c4_i32 : i32 to index
    %c0_95 = arith.constant 0 : index
    %176 = vector.load %arg18[%175, %c0_95] : memref<8x128xf32, #tpu.memory_space<vmem>>, vector<1x128xf32>
    %177 = arith.truncf %174 : vector<1x32xf32> to vector<1x32xbf16>
    %cst_96 = arith.constant dense<0.000000e+00> : vector<1x128xf32>
    %178 = tpu.matmul %177, %57, %cst_96 {dimension_numbers = #tpu.dot_dimension_numbers<[1], [0], [0], [1], [0, 0, 1, 1], [], []>} : vector<1x32xbf16>, vector<32x128xbf16>, vector<1x128xf32> -> vector<1x128xf32>
    %179 = arith.addf %176, %178 : vector<1x128xf32>
    %180 = arith.negf %179 : vector<1x128xf32>
    %181 = math.exp %180 : vector<1x128xf32>
    %cst_97 = arith.constant 1.000000e+00 : f32
    %182 = vector.broadcast %cst_97 : f32 to vector<1x128xf32>
    %183 = arith.addf %182, %181 : vector<1x128xf32>
    %184 = arith.divf %182, %183 : vector<1x128xf32>
    %185 = math.tanh %179 : vector<1x128xf32>
    %186 = vector.extract_strided_slice %184 {offsets = [0, 0], sizes = [1, 32], strides = [1, 1]} : vector<1x128xf32> to vector<1x32xf32>
    %187 = vector.extract_strided_slice %184 {offsets = [0, 32], sizes = [1, 32], strides = [1, 1]} : vector<1x128xf32> to vector<1x32xf32>
    %188 = vector.extract_strided_slice %185 {offsets = [0, 64], sizes = [1, 32], strides = [1, 1]} : vector<1x128xf32> to vector<1x32xf32>
    %189 = vector.extract_strided_slice %184 {offsets = [0, 96], sizes = [1, 32], strides = [1, 1]} : vector<1x128xf32> to vector<1x32xf32>
    %c0_98 = arith.constant 0 : index
    %c0_99 = arith.constant 0 : index
    %190 = vector.load %arg20[%c0_98, %c0_99] : memref<1x32xf32, #tpu.memory_space<vmem>>, vector<1x32xf32>
    %191 = arith.mulf %187, %190 : vector<1x32xf32>
    %192 = arith.mulf %186, %188 : vector<1x32xf32>
    %193 = arith.addf %191, %192 : vector<1x32xf32>
    %194 = math.tanh %193 : vector<1x32xf32>
    %195 = arith.mulf %189, %194 : vector<1x32xf32>
    %c0_100 = arith.constant 0 : index
    %c0_101 = arith.constant 0 : index
    %196 = vector.load %arg19[%c0_100, %c0_101] : memref<1x32xf32, #tpu.memory_space<vmem>>, vector<1x32xf32>
    tpu.vector_store %arg19[%c0_100, %c0_101], %195 {strides = array<i32>} : memref<1x32xf32, #tpu.memory_space<vmem>>, vector<1x32xf32>,
    %c0_102 = arith.constant 0 : index
    %c0_103 = arith.constant 0 : index
    %197 = vector.load %arg20[%c0_102, %c0_103] : memref<1x32xf32, #tpu.memory_space<vmem>>, vector<1x32xf32>
    tpu.vector_store %arg20[%c0_102, %c0_103], %193 {strides = array<i32>} : memref<1x32xf32, #tpu.memory_space<vmem>>, vector<1x32xf32>,
    %c0_104 = arith.constant 0 : index
    %198 = arith.index_cast %c4_i32 : i32 to index
    %c0_105 = arith.constant 0 : index
    %199 = vector.load %arg17[%c0_104, %198, %c0_105] : memref<1x8x32xf32, #tpu.memory_space<vmem>>, vector<1x1x32xf32>
    %200 = vector.shape_cast %199 : vector<1x1x32xf32> to vector<1x32xf32>
    %201 = vector.shape_cast %195 : vector<1x32xf32> to vector<1x1x32xf32>
    tpu.vector_store %arg17[%c0_104, %198, %c0_105], %201 {strides = array<i32>} : memref<1x8x32xf32, #tpu.memory_space<vmem>>, vector<1x1x32xf32>,
    %c5_i32 = arith.constant 5 : i32
    %c0_106 = arith.constant 0 : index
    %c0_107 = arith.constant 0 : index
    %202 = vector.load %arg19[%c0_106, %c0_107] : memref<1x32xf32, #tpu.memory_space<vmem>>, vector<1x32xf32>
    %203 = arith.index_cast %c5_i32 : i32 to index
    %c0_108 = arith.constant 0 : index
    %204 = vector.load %arg18[%203, %c0_108] : memref<8x128xf32, #tpu.memory_space<vmem>>, vector<1x128xf32>
    %205 = arith.truncf %202 : vector<1x32xf32> to vector<1x32xbf16>
    %cst_109 = arith.constant dense<0.000000e+00> : vector<1x128xf32>
    %206 = tpu.matmul %205, %57, %cst_109 {dimension_numbers = #tpu.dot_dimension_numbers<[1], [0], [0], [1], [0, 0, 1, 1], [], []>} : vector<1x32xbf16>, vector<32x128xbf16>, vector<1x128xf32> -> vector<1x128xf32>
    %207 = arith.addf %204, %206 : vector<1x128xf32>
    %208 = arith.negf %207 : vector<1x128xf32>
    %209 = math.exp %208 : vector<1x128xf32>
    %cst_110 = arith.constant 1.000000e+00 : f32
    %210 = vector.broadcast %cst_110 : f32 to vector<1x128xf32>
    %211 = arith.addf %210, %209 : vector<1x128xf32>
    %212 = arith.divf %210, %211 : vector<1x128xf32>
    %213 = math.tanh %207 : vector<1x128xf32>
    %214 = vector.extract_strided_slice %212 {offsets = [0, 0], sizes = [1, 32], strides = [1, 1]} : vector<1x128xf32> to vector<1x32xf32>
    %215 = vector.extract_strided_slice %212 {offsets = [0, 32], sizes = [1, 32], strides = [1, 1]} : vector<1x128xf32> to vector<1x32xf32>
    %216 = vector.extract_strided_slice %213 {offsets = [0, 64], sizes = [1, 32], strides = [1, 1]} : vector<1x128xf32> to vector<1x32xf32>
    %217 = vector.extract_strided_slice %212 {offsets = [0, 96], sizes = [1, 32], strides = [1, 1]} : vector<1x128xf32> to vector<1x32xf32>
    %c0_111 = arith.constant 0 : index
    %c0_112 = arith.constant 0 : index
    %218 = vector.load %arg20[%c0_111, %c0_112] : memref<1x32xf32, #tpu.memory_space<vmem>>, vector<1x32xf32>
    %219 = arith.mulf %215, %218 : vector<1x32xf32>
    %220 = arith.mulf %214, %216 : vector<1x32xf32>
    %221 = arith.addf %219, %220 : vector<1x32xf32>
    %222 = math.tanh %221 : vector<1x32xf32>
    %223 = arith.mulf %217, %222 : vector<1x32xf32>
    %c0_113 = arith.constant 0 : index
    %c0_114 = arith.constant 0 : index
    %224 = vector.load %arg19[%c0_113, %c0_114] : memref<1x32xf32, #tpu.memory_space<vmem>>, vector<1x32xf32>
    tpu.vector_store %arg19[%c0_113, %c0_114], %223 {strides = array<i32>} : memref<1x32xf32, #tpu.memory_space<vmem>>, vector<1x32xf32>,
    %c0_115 = arith.constant 0 : index
    %c0_116 = arith.constant 0 : index
    %225 = vector.load %arg20[%c0_115, %c0_116] : memref<1x32xf32, #tpu.memory_space<vmem>>, vector<1x32xf32>
    tpu.vector_store %arg20[%c0_115, %c0_116], %221 {strides = array<i32>} : memref<1x32xf32, #tpu.memory_space<vmem>>, vector<1x32xf32>,
    %c0_117 = arith.constant 0 : index
    %226 = arith.index_cast %c5_i32 : i32 to index
    %c0_118 = arith.constant 0 : index
    %227 = vector.load %arg17[%c0_117, %226, %c0_118] : memref<1x8x32xf32, #tpu.memory_space<vmem>>, vector<1x1x32xf32>
    %228 = vector.shape_cast %227 : vector<1x1x32xf32> to vector<1x32xf32>
    %229 = vector.shape_cast %223 : vector<1x32xf32> to vector<1x1x32xf32>
    tpu.vector_store %arg17[%c0_117, %226, %c0_118], %229 {strides = array<i32>} : memref<1x8x32xf32, #tpu.memory_space<vmem>>, vector<1x1x32xf32>,
    %c6_i32 = arith.constant 6 : i32
    %c0_119 = arith.constant 0 : index
    %c0_120 = arith.constant 0 : index
    %230 = vector.load %arg19[%c0_119, %c0_120] : memref<1x32xf32, #tpu.memory_space<vmem>>, vector<1x32xf32>
    %231 = arith.index_cast %c6_i32 : i32 to index
    %c0_121 = arith.constant 0 : index
    %232 = vector.load %arg18[%231, %c0_121] : memref<8x128xf32, #tpu.memory_space<vmem>>, vector<1x128xf32>
    %233 = arith.truncf %230 : vector<1x32xf32> to vector<1x32xbf16>
    %cst_122 = arith.constant dense<0.000000e+00> : vector<1x128xf32>
    %234 = tpu.matmul %233, %57, %cst_122 {dimension_numbers = #tpu.dot_dimension_numbers<[1], [0], [0], [1], [0, 0, 1, 1], [], []>} : vector<1x32xbf16>, vector<32x128xbf16>, vector<1x128xf32> -> vector<1x128xf32>
    %235 = arith.addf %232, %234 : vector<1x128xf32>
    %236 = arith.negf %235 : vector<1x128xf32>
    %237 = math.exp %236 : vector<1x128xf32>
    %cst_123 = arith.constant 1.000000e+00 : f32
    %238 = vector.broadcast %cst_123 : f32 to vector<1x128xf32>
    %239 = arith.addf %238, %237 : vector<1x128xf32>
    %240 = arith.divf %238, %239 : vector<1x128xf32>
    %241 = math.tanh %235 : vector<1x128xf32>
    %242 = vector.extract_strided_slice %240 {offsets = [0, 0], sizes = [1, 32], strides = [1, 1]} : vector<1x128xf32> to vector<1x32xf32>
    %243 = vector.extract_strided_slice %240 {offsets = [0, 32], sizes = [1, 32], strides = [1, 1]} : vector<1x128xf32> to vector<1x32xf32>
    %244 = vector.extract_strided_slice %241 {offsets = [0, 64], sizes = [1, 32], strides = [1, 1]} : vector<1x128xf32> to vector<1x32xf32>
    %245 = vector.extract_strided_slice %240 {offsets = [0, 96], sizes = [1, 32], strides = [1, 1]} : vector<1x128xf32> to vector<1x32xf32>
    %c0_124 = arith.constant 0 : index
    %c0_125 = arith.constant 0 : index
    %246 = vector.load %arg20[%c0_124, %c0_125] : memref<1x32xf32, #tpu.memory_space<vmem>>, vector<1x32xf32>
    %247 = arith.mulf %243, %246 : vector<1x32xf32>
    %248 = arith.mulf %242, %244 : vector<1x32xf32>
    %249 = arith.addf %247, %248 : vector<1x32xf32>
    %250 = math.tanh %249 : vector<1x32xf32>
    %251 = arith.mulf %245, %250 : vector<1x32xf32>
    %c0_126 = arith.constant 0 : index
    %c0_127 = arith.constant 0 : index
    %252 = vector.load %arg19[%c0_126, %c0_127] : memref<1x32xf32, #tpu.memory_space<vmem>>, vector<1x32xf32>
    tpu.vector_store %arg19[%c0_126, %c0_127], %251 {strides = array<i32>} : memref<1x32xf32, #tpu.memory_space<vmem>>, vector<1x32xf32>,
    %c0_128 = arith.constant 0 : index
    %c0_129 = arith.constant 0 : index
    %253 = vector.load %arg20[%c0_128, %c0_129] : memref<1x32xf32, #tpu.memory_space<vmem>>, vector<1x32xf32>
    tpu.vector_store %arg20[%c0_128, %c0_129], %249 {strides = array<i32>} : memref<1x32xf32, #tpu.memory_space<vmem>>, vector<1x32xf32>,
    %c0_130 = arith.constant 0 : index
    %254 = arith.index_cast %c6_i32 : i32 to index
    %c0_131 = arith.constant 0 : index
    %255 = vector.load %arg17[%c0_130, %254, %c0_131] : memref<1x8x32xf32, #tpu.memory_space<vmem>>, vector<1x1x32xf32>
    %256 = vector.shape_cast %255 : vector<1x1x32xf32> to vector<1x32xf32>
    %257 = vector.shape_cast %251 : vector<1x32xf32> to vector<1x1x32xf32>
    tpu.vector_store %arg17[%c0_130, %254, %c0_131], %257 {strides = array<i32>} : memref<1x8x32xf32, #tpu.memory_space<vmem>>, vector<1x1x32xf32>,
    %c7_i32 = arith.constant 7 : i32
    %c0_132 = arith.constant 0 : index
    %c0_133 = arith.constant 0 : index
    %258 = vector.load %arg19[%c0_132, %c0_133] : memref<1x32xf32, #tpu.memory_space<vmem>>, vector<1x32xf32>
    %259 = arith.index_cast %c7_i32 : i32 to index
    %c0_134 = arith.constant 0 : index
    %260 = vector.load %arg18[%259, %c0_134] : memref<8x128xf32, #tpu.memory_space<vmem>>, vector<1x128xf32>
    %261 = arith.truncf %258 : vector<1x32xf32> to vector<1x32xbf16>
    %cst_135 = arith.constant dense<0.000000e+00> : vector<1x128xf32>
    %262 = tpu.matmul %261, %57, %cst_135 {dimension_numbers = #tpu.dot_dimension_numbers<[1], [0], [0], [1], [0, 0, 1, 1], [], []>} : vector<1x32xbf16>, vector<32x128xbf16>, vector<1x128xf32> -> vector<1x128xf32>
    %263 = arith.addf %260, %262 : vector<1x128xf32>
    %264 = arith.negf %263 : vector<1x128xf32>
    %265 = math.exp %264 : vector<1x128xf32>
    %cst_136 = arith.constant 1.000000e+00 : f32
    %266 = vector.broadcast %cst_136 : f32 to vector<1x128xf32>
    %267 = arith.addf %266, %265 : vector<1x128xf32>
    %268 = arith.divf %266, %267 : vector<1x128xf32>
    %269 = math.tanh %263 : vector<1x128xf32>
    %270 = vector.extract_strided_slice %268 {offsets = [0, 0], sizes = [1, 32], strides = [1, 1]} : vector<1x128xf32> to vector<1x32xf32>
    %271 = vector.extract_strided_slice %268 {offsets = [0, 32], sizes = [1, 32], strides = [1, 1]} : vector<1x128xf32> to vector<1x32xf32>
    %272 = vector.extract_strided_slice %269 {offsets = [0, 64], sizes = [1, 32], strides = [1, 1]} : vector<1x128xf32> to vector<1x32xf32>
    %273 = vector.extract_strided_slice %268 {offsets = [0, 96], sizes = [1, 32], strides = [1, 1]} : vector<1x128xf32> to vector<1x32xf32>
    %c0_137 = arith.constant 0 : index
    %c0_138 = arith.constant 0 : index
    %274 = vector.load %arg20[%c0_137, %c0_138] : memref<1x32xf32, #tpu.memory_space<vmem>>, vector<1x32xf32>
    %275 = arith.mulf %271, %274 : vector<1x32xf32>
    %276 = arith.mulf %270, %272 : vector<1x32xf32>
    %277 = arith.addf %275, %276 : vector<1x32xf32>
    %278 = math.tanh %277 : vector<1x32xf32>
    %279 = arith.mulf %273, %278 : vector<1x32xf32>
    %c0_139 = arith.constant 0 : index
    %c0_140 = arith.constant 0 : index
    %280 = vector.load %arg19[%c0_139, %c0_140] : memref<1x32xf32, #tpu.memory_space<vmem>>, vector<1x32xf32>
    tpu.vector_store %arg19[%c0_139, %c0_140], %279 {strides = array<i32>} : memref<1x32xf32, #tpu.memory_space<vmem>>, vector<1x32xf32>,
    %c0_141 = arith.constant 0 : index
    %c0_142 = arith.constant 0 : index
    %281 = vector.load %arg20[%c0_141, %c0_142] : memref<1x32xf32, #tpu.memory_space<vmem>>, vector<1x32xf32>
    tpu.vector_store %arg20[%c0_141, %c0_142], %277 {strides = array<i32>} : memref<1x32xf32, #tpu.memory_space<vmem>>, vector<1x32xf32>,
    %c0_143 = arith.constant 0 : index
    %282 = arith.index_cast %c7_i32 : i32 to index
    %c0_144 = arith.constant 0 : index
    %283 = vector.load %arg17[%c0_143, %282, %c0_144] : memref<1x8x32xf32, #tpu.memory_space<vmem>>, vector<1x1x32xf32>
    %284 = vector.shape_cast %283 : vector<1x1x32xf32> to vector<1x32xf32>
    %285 = vector.shape_cast %279 : vector<1x32xf32> to vector<1x1x32xf32>
    tpu.vector_store %arg17[%c0_143, %282, %c0_144], %285 {strides = array<i32>} : memref<1x8x32xf32, #tpu.memory_space<vmem>>, vector<1x1x32xf32>,
    %c8_i32 = arith.constant 8 : i32
    %c0_145 = arith.constant 0 : index
    %c0_146 = arith.constant 0 : index
    %c0_147 = arith.constant 0 : index
    %286 = vector.load %arg17[%c0_145, %c0_146, %c0_147] : memref<1x8x32xf32, #tpu.memory_space<vmem>>, vector<1x8x32xf32>
    %287 = vector.shape_cast %286 : vector<1x8x32xf32> to vector<8x32xf32>
    %c0_148 = arith.constant 0 : index
    %c0_149 = arith.constant 0 : index
    %288 = vector.load %arg13[%c0_148, %c0_149] : memref<1x32xf32, #tpu.memory_space<vmem>>, vector<1x32xf32>
    %c0_150 = arith.constant 0 : index
    %c0_151 = arith.constant 0 : index
    %289 = vector.load %arg14[%c0_150, %c0_151] : memref<1x32xf32, #tpu.memory_space<vmem>>, vector<1x32xf32>
    %cst_152 = arith.constant dense<0.000000e+00> : vector<8xf32>
    %290 = vector.multi_reduction <add>, %287, %cst_152 [1] : vector<8x32xf32> to vector<8xf32>
    %291 = vector.shape_cast %290 : vector<8xf32> to vector<8x1xf32>
    %cst_153 = arith.constant 3.200000e+01 : f32
    %292 = vector.broadcast %cst_153 : f32 to vector<8x1xf32>
    %293 = arith.divf %291, %292 : vector<8x1xf32>
    %294 = vector.broadcast %293 : vector<8x1xf32> to vector<8x32xf32>
    %295 = arith.subf %287, %294 : vector<8x32xf32>
    %296 = arith.mulf %295, %295 : vector<8x32xf32>
    %cst_154 = arith.constant dense<0.000000e+00> : vector<8xf32>
    %297 = vector.multi_reduction <add>, %296, %cst_154 [1] : vector<8x32xf32> to vector<8xf32>
    %298 = vector.shape_cast %297 : vector<8xf32> to vector<8x1xf32>
    %cst_155 = arith.constant 3.200000e+01 : f32
    %299 = vector.broadcast %cst_155 : f32 to vector<8x1xf32>
    %300 = arith.divf %298, %299 : vector<8x1xf32>
    %301 = vector.broadcast %293 : vector<8x1xf32> to vector<8x32xf32>
    %302 = arith.subf %287, %301 : vector<8x32xf32>
    %cst_156 = arith.constant 9.99999974E-6 : f32
    %303 = vector.broadcast %cst_156 : f32 to vector<8x1xf32>
    %304 = arith.addf %300, %303 : vector<8x1xf32>
    %305 = math.rsqrt %304 : vector<8x1xf32>
    %306 = vector.broadcast %305 : vector<8x1xf32> to vector<8x32xf32>
    %307 = arith.mulf %302, %306 : vector<8x32xf32>
    %308 = vector.broadcast %288 : vector<1x32xf32> to vector<8x32xf32>
    %309 = arith.mulf %307, %308 : vector<8x32xf32>
    %310 = vector.broadcast %289 : vector<1x32xf32> to vector<8x32xf32>
    %311 = arith.addf %309, %310 : vector<8x32xf32>
    %312 = arith.addf %311, %49 : vector<8x32xf32>
    %c0_157 = arith.constant 0 : index
    %c0_158 = arith.constant 0 : index
    %313 = vector.load %arg15[%c0_157, %c0_158] : memref<1x32xf32, #tpu.memory_space<vmem>>, vector<1x32xf32>
    %c0_159 = arith.constant 0 : index
    %c0_160 = arith.constant 0 : index
    %314 = vector.load %arg16[%c0_159, %c0_160] : memref<1x32xf32, #tpu.memory_space<vmem>>, vector<1x32xf32>
    %cst_161 = arith.constant dense<0.000000e+00> : vector<8xf32>
    %315 = vector.multi_reduction <add>, %312, %cst_161 [1] : vector<8x32xf32> to vector<8xf32>
    %316 = vector.shape_cast %315 : vector<8xf32> to vector<8x1xf32>
    %cst_162 = arith.constant 3.200000e+01 : f32
    %317 = vector.broadcast %cst_162 : f32 to vector<8x1xf32>
    %318 = arith.divf %316, %317 : vector<8x1xf32>
    %319 = vector.broadcast %318 : vector<8x1xf32> to vector<8x32xf32>
    %320 = arith.subf %312, %319 : vector<8x32xf32>
    %321 = arith.mulf %320, %320 : vector<8x32xf32>
    %cst_163 = arith.constant dense<0.000000e+00> : vector<8xf32>
    %322 = vector.multi_reduction <add>, %321, %cst_163 [1] : vector<8x32xf32> to vector<8xf32>
    %323 = vector.shape_cast %322 : vector<8xf32> to vector<8x1xf32>
    %cst_164 = arith.constant 3.200000e+01 : f32
    %324 = vector.broadcast %cst_164 : f32 to vector<8x1xf32>
    %325 = arith.divf %323, %324 : vector<8x1xf32>
    %326 = vector.broadcast %318 : vector<8x1xf32> to vector<8x32xf32>
    %327 = arith.subf %312, %326 : vector<8x32xf32>
    %cst_165 = arith.constant 9.99999974E-6 : f32
    %328 = vector.broadcast %cst_165 : f32 to vector<8x1xf32>
    %329 = arith.addf %325, %328 : vector<8x1xf32>
    %330 = math.rsqrt %329 : vector<8x1xf32>
    %331 = vector.broadcast %330 : vector<8x1xf32> to vector<8x32xf32>
    %332 = arith.mulf %327, %331 : vector<8x32xf32>
    %333 = vector.broadcast %313 : vector<1x32xf32> to vector<8x32xf32>
    %334 = arith.mulf %332, %333 : vector<8x32xf32>
    %335 = vector.broadcast %314 : vector<1x32xf32> to vector<8x32xf32>
    %336 = arith.addf %334, %335 : vector<8x32xf32>
    %c0_166 = arith.constant 0 : index
    %c0_167 = arith.constant 0 : index
    %c0_168 = arith.constant 0 : index
    %337 = vector.load %arg17[%c0_166, %c0_167, %c0_168] : memref<1x8x32xf32, #tpu.memory_space<vmem>>, vector<1x8x32xf32>
    %338 = vector.shape_cast %337 : vector<1x8x32xf32> to vector<8x32xf32>
    %339 = vector.shape_cast %336 : vector<8x32xf32> to vector<1x8x32xf32>
    tpu.vector_store %arg17[%c0_166, %c0_167, %c0_168], %339 {strides = array<i32>} : memref<1x8x32xf32, #tpu.memory_space<vmem>>, vector<1x8x32xf32>,
    return
  }
  func.func @transform_0(%arg0: i32) -> (i32, i32, i32) {
    %c0_i32 = arith.constant 0 : i32
    %c0_i32_0 = arith.constant 0 : i32
    %c0_i32_1 = arith.constant 0 : i32
    return %arg0, %c0_i32, %c0_i32_0 : i32, i32, i32
  }
  func.func @transform_1(%arg0: i32) -> (i32, i32) {
    %c0_i32 = arith.constant 0 : i32
    %c0_i32_0 = arith.constant 0 : i32
    %c0_i32_1 = arith.constant 0 : i32
    return %c0_i32, %c0_i32_0 : i32, i32
  }
  func.func @transform_2(%arg0: i32) -> (i32, i32) {
    %c0_i32 = arith.constant 0 : i32
    %c0_i32_0 = arith.constant 0 : i32
    %c0_i32_1 = arith.constant 0 : i32
    return %c0_i32, %c0_i32_0 : i32, i32
  }
  func.func @transform_3(%arg0: i32) -> (i32, i32) {
    %c0_i32 = arith.constant 0 : i32
    %c0_i32_0 = arith.constant 0 : i32
    %c0_i32_1 = arith.constant 0 : i32
    return %c0_i32, %c0_i32_0 : i32, i32
  }
  func.func @transform_4(%arg0: i32) -> (i32, i32) {
    %c0_i32 = arith.constant 0 : i32
    %c0_i32_0 = arith.constant 0 : i32
    %c0_i32_1 = arith.constant 0 : i32
    return %c0_i32, %c0_i32_0 : i32, i32
  }
  func.func @transform_5(%arg0: i32) -> (i32, i32) {
    %c0_i32 = arith.constant 0 : i32
    %c0_i32_0 = arith.constant 0 : i32
    %c0_i32_1 = arith.constant 0 : i32
    return %c0_i32, %c0_i32_0 : i32, i32
  }
  func.func @transform_6(%arg0: i32) -> (i32, i32) {
    %c0_i32 = arith.constant 0 : i32
    %c0_i32_0 = arith.constant 0 : i32
    %c0_i32_1 = arith.constant 0 : i32
    return %c0_i32, %c0_i32_0 : i32, i32
  }
  func.func @transform_7(%arg0: i32) -> (i32, i32) {
    %c0_i32 = arith.constant 0 : i32
    %c0_i32_0 = arith.constant 0 : i32
    %c0_i32_1 = arith.constant 0 : i32
    return %c0_i32, %c0_i32_0 : i32, i32
  }
  func.func @transform_8(%arg0: i32) -> (i32, i32) {
    %c0_i32 = arith.constant 0 : i32
    %c0_i32_0 = arith.constant 0 : i32
    %c0_i32_1 = arith.constant 0 : i32
    return %c0_i32, %c0_i32_0 : i32, i32
  }
  func.func @transform_9(%arg0: i32) -> (i32, i32) {
    %c0_i32 = arith.constant 0 : i32
    %c0_i32_0 = arith.constant 0 : i32
    %c0_i32_1 = arith.constant 0 : i32
    return %c0_i32, %c0_i32_0 : i32, i32
  }
  func.func @transform_10(%arg0: i32) -> (i32, i32) {
    %c0_i32 = arith.constant 0 : i32
    %c0_i32_0 = arith.constant 0 : i32
    %c0_i32_1 = arith.constant 0 : i32
    return %c0_i32, %c0_i32_0 : i32, i32
  }
  func.func @transform_11(%arg0: i32) -> (i32, i32) {
    %c0_i32 = arith.constant 0 : i32
    %c0_i32_0 = arith.constant 0 : i32
    %c0_i32_1 = arith.constant 0 : i32
    return %c0_i32, %c0_i32_0 : i32, i32
  }
  func.func @transform_12(%arg0: i32) -> (i32, i32) {
    %c0_i32 = arith.constant 0 : i32
    %c0_i32_0 = arith.constant 0 : i32
    %c0_i32_1 = arith.constant 0 : i32
    return %c0_i32, %c0_i32_0 : i32, i32
  }
  func.func @transform_13(%arg0: i32) -> (i32, i32) {
    %c0_i32 = arith.constant 0 : i32
    %c0_i32_0 = arith.constant 0 : i32
    %c0_i32_1 = arith.constant 0 : i32
    return %c0_i32, %c0_i32_0 : i32, i32
  }
  func.func @transform_14(%arg0: i32) -> (i32, i32) {
    %c0_i32 = arith.constant 0 : i32
    %c0_i32_0 = arith.constant 0 : i32
    %c0_i32_1 = arith.constant 0 : i32
    return %c0_i32, %c0_i32_0 : i32, i32
  }
  func.func @transform_15(%arg0: i32) -> (i32, i32) {
    %c0_i32 = arith.constant 0 : i32
    %c0_i32_0 = arith.constant 0 : i32
    %c0_i32_1 = arith.constant 0 : i32
    return %c0_i32, %c0_i32_0 : i32, i32
  }
  func.func @transform_16(%arg0: i32) -> (i32, i32, i32) {
    %c0_i32 = arith.constant 0 : i32
    %c0_i32_0 = arith.constant 0 : i32
    %c0_i32_1 = arith.constant 0 : i32
    return %arg0, %c0_i32, %c0_i32_0 : i32, i32, i32
  }
}

module attributes {stable_mosaic.version = 11 : i64} {
  func.func @kernel(%arg0: i32, %arg1: memref<2x32xf32, #tpu.memory_space<vmem>>, %arg2: memref<32x16xf32, #tpu.memory_space<vmem>>, %arg3: memref<1x16xf32, #tpu.memory_space<vmem>>, %arg4: memref<2x16xf32, #tpu.memory_space<vmem>>) attributes {dimension_semantics = [#tpu.dimension_semantics<parallel>], iteration_bounds = array<i64: 1>, scalar_prefetch = 0 : i64, scratch_operands = 0 : i64, tpu.core_type = #tpu.core_type<tc>, window_params = [{transform_indices = @transform_0, window_bounds = array<i64: 2, 32>}, {pipeline_mode = #tpu.pipeline_mode<synchronous>, transform_indices = @transform_1, window_bounds = array<i64: 32, 16>}, {pipeline_mode = #tpu.pipeline_mode<synchronous>, transform_indices = @transform_2, window_bounds = array<i64: 1, 16>}, {transform_indices = @transform_3, window_bounds = array<i64: 2, 16>}]} {
    %c0 = arith.constant 0 : index
    %c0_0 = arith.constant 0 : index
    %0 = vector.load %arg1[%c0, %c0_0] : memref<2x32xf32, #tpu.memory_space<vmem>>, vector<2x32xf32>
    %c0_1 = arith.constant 0 : index
    %c0_2 = arith.constant 0 : index
    %1 = vector.load %arg2[%c0_1, %c0_2] : memref<32x16xf32, #tpu.memory_space<vmem>>, vector<32x16xf32>
    %cst = arith.constant dense<0.000000e+00> : vector<2x16xf32>
    %2 = tpu.matmul %0, %1, %cst {dimension_numbers = #tpu.dot_dimension_numbers<[1], [0], [0], [1], [0, 0, 1, 1], [], []>} : vector<2x32xf32>, vector<32x16xf32>, vector<2x16xf32> -> vector<2x16xf32>
    %c0_3 = arith.constant 0 : index
    %c0_4 = arith.constant 0 : index
    %3 = vector.load %arg3[%c0_3, %c0_4] : memref<1x16xf32, #tpu.memory_space<vmem>>, vector<1x16xf32>
    %4 = vector.broadcast %3 : vector<1x16xf32> to vector<2x16xf32>
    %5 = arith.addf %2, %4 : vector<2x16xf32>
    %c0_5 = arith.constant 0 : index
    %c0_6 = arith.constant 0 : index
    %6 = vector.load %arg4[%c0_5, %c0_6] : memref<2x16xf32, #tpu.memory_space<vmem>>, vector<2x16xf32>
    tpu.vector_store %arg4[%c0_5, %c0_6], %5 {strides = array<i32>} : memref<2x16xf32, #tpu.memory_space<vmem>>, vector<2x16xf32>,
    return
  }
  func.func @transform_0(%arg0: i32) -> (i32, i32) {
    %c0_i32 = arith.constant 0 : i32
    %c0_i32_0 = arith.constant 0 : i32
    return %arg0, %c0_i32 : i32, i32
  }
  func.func @transform_1(%arg0: i32) -> (i32, i32) {
    %c0_i32 = arith.constant 0 : i32
    %c0_i32_0 = arith.constant 0 : i32
    %c0_i32_1 = arith.constant 0 : i32
    return %c0_i32, %c0_i32_0 : i32, i32
  }
  func.func @transform_2(%arg0: i32) -> (i32, i32) {
    %c0_i32 = arith.constant 0 : i32
    %c0_i32_0 = arith.constant 0 : i32
    %c0_i32_1 = arith.constant 0 : i32
    return %c0_i32, %c0_i32_0 : i32, i32
  }
  func.func @transform_3(%arg0: i32) -> (i32, i32) {
    %c0_i32 = arith.constant 0 : i32
    %c0_i32_0 = arith.constant 0 : i32
    return %arg0, %c0_i32 : i32, i32
  }
}

module attributes {stable_mosaic.version = 11 : i64} {
  func.func @kernel(%arg0: i32, %arg1: memref<1x8x32xf32, #tpu.memory_space<vmem>>, %arg2: memref<32x64xbf16, #tpu.memory_space<vmem>>, %arg3: memref<1x64xf32, #tpu.memory_space<vmem>>, %arg4: memref<1x8x64xf32, #tpu.memory_space<vmem>>, %arg5: memref<64x16xbf16, #tpu.memory_space<vmem>>, %arg6: memref<1x1xf32, #tpu.memory_space<vmem>>, %arg7: memref<1x1x72xf32, #tpu.memory_space<vmem>>) attributes {dimension_semantics = [#tpu.dimension_semantics<parallel>], iteration_bounds = array<i64: 2>, scalar_prefetch = 0 : i64, scratch_operands = 0 : i64, tpu.core_type = #tpu.core_type<tc>, window_params = [{transform_indices = @transform_0, window_bounds = array<i64: 1, 8, 32>}, {pipeline_mode = #tpu.pipeline_mode<synchronous>, transform_indices = @transform_1, window_bounds = array<i64: 32, 64>}, {pipeline_mode = #tpu.pipeline_mode<synchronous>, transform_indices = @transform_2, window_bounds = array<i64: 1, 64>}, {transform_indices = @transform_3, window_bounds = array<i64: 1, 8, 64>}, {pipeline_mode = #tpu.pipeline_mode<synchronous>, transform_indices = @transform_4, window_bounds = array<i64: 64, 16>}, {pipeline_mode = #tpu.pipeline_mode<synchronous>, transform_indices = @transform_5, window_bounds = array<i64: 1, 1>}, {transform_indices = @transform_6, window_bounds = array<i64: 1, 1, 72>}]} {
    %c0 = arith.constant 0 : index
    %c0_0 = arith.constant 0 : index
    %c0_1 = arith.constant 0 : index
    %0 = vector.load %arg1[%c0, %c0_0, %c0_1] : memref<1x8x32xf32, #tpu.memory_space<vmem>>, vector<1x8x32xf32>
    %1 = vector.shape_cast %0 : vector<1x8x32xf32> to vector<8x32xf32>
    %2 = arith.truncf %1 : vector<8x32xf32> to vector<8x32xbf16>
    %c0_2 = arith.constant 0 : index
    %c0_3 = arith.constant 0 : index
    %3 = vector.load %arg2[%c0_2, %c0_3] : memref<32x64xbf16, #tpu.memory_space<vmem>>, vector<32x64xbf16>
    %cst = arith.constant dense<0.000000e+00> : vector<8x64xf32>
    %4 = tpu.matmul %2, %3, %cst {dimension_numbers = #tpu.dot_dimension_numbers<[1], [0], [0], [1], [0, 0, 1, 1], [], []>} : vector<8x32xbf16>, vector<32x64xbf16>, vector<8x64xf32> -> vector<8x64xf32>
    %c0_4 = arith.constant 0 : index
    %c0_5 = arith.constant 0 : index
    %5 = vector.load %arg3[%c0_4, %c0_5] : memref<1x64xf32, #tpu.memory_space<vmem>>, vector<1x64xf32>
    %6 = vector.broadcast %5 : vector<1x64xf32> to vector<8x64xf32>
    %7 = arith.addf %4, %6 : vector<8x64xf32>
    %8 = arith.negf %7 : vector<8x64xf32>
    %9 = math.exp %8 : vector<8x64xf32>
    %cst_6 = arith.constant 1.000000e+00 : f32
    %10 = vector.broadcast %cst_6 : f32 to vector<8x64xf32>
    %11 = arith.addf %10, %9 : vector<8x64xf32>
    %12 = arith.divf %10, %11 : vector<8x64xf32>
    %c0_7 = arith.constant 0 : index
    %c0_8 = arith.constant 0 : index
    %c0_9 = arith.constant 0 : index
    %13 = vector.load %arg4[%c0_7, %c0_8, %c0_9] : memref<1x8x64xf32, #tpu.memory_space<vmem>>, vector<1x8x64xf32>
    %14 = vector.shape_cast %13 : vector<1x8x64xf32> to vector<8x64xf32>
    %15 = arith.mulf %14, %12 : vector<8x64xf32>
    %16 = arith.truncf %15 : vector<8x64xf32> to vector<8x64xbf16>
    %c0_10 = arith.constant 0 : index
    %c0_11 = arith.constant 0 : index
    %17 = vector.load %arg5[%c0_10, %c0_11] : memref<64x16xbf16, #tpu.memory_space<vmem>>, vector<64x16xbf16>
    %cst_12 = arith.constant dense<0.000000e+00> : vector<8x16xf32>
    %18 = tpu.matmul %16, %17, %cst_12 {dimension_numbers = #tpu.dot_dimension_numbers<[1], [0], [0], [1], [0, 0, 1, 1], [], []>} : vector<8x64xbf16>, vector<64x16xbf16>, vector<8x16xf32> -> vector<8x16xf32>
    %cst_13 = arith.constant 0.000000e+00 : f32
    %19 = vector.broadcast %cst_13 : f32 to vector<1x72xf32>
    %20 = vector.extract_strided_slice %18 {offsets = [0, 0], sizes = [1, 16], strides = [1, 1]} : vector<8x16xf32> to vector<1x16xf32>
    %cst_14 = arith.constant 0.000000e+00 : f32
    %21 = vector.broadcast %cst_14 : f32 to vector<1x56xf32>
    %22 = tpu.concatenate %20, %21 in 1 : vector<1x16xf32>, vector<1x56xf32> -> vector<1x72xf32>
    %23 = arith.addf %19, %22 : vector<1x72xf32>
    %24 = vector.extract_strided_slice %18 {offsets = [1, 0], sizes = [1, 16], strides = [1, 1]} : vector<8x16xf32> to vector<1x16xf32>
    %cst_15 = arith.constant 0.000000e+00 : f32
    %25 = vector.broadcast %cst_15 : f32 to vector<1x8xf32>
    %cst_16 = arith.constant 0.000000e+00 : f32
    %26 = vector.broadcast %cst_16 : f32 to vector<1x48xf32>
    %27 = tpu.concatenate %25, %24, %26 in 1 : vector<1x8xf32>, vector<1x16xf32>, vector<1x48xf32> -> vector<1x72xf32>
    %28 = arith.addf %23, %27 : vector<1x72xf32>
    %29 = vector.extract_strided_slice %18 {offsets = [2, 0], sizes = [1, 16], strides = [1, 1]} : vector<8x16xf32> to vector<1x16xf32>
    %cst_17 = arith.constant 0.000000e+00 : f32
    %30 = vector.broadcast %cst_17 : f32 to vector<1x16xf32>
    %cst_18 = arith.constant 0.000000e+00 : f32
    %31 = vector.broadcast %cst_18 : f32 to vector<1x40xf32>
    %32 = tpu.concatenate %30, %29, %31 in 1 : vector<1x16xf32>, vector<1x16xf32>, vector<1x40xf32> -> vector<1x72xf32>
    %33 = arith.addf %28, %32 : vector<1x72xf32>
    %34 = vector.extract_strided_slice %18 {offsets = [3, 0], sizes = [1, 16], strides = [1, 1]} : vector<8x16xf32> to vector<1x16xf32>
    %cst_19 = arith.constant 0.000000e+00 : f32
    %35 = vector.broadcast %cst_19 : f32 to vector<1x24xf32>
    %cst_20 = arith.constant 0.000000e+00 : f32
    %36 = vector.broadcast %cst_20 : f32 to vector<1x32xf32>
    %37 = tpu.concatenate %35, %34, %36 in 1 : vector<1x24xf32>, vector<1x16xf32>, vector<1x32xf32> -> vector<1x72xf32>
    %38 = arith.addf %33, %37 : vector<1x72xf32>
    %39 = vector.extract_strided_slice %18 {offsets = [4, 0], sizes = [1, 16], strides = [1, 1]} : vector<8x16xf32> to vector<1x16xf32>
    %cst_21 = arith.constant 0.000000e+00 : f32
    %40 = vector.broadcast %cst_21 : f32 to vector<1x32xf32>
    %cst_22 = arith.constant 0.000000e+00 : f32
    %41 = vector.broadcast %cst_22 : f32 to vector<1x24xf32>
    %42 = tpu.concatenate %40, %39, %41 in 1 : vector<1x32xf32>, vector<1x16xf32>, vector<1x24xf32> -> vector<1x72xf32>
    %43 = arith.addf %38, %42 : vector<1x72xf32>
    %44 = vector.extract_strided_slice %18 {offsets = [5, 0], sizes = [1, 16], strides = [1, 1]} : vector<8x16xf32> to vector<1x16xf32>
    %cst_23 = arith.constant 0.000000e+00 : f32
    %45 = vector.broadcast %cst_23 : f32 to vector<1x40xf32>
    %cst_24 = arith.constant 0.000000e+00 : f32
    %46 = vector.broadcast %cst_24 : f32 to vector<1x16xf32>
    %47 = tpu.concatenate %45, %44, %46 in 1 : vector<1x40xf32>, vector<1x16xf32>, vector<1x16xf32> -> vector<1x72xf32>
    %48 = arith.addf %43, %47 : vector<1x72xf32>
    %49 = vector.extract_strided_slice %18 {offsets = [6, 0], sizes = [1, 16], strides = [1, 1]} : vector<8x16xf32> to vector<1x16xf32>
    %cst_25 = arith.constant 0.000000e+00 : f32
    %50 = vector.broadcast %cst_25 : f32 to vector<1x48xf32>
    %cst_26 = arith.constant 0.000000e+00 : f32
    %51 = vector.broadcast %cst_26 : f32 to vector<1x8xf32>
    %52 = tpu.concatenate %50, %49, %51 in 1 : vector<1x48xf32>, vector<1x16xf32>, vector<1x8xf32> -> vector<1x72xf32>
    %53 = arith.addf %48, %52 : vector<1x72xf32>
    %54 = vector.extract_strided_slice %18 {offsets = [7, 0], sizes = [1, 16], strides = [1, 1]} : vector<8x16xf32> to vector<1x16xf32>
    %cst_27 = arith.constant 0.000000e+00 : f32
    %55 = vector.broadcast %cst_27 : f32 to vector<1x56xf32>
    %56 = tpu.concatenate %55, %54 in 1 : vector<1x56xf32>, vector<1x16xf32> -> vector<1x72xf32>
    %57 = arith.addf %53, %56 : vector<1x72xf32>
    %c0_28 = arith.constant 0 : index
    %c0_29 = arith.constant 0 : index
    %58 = vector.load %arg6[%c0_28, %c0_29] : memref<1x1xf32, #tpu.memory_space<vmem>>, vector<1x1xf32>
    %59 = vector.extract %58[0, 0] : f32 from vector<1x1xf32>
    %60 = vector.broadcast %59 : f32 to vector<1x72xf32>
    %61 = arith.addf %57, %60 : vector<1x72xf32>
    %c0_30 = arith.constant 0 : index
    %c0_31 = arith.constant 0 : index
    %c0_32 = arith.constant 0 : index
    %62 = vector.load %arg7[%c0_30, %c0_31, %c0_32] : memref<1x1x72xf32, #tpu.memory_space<vmem>>, vector<1x1x72xf32>
    %63 = vector.shape_cast %62 : vector<1x1x72xf32> to vector<1x72xf32>
    %64 = vector.shape_cast %61 : vector<1x72xf32> to vector<1x1x72xf32>
    tpu.vector_store %arg7[%c0_30, %c0_31, %c0_32], %64 {strides = array<i32>} : memref<1x1x72xf32, #tpu.memory_space<vmem>>, vector<1x1x72xf32>,
    return
  }
  func.func @transform_0(%arg0: i32) -> (i32, i32, i32) {
    %c0_i32 = arith.constant 0 : i32
    %c0_i32_0 = arith.constant 0 : i32
    %c0_i32_1 = arith.constant 0 : i32
    return %arg0, %c0_i32, %c0_i32_0 : i32, i32, i32
  }
  func.func @transform_1(%arg0: i32) -> (i32, i32) {
    %c0_i32 = arith.constant 0 : i32
    %c0_i32_0 = arith.constant 0 : i32
    %c0_i32_1 = arith.constant 0 : i32
    return %c0_i32, %c0_i32_0 : i32, i32
  }
  func.func @transform_2(%arg0: i32) -> (i32, i32) {
    %c0_i32 = arith.constant 0 : i32
    %c0_i32_0 = arith.constant 0 : i32
    %c0_i32_1 = arith.constant 0 : i32
    return %c0_i32, %c0_i32_0 : i32, i32
  }
  func.func @transform_3(%arg0: i32) -> (i32, i32, i32) {
    %c0_i32 = arith.constant 0 : i32
    %c0_i32_0 = arith.constant 0 : i32
    %c0_i32_1 = arith.constant 0 : i32
    return %arg0, %c0_i32, %c0_i32_0 : i32, i32, i32
  }
  func.func @transform_4(%arg0: i32) -> (i32, i32) {
    %c0_i32 = arith.constant 0 : i32
    %c0_i32_0 = arith.constant 0 : i32
    %c0_i32_1 = arith.constant 0 : i32
    return %c0_i32, %c0_i32_0 : i32, i32
  }
  func.func @transform_5(%arg0: i32) -> (i32, i32) {
    %c0_i32 = arith.constant 0 : i32
    %c0_i32_0 = arith.constant 0 : i32
    %c0_i32_1 = arith.constant 0 : i32
    return %c0_i32, %c0_i32_0 : i32, i32
  }
  func.func @transform_6(%arg0: i32) -> (i32, i32, i32) {
    %c0_i32 = arith.constant 0 : i32
    %c0_i32_0 = arith.constant 0 : i32
    %c0_i32_1 = arith.constant 0 : i32
    return %arg0, %c0_i32, %c0_i32_0 : i32, i32, i32
  }
}

</mosaic_0001>

<bundles_post_ra>
// kernel: e3net_forward.8
= control target key start
LH: loop header
LB: loop body
LE: loop exit
PB: predicated region body
PF: predicated region fallthrough
CT: control target
= control target key end

     0   :  { %v144_v0 = vmov 0.0|0.0   ;;  %vm145_vm0 = vmmov 0   ;;  %v146_v4 = vmov 0.0   ;;  %vm28_vm1 = vcmask 392192   ;;  %s194_s1 = inlined_call_operand.vmem [shape: f32[48,32], index: 1, kind: input, shape index: {}]   ;;  %s195_s0 = inlined_call_operand.vmem [shape: f32[2,48], index: 0, kind: input, shape index: {}]   ;;  %s196_s2 = inlined_call_operand.vmem [shape: f32[1,32], index: 2, kind: input, shape index: {}]   ;;  %s197_s3 = inlined_call_operand.vmem [shape: f32[2,32], index: 3, kind: output, shape index: {}]  }
   0x1   :  { %132 = vmatprep.subr.bf16.mxu0 %v144_v0  ;;  %v15_v1 = vld [vmem:[%s194_s1] sm:$0xff]  ;;  %v16_v2 = vld [vmem:[%s194_s1 + $0x8] sm:$0xff]  ;;  %v17_v3 = vld [vmem:[%s194_s1 + $0x10] sm:$0xff]  ;;  %129 = vmatprep.mubr.msk.f32.mxu0 %vm145_vm0, %v146_v4  ;;  %vm102_vm2 = vcmask 254976  }
   0x2   :  { %v133_v5 = vpack.c.bf16 %v16_v2, %v15_v1  ;;  %v18_v6 = vld [vmem:[%s194_s1 + $0x18] sm:$0xff]  ;;  %v19_v8 = vld [vmem:[%s194_s1 + $0x20] sm:$0xff]  ;;  %v20_v9 = vld [vmem:[%s194_s1 + $0x28] sm:$0xff] }
   0x3   :  { %v136_v7 = vpack.c.bf16 %v18_v6, %v17_v3  ;;  %v139_v10 = vpack.c.bf16 %v20_v9, %v19_v8  ;;  %v14_v11 = vld [vmem:[%s195_s0] sm:$0x3] }
   0x4   :  { %134 = vmatpush3.bf16.msra.mxu0 %v133_v5  ;;  %v108_v12 = vld [vmem:[%s196_s2] ss:$0 sm:$0xff] }
   0x5   :  { %135 = vmatprep.subr.bf16.mxu0 %v144_v0 }
   0x8   :  { %137 = vmatpush3.bf16.msra.mxu0 %v136_v7 }
   0x9   :  { %138 = vmatprep.subr.bf16.mxu0 %v144_v0 }
   0xc   :  { %140 = vmatpush3.bf16.msra.mxu0 %v139_v10 }
   0xf   :  { %130 = vmatmul.mubr.msk.f32.vlgmr.msra.gmra.mrb[0].mxu0 %vm28_vm1, %v14_v11 }
  0xe2   :  { %v98_v13 = vpop.f32.mrb[0].mxu0 }
  0xe3   :  { %v99_v14 = vadd.f32 %v108_v12, %v98_v13  ;;  %v131_v15 = vpop.f32.mrb[1].mxu0 }
  0xe5   :  { %103 = vst.msk [vmem:[%s197_s3] sm:$0x3] %vm102_vm2, %v99_v14 }

// kernel: e3net_forward.10
= control target key start
LH: loop header
LB: loop body
LE: loop exit
PB: predicated region body
PF: predicated region fallthrough
CT: control target
= control target key end

     0   :  { %s1046_s17 = smov 0   ;;  %s1123_s0 = inlined_call_operand.vmem [shape: f32[2,8,16], index: 0, kind: input, shape index: {}]   ;;  %s1124_s1 = inlined_call_operand.vmem [shape: f32[2,32], index: 1, kind: input, shape index: {}]   ;;  %s1125_s2 = inlined_call_operand.vmem [shape: bf16[16,64], index: 2, kind: input, shape index: {}]   ;;  %s1126_s3 = inlined_call_operand.vmem [shape: f32[1,64], index: 3, kind: input, shape index: {}]   ;;  %s1127_s4 = inlined_call_operand.<no memory space> [shape: f32[1,1], index: 4, kind: input, shape index: {}]   ;;  %s1128_s5 = inlined_call_operand.vmem [shape: f32[1,64], index: 5, kind: input, shape index: {}]   ;;  %s1129_s6 = inlined_call_operand.vmem [shape: f32[1,64], index: 6, kind: input, shape index: {}]   ;;  %s1130_s7 = inlined_call_operand.vmem [shape: bf16[64,64], index: 7, kind: input, shape index: {}]   ;;  %s1131_s8 = inlined_call_operand.vmem [shape: bf16[32,64], index: 8, kind: input, shape index: {}]   ;;  %s1132_s9 = inlined_call_operand.vmem [shape: f32[1,64], index: 9, kind: input, shape index: {}]   ;;  %s1133_s11 = inlined_call_operand.vmem [shape: f32[1,64], index: 11, kind: input, shape index: {}]   ;;  %s1134_s12 = inlined_call_operand.vmem [shape: f32[1,64], index: 12, kind: input, shape index: {}]   ;;  %s1135_s13 = inlined_call_operand.vmem [shape: f32[2,8,64], index: 13, kind: output, shape index: {0}]   ;;  %s1136_s14 = inlined_call_operand.vmem [shape: bf16[2,8,64], index: 14, kind: output, shape index: {1}]   ;;  %s1137_s10 = inlined_call_operand.<no memory space> [shape: f32[1,1], index: 10, kind: input, shape index: {}]  }
   0x1   :  { %v20_v0 = vstv %s1127_s4  ;;  %v22_v1 = vstv %s1137_s10 }
   0x2   :  { %21 = vst [vmem:[#allocation2] sm:$0x1] %v20_v0  ;;  %23 = vst [vmem:[#allocation3] sm:$0x1] %v22_v1 }
   0x3 LB: > { %s1052_s18 = sadd.s32 4294967295, %s960_s17   ;;  %p870_p0 = scmp.ge.s32.totalorder %s960_s17, 1  ;;  %s960_s17 = sphi %s1046_s17, %s29_s17  }
   0x4   : > { %p418_p1 = scmp.lt.s32.totalorder %s960_s17, 3 }
   0x6   : > { %p419_p2 = pnand %p870_p0, %p418_p1 }
   0x7   : > { %v943_v2 = vld [vmem:[%s1125_s2] sm:$0xff] (!%p419_p2)   ;;  %v962_v3 = vmov (!%p419_p2), 0.0   ;;  %p466_p3 = scmp.lt.s32.totalorder (!%p419_p2), %s1052_s18, 1  ;;  %vm963_vm0 = vmmov (!%p419_p2), 0   ;;  %v964_v5 = vmov (!%p419_p2), 0   ;;  %vm496_vm1 = vcmask (!%p419_p2), 130048  }
   0x8   : > { %422 = sbr.rel (%p419_p2) target bundleno = 1089 (0x441), region = 72  ;;  %904 = vmatprep.subr.bf16.mxu1 (!%p419_p2), %v962_v3  ;;  %918 = vmatprep.subr.bf16.mxu0 (!%p419_p2), %v962_v3  ;;  %v874_v8 = vld [vmem:[%s1126_s3] ss:$0 sm:$0xff] (!%p419_p2)  ;;  %vm540_vm2 = vcmask (!%p419_p2), 523264   ;;  %v946_v25 = vld [vmem:[%s1130_s7 + $0x8] sm:$0xff] (!%p419_p2)   ;;  %v948_v29 = vld [vmem:[%s1130_s7 + $0x10] sm:$0xff] (!%p419_p2)   ;;  %v657_v46 = vlaneseq (!%p419_p2) }
   0x9   : > { %v877_v4 = vld [vmem:[#allocation2] ss:$0 sm:$0xff] (!%p419_p2)  ;;  %905 = vmatpush3.bf16.msra.mxu1 (!%p419_p2), %v943_v2  ;;  %906 = vmatprep.mubr.msk.bf16.mxu1 (!%p419_p2), %vm963_vm0, %v962_v3  ;;  %v947_v26 = vld [vmem:[%s1131_s8 + $0x8] sm:$0xff] (!%p419_p2)   ;;  %vm604_vm4 = vcmask (!%p419_p2), 261120   ;;  %v949_v30 = vld [vmem:[%s1130_s7 + $0x18] sm:$0xff] (!%p419_p2)   ;;  %vm779_vm6 = vcmask (!%p419_p2), 519168  }
   0xa   : > { %941 = vset.pattern.permute.xlu0 (!%p419_p2), %v964_v5  ;;  %910 = vmatprep.subr.bf16.mxu1 (!%p419_p2), %v962_v3  ;;  %v944_v23 = vld [vmem:[%s1130_s7] sm:$0xff] (!%p419_p2)   ;;  %v658_v47 = vshrl.u32 (!%p419_p2), %v657_v46, 7 }
   0xb   : > { %550 = vperm.xlu0 (!%p419_p2), %941, %v877_v4   ;;  %926 = vmatprep.mubr.msk.bf16.mxu0 (!%p419_p2), %vm963_vm0, %v962_v3  ;;  %v945_v24 = vld [vmem:[%s1131_s8] sm:$0xff] (!%p419_p2)  }
   0xc   : > { %942 = vset.pattern.permute.xlu1 (!%p419_p2), %v964_v5  ;;  %919 = vmatpush3.bf16.msra.mxu0 (!%p419_p2), %v944_v23  ;;  %v889_v31 = vld [vmem:[#allocation3] ss:$0 sm:$0xff] (!%p419_p2)  ;;  %v878_v36 = vld [vmem:[%s1128_s5] ss:$0 sm:$0xff] (!%p419_p2)  ;;  %v659_v48 = vsub.s32 (!%p419_p2), 0, %v658_v47 }
   0xd   : > { %920 = vmatprep.subr.bf16.mxu0 (!%p419_p2), %v962_v3  ;;  %v879_v38 = vld [vmem:[%s1129_s6] ss:$0 sm:$0xff] (!%p419_p2) }
   0xe   : > { %v888_v51 = vld [vmem:[%s1132_s9] ss:$0 sm:$0xff] (!%p419_p2) }
   0xf   : > { %s1061_s19 = scalar_select %p466_p3, %s1052_s18, 1 }
  0x10   : > { %921 = vmatpush3.bf16.msra.mxu0 %v946_v25 }
  0x11   : > { %s871_s20 = sshll.u32 %s1061_s19, 3  ;;  %922 = vmatprep.subr.bf16.mxu0 %v962_v3 }
  0x12   : > { %s469_s23 = scalar_lea.vmem %s1123_s0, %s871_s20  ;;  %s473_s28 = scalar_lea.vmem %s1135_s13, %s871_s20 }
  0x13   : > { %v479_v6 = vld [vmem:[%s469_s23] sm:$0xff]  ;;  %s585_s20 = scalar_lea.vmem %s1124_s1, %s1052_s18  ;;  %s873_s23 = sshll.u32 %s1061_s19, 2 }
  0x14   : > { %v480_v7 = vpack.c.bf16 %v479_v6, %v479_v6  ;;  %v586_v27 = vld [vmem:[%s585_s20] sm:$0x1]  ;;  %923 = vmatpush3.bf16.msra.mxu0 %v948_v29  ;;  %s477_s26 = scalar_lea.vmem %s1136_s14, %s873_s23 }
  0x15   : > { %v587_v28 = vpack.c.bf16 %v586_v27, %v586_v27  ;;  %924 = vmatprep.subr.bf16.mxu0 %v962_v3  ;;  %v890_v6 = vld [vmem:[%s1133_s11] ss:$0 sm:$0xff] }
  0x16   : > { %907 = vmatmul.mubr.msk.bf16.vlgmr.msra.gmra.mrb[0].mxu1 %vm496_vm1, %v480_v7 }
  0x17   : > { %914 = vmatprep.mubr.msk.bf16.mxu1 %vm963_vm0, %v962_v3  ;;  %911 = vmatpush3.bf16.msra.mxu1 %v945_v24 }
  0x18   : > { %912 = vmatprep.subr.bf16.mxu1 %v962_v3  ;;  %925 = vmatpush3.bf16.msra.mxu0 %v949_v30 }
  0x1b   : > { %913 = vmatpush3.bf16.msra.mxu1 %v947_v26 }
  0x1e   : > { %915 = vmatmul.mubr.msk.bf16.vlgmr.msra.gmra.mrb[4].mxu1 %vm604_vm4, %v587_v28 }
  0x8a   : > { %v551_v10 = vpop.permute.xlu0 %550 }
  0xe9   : > { %v534_v9 = vpop.f32.mrb[0].mxu1 }
  0xea   : > { %v535_v11 = vadd.f32 %v874_v8, %v534_v9  ;;  %v908_v12 = vpop.f32.mrb[1].mxu1  ;;  %v891_v8 = vld [vmem:[%s1134_s12] ss:$0 sm:$0xff] }
  0xeb   : > { %v537_v13 = vpop.f32.mrb[2].mxu1 }
  0xec   : > { %541 = vst.msk [vmem:[%s473_s28] sm:$0xff] %vm540_vm2, %v535_v11  ;;  %v553_v14 = vmul.f32 %v551_v10, %v535_v11  ;;  %v909_v15 = vpop.f32.mrb[3].mxu1  ;;  %vm543_vm3 = vcmp.gt.f32.partialorder %v535_v11, 0.0 }
  0xee   : > { %v554_v16 = vsel %vm543_vm3, %v535_v11, %v553_v14 }
  0xef   : > { %v557_v17 = vsel %vm540_vm2, %v554_v16, 0.0 }
  0xf0   : > { %558 = vadd.xlane.f32.xlu0 %v557_v17 }
  0xf1   : > { %v642_v42 = vpop.f32.mrb[4].mxu1 }
  0xf2   : > { %v916_v43 = vpop.f32.mrb[5].mxu1  ;;  %v660_v49 = vrot.slane %v642_v42, %v659_v48 }
  0xf3   : > { %v645_v44 = vpop.f32.mrb[6].mxu1 }
  0xf4   : > { %v917_v45 = vpop.f32.mrb[7].mxu1 }
 0x17d   : > { %v559_v18 = vpop.xlane.xlu0 %558 }
 0x17e   : > { %v561_v19 = vmul.f32 0.015625, %v559_v18 }
 0x180   : > { %v562_v20 = vsub.f32 %v554_v16, %v561_v19 }
 0x182   : > { %v563_v21 = vmul.f32 %v562_v20, %v562_v20 }
 0x184   : > { %v564_v22 = vsel %vm540_vm2, %v563_v21, 0.0 }
 0x185   : > { %565 = vadd.xlane.f32.xlu1 %v564_v22 }
 0x196   : > { %744 = vperm.xlu1 %942, %v889_v31  }
 0x212   : > { %v566_v32 = vpop.xlane.xlu1 %565 }
 0x213   : > { %v567_v33 = vmul.f32 0.015625, %v566_v32 }
 0x215   : > { %v568_v34 = vadd.f32 1e-05, %v567_v33 }
 0x216   : > { %v745_v55 = vpop.permute.xlu1 %744 }
 0x217   : > { %950 = vrsqrt.f32 %v568_v34 }
 0x221   : > { %v951_v35 = vpop.eup %950 }
 0x222   : > { %v570_v37 = vmul.f32 %v951_v35, %v562_v20 }
 0x224   : > { %v577_v39 = vmul.f32 %v878_v36, %v570_v37 }
 0x226   : > { %v584_v40 = vadd.f32 %v879_v38, %v577_v39 }
 0x228   : > { %v648_v41 = vpack.c.bf16 %v584_v40, %v584_v40 }
 0x22a   : > { %927 = vmatmul.mubr.msk.bf16.vlgmr.msra.gmra.mrb[0].mxu0 %vm540_vm2, %v648_v41 }
 0x2fd   : > { %v722_v50 = vpop.f32.mrb[0].mxu0 }
 0x2fe   : > { %v723_v52 = vadd.f32 %v722_v50, %v660_v49  ;;  %v928_v53 = vpop.f32.mrb[1].mxu0 }
 0x2ff   : > { %v725_v54 = vpop.f32.mrb[2].mxu0 }
 0x300   : > { %v735_v56 = vadd.f32 %v888_v51, %v723_v52  ;;  %v929_v57 = vpop.f32.mrb[3].mxu0 }
 0x302   : > { %v747_v58 = vmul.f32 %v745_v55, %v735_v56  ;;  %vm737_vm5 = vcmp.gt.f32.partialorder %v735_v56, 0.0 }
 0x304   : > { %v748_v59 = vsel %vm737_vm5, %v735_v56, %v747_v58 }
 0x305   : > { %v751_v60 = vsel %vm540_vm2, %v748_v59, 0.0 }
 0x306   : > { %752 = vadd.xlane.f32.xlu1 %v751_v60 }
 0x393   : > { %v753_v61 = vpop.xlane.xlu1 %752 }
 0x394   : > { %v754_v62 = vmul.f32 0.015625, %v753_v61 }
 0x396   : > { %v755_v63 = vsub.f32 %v748_v59, %v754_v62 }
 0x398   : > { %v756_v0 = vmul.f32 %v755_v63, %v755_v63 }
 0x39a   : > { %v757_v1 = vsel %vm540_vm2, %v756_v0, 0.0 }
 0x39b   : > { %758 = vadd.xlane.f32.xlu0 %v757_v1 }
 0x428   : > { %v759_v2 = vpop.xlane.xlu0 %758 }
 0x429   : > { %v760_v3 = vmul.f32 0.015625, %v759_v2 }
 0x42b   : > { %v761_v4 = vadd.f32 1e-05, %v760_v3 }
 0x42d   : > { %952 = vrsqrt.f32 %v761_v4 }
 0x437   : > { %v953_v5 = vpop.eup %952 }
 0x438   : > { %v763_v7 = vmul.f32 %v953_v5, %v755_v63 }
 0x43a   : > { %v770_v9 = vmul.f32 %v890_v6, %v763_v7 }
 0x43c   : > { %v777_v10 = vadd.f32 %v891_v8, %v770_v9 }
 0x43e   : > { %v778_v11 = vpack.c.bf16 %v777_v10, %v777_v10 }
 0x440   : > { %780 = vst.msk [vmem:[%s477_s26] sm:$0xf] %vm779_vm6, %v778_v11 }
 0x441 PF: > { %s29_s17 = sadd.s32 1, %s960_s17  }
 0x442   : > { %p26_p4 = scmp.ge.s32.totalorder %s29_s17, 4  }
 0x444   :  { %28 = sbr.rel (!%p26_p4) target bundleno = 3 (0x3), region = 115 }

// kernel: e3net_forward.9
= control target key start
LH: loop header
LB: loop body
LE: loop exit
PB: predicated region body
PF: predicated region fallthrough
CT: control target
= control target key end

     0   :  { %v169_v3 = vmov 0.0|0.0   ;;  %vm170_vm0 = vmmov 0   ;;  %v171_v6 = vmov 0.0   ;;  %s223_s0 = inlined_call_operand.vmem [shape: f32[2,32], index: 0, kind: input, shape index: {}]   ;;  %s224_s1 = inlined_call_operand.vmem [shape: f32[32,16], index: 1, kind: input, shape index: {}]   ;;  %s225_s2 = inlined_call_operand.vmem [shape: f32[1,16], index: 2, kind: input, shape index: {}]   ;;  %s226_s3 = inlined_call_operand.hbm [shape: f32[2,16], index: 3, kind: output, shape index: {}]  }
   0x1   :  { %v16_v0 = vld [vmem:[%s224_s1] sm:$0xff]  ;;  %v17_v1 = vld [vmem:[%s224_s1 + $0x8] sm:$0xff]  ;;  %v18_v2 = vld [vmem:[%s224_s1 + $0x10] sm:$0xff]  ;;  %135 = vmatprep.subr.bf16.mxu0 %v169_v3  ;;  %132 = vmatprep.mubr.msk.f32.mxu0 %vm170_vm0, %v171_v6 }
   0x2   :  { %v136_v4 = vpack.c.bf16 %v17_v1, %v16_v0  ;;  %v19_v5 = vld [vmem:[%s224_s1 + $0x18] sm:$0xff] }
   0x3   :  { %8 = vsyncpa [#allocation3], 0  ;;  %v139_v7 = vpack.c.bf16 %v19_v5, %v18_v2  ;;  %v15_v8 = vld [vmem:[%s223_s0] sm:$0x3]  ;;  %vm27_vm1 = vcmask 261120   ;;  %s172_s24 = smov [#allocation2]  }
   0x4   :  { %137 = vmatpush3.bf16.msra.mxu0 %v136_v4  ;;  %v117_v9 = vld [vmem:[%s225_s2] ss:$0 sm:$0xff]  ;;  %s109_s1 = sshll.u32 %s172_s24, 4  ;;  %vm101_vm2 = vcmask 123904   ;;  %s110_s1 = int_to_ptr.vmem [resolvable:$true] %s109_s1 }
   0x5   :  { %138 = vmatprep.subr.bf16.mxu0 %v169_v3  ;;  %s145_s25 = scalar_lea.vmem %s110_s1, 32  ;;  %p150_p1 = scmp.lt.s32.totalorder %s110_s1, %s110_s1 }
   0x6   :  { %p146_p0 = scmp.ne.s32.totalorder %s110_s1, %s145_s25  ;;  %p151_p2 = scmp.lt.s32.totalorder %s145_s25, %s145_s25 }
   0x8   :  { %140 = vmatpush3.bf16.msra.mxu0 %v139_v7  ;;  %p152_p3 = por %p151_p2, %p150_p1 }
   0xa   :  { %p153_p4 = pnand %p152_p3, %p146_p0 }
   0xb   :  { %133 = vmatmul.mubr.msk.f32.vlgmr.msra.gmra.mrb[0].mxu0 %vm27_vm1, %v15_v8 }
  0xde   :  { %v97_v10 = vpop.f32.mrb[0].mxu0 }
  0xdf   :  { %v98_v11 = vadd.f32 %v117_v9, %v97_v10  ;;  %v134_v12 = vpop.f32.mrb[1].mxu0 }
  0xe1   :  { %102 = vst.msk [vmem:[#allocation2] sm:$0x3] %vm101_vm2, %v98_v11 }
  0xe2   :  { %156 = shalt.err (!%p153_p4)
}
  0xe3   :  { %s157_s27 = scalar_lea.hbm %s226_s3, 32 }
  0xe4   :  { %p158_p5 = scmp.ne.s32.totalorder %s226_s3, %s157_s27  ;;  %p161_p6 = scmp.lt.u32.totalorder %s157_s27, %s226_s3 }
  0xe6   :  { %p163_p7 = pnand %p161_p6, %p158_p5 }
  0xe8   :  { %166 = shalt.err (!%p163_p7)
}
  0xe9   :  { %112 = dma.vmem_to_hbm [thread:$0]  %s110_s1, 32, %s226_s3, [#allocation3]  }
  0xea   :  { %167 = dma.done.wait [#allocation3], 32  }
  0xeb   :  { %168 = vsyncadd [#allocation3], 4294967264 }
  0xec   :  { %116 = vsyncpa [#allocation3], 1 }

// kernel: e3net_forward.11
= control target key start
LH: loop header
LB: loop body
LE: loop exit
PB: predicated region body
PF: predicated region fallthrough
CT: control target
= control target key end

     0   :  { %s2069_s25 = smov 0   ;;  %s2332_s0 = inlined_call_operand.vmem [shape: bf16[2,8,64], index: 0, kind: input, shape index: {}]   ;;  %s2333_s1 = inlined_call_operand.vmem [shape: bf16[64,64], index: 1, kind: input, shape index: {}]   ;;  %s2334_s2 = inlined_call_operand.vmem [shape: f32[1,64], index: 2, kind: input, shape index: {}]   ;;  %s2335_s3 = inlined_call_operand.<no memory space> [shape: f32[1,1], index: 3, kind: input, shape index: {}]   ;;  %s2336_s4 = inlined_call_operand.vmem [shape: bf16[64,32], index: 4, kind: input, shape index: {}]   ;;  %s2337_s5 = inlined_call_operand.vmem [shape: f32[1,32], index: 5, kind: input, shape index: {}]   ;;  %s2338_s7 = inlined_call_operand.vmem [shape: f32[1,32], index: 7, kind: input, shape index: {}]   ;;  %s2339_s8 = inlined_call_operand.vmem [shape: f32[1,32], index: 8, kind: input, shape index: {}]   ;;  %s2340_s9 = inlined_call_operand.vmem [shape: bf16[32,128], index: 9, kind: input, shape index: {}]   ;;  %s2341_s10 = inlined_call_operand.vmem [shape: f32[1,128], index: 10, kind: input, shape index: {}]   ;;  %s2342_s11 = inlined_call_operand.vmem [shape: bf16[32,128], index: 11, kind: input, shape index: {}]   ;;  %s2343_s12 = inlined_call_operand.vmem [shape: f32[1,32], index: 12, kind: input, shape index: {}]   ;;  %s2344_s13 = inlined_call_operand.vmem [shape: f32[1,32], index: 13, kind: input, shape index: {}]   ;;  %s2345_s14 = inlined_call_operand.vmem [shape: f32[1,32], index: 14, kind: input, shape index: {}]   ;;  %s2346_s15 = inlined_call_operand.vmem [shape: f32[1,32], index: 15, kind: input, shape index: {}]   ;;  %s2347_s16 = inlined_call_operand.vmem [shape: f32[2,8,32], index: 16, kind: output, shape index: {}]   ;;  %s2348_s6 = inlined_call_operand.<no memory space> [shape: f32[1,1], index: 6, kind: input, shape index: {}]  }
   0x1   :  { %2349 = sst [smem:[#allocation7_spill]] %s2332_s0  ;;  %v21_v0 = vstv %s2335_s3  ;;  %v23_v1 = vstv %s2348_s6 }
   0x2   :  { %22 = vst [vmem:[#allocation5] sm:$0x1] %v21_v0  ;;  %24 = vst [vmem:[#allocation6] sm:$0x1] %v23_v1 }
   0x3 LB: > { %s1675_s26 = sadd.s32 4294967295, %s1970_s25   ;;  %p1679_p0 = scmp.ge.s32.totalorder %s1970_s25, 1  ;;  %s1970_s25 = sphi %s2069_s25, %s30_s25  }
   0x4   : > { %p465_p1 = scmp.lt.s32.totalorder %s1970_s25, 3 }
   0x6   : > { %p466_p2 = pnand %p1679_p0, %p465_p1 }
   0x7   : > { %v1882_v2 = vld [vmem:[%s2333_s1] sm:$0xff] (!%p466_p2)   ;;  %v1972_v3 = vmov (!%p466_p2), 0.0   ;;  %v1883_v4 = vld [vmem:[%s2333_s1 + $0x8] sm:$0xff] (!%p466_p2)   ;;  %vm1973_vm0 = vmmov (!%p466_p2), 0   ;;  %p513_p3 = scmp.lt.s32.totalorder (!%p466_p2), %s1675_s26, 1  ;;  %v1974_v6 = vmov (!%p466_p2), 0  }
   0x8   : > { %469 = sbr.rel (%p466_p2) target bundleno = 7108 (0x1bc4), region = 84  ;;  %1771 = vmatprep.subr.bf16.mxu0 (!%p466_p2), %v1972_v3  ;;  %1783 = vmatprep.subr.bf16.mxu1 (!%p466_p2), %v1972_v3  ;;  %v1886_v7 = vld [vmem:[%s2336_s4] sm:$0xff] (!%p466_p2)   ;;  %v1884_v8 = vld [vmem:[%s2333_s1 + $0x10] sm:$0xff] (!%p466_p2)   ;;  %v1887_v10 = vld [vmem:[%s2336_s4 + $0x8] sm:$0xff] (!%p466_p2)   ;;  %s2350_s3 = sld [smem:[#allocation7_spill]] (!%p466_p2)  ;;  %vm562_vm1 = vcmask (!%p466_p2), 523264  }
   0x9   : > { %1772 = vmatpush3.bf16.msra.mxu0 (!%p466_p2), %v1882_v2  ;;  %1779 = vmatprep.mubr.msk.bf16.mxu0 (!%p466_p2), %vm1973_vm0, %v1972_v3  ;;  %v1688_v5 = vld [vmem:[#allocation5] ss:$0 sm:$0xff] (!%p466_p2)  ;;  %v1695_v9 = vld [vmem:[#allocation6] ss:$0 sm:$0xff] (!%p466_p2)  ;;  %v1885_v11 = vld [vmem:[%s2333_s1 + $0x18] sm:$0xff] (!%p466_p2)   ;;  %vm717_vm4 = vcmask (!%p466_p2), 261120  }
   0xa   : > { %1773 = vmatprep.subr.bf16.mxu0 (!%p466_p2), %v1972_v3  ;;  %1791 = vmatprep.mubr.msk.bf16.mxu1 (!%p466_p2), %vm1973_vm0, %v1972_v3  ;;  %v1888_v13 = vld [vmem:[%s2336_s4 + $0x10] sm:$0xff] (!%p466_p2)   ;;  %v1889_v14 = vld [vmem:[%s2336_s4 + $0x18] sm:$0xff] (!%p466_p2)   ;;  %v1682_v15 = vld [vmem:[%s2334_s2] ss:$0 sm:$0xff] (!%p466_p2)  ;;  %vm818_vm5 = vcmask (!%p466_p2), 253952   ;;  %s1975_s28 = smov (!%p466_p2), 32  }
   0xb   : > { %1881 = vset.pattern.permute.xlu0 (!%p466_p2), %v1974_v6  ;;  %1784 = vmatpush3.bf16.msra.mxu1 (!%p466_p2), %v1886_v7  ;;  %v1689_v25 = vld [vmem:[%s2337_s5] ss:$0 sm:$0xff] (!%p466_p2)  ;;  %v1891_v41 = vld [vmem:[%s2340_s9 + $0x8] sm:$0xff] (!%p466_p2)   ;;  %819 = vst.msk [vmem:[#allocation3] sm:$0x1] (!%p466_p2), %vm818_vm5, %v1972_v3  ;;  %s1976_s20 = smov (!%p466_p2), 64  }
   0xc   : > { %614 = vperm.xlu0 (!%p466_p2), %1881, %v1688_v5   ;;  %1785 = vmatprep.subr.bf16.mxu1 (!%p466_p2), %v1972_v3  ;;  %v1890_v40 = vld [vmem:[%s2340_s9] sm:$0xff] (!%p466_p2)   ;;  %820 = vst.msk [vmem:[#allocation4] sm:$0x1] (!%p466_p2), %vm818_vm5, %v1972_v3  ;;  %v2156_v43 = vld [vmem:[%s2342_s11 + $0x8] sm:$0xff] (!%p466_p2)   ;;  %s1977_s21 = smov (!%p466_p2), 96  }
   0xd   : > { %1774 = vmatpush3.bf16.msra.mxu0 (!%p466_p2), %v1883_v4  ;;  %v2149_v42 = vld [vmem:[%s2342_s11] sm:$0xff] (!%p466_p2)  }
   0xe   : > { %1775 = vmatprep.subr.bf16.mxu0 (!%p466_p2), %v1972_v3  ;;  %v1696_v51 = vld [vmem:[%s2338_s7] ss:$0 sm:$0xff] (!%p466_p2) }
   0xf   : > { %s2352_s26 = smov (!%p513_p3, %s1675_s26), 1  ;;  %1786 = vmatpush3.bf16.msra.mxu1 %v1887_v10  ;;  %v1697_v53 = vld [vmem:[%s2339_s8] ss:$0 sm:$0xff] }
  0x10   : > { %s1680_s22 = sshll.u32 %s2352_s26, 2  ;;  %710 = vperm.xlu0 %1881, %v1695_v9   ;;  %1787 = vmatprep.subr.bf16.mxu1 %v1972_v3  ;;  %v1698_v61 = vld [vmem:[%s2341_s10] ss:$0 sm:$0xff] }
  0x11   : > { %1776 = vmatpush3.bf16.msra.mxu0 %v1884_v8  ;;  %s516_s27 = scalar_lea.vmem %s2350_s3, %s1680_s22  ;;  %s1681_s22 = sshll.u32 %s2352_s26, 3 }
  0x12   : > { %1777 = vmatprep.subr.bf16.mxu0 %v1972_v3  ;;  %v522_v12 = vld [vmem:[%s516_s27] sm:$0xf]  ;;  %v821_v44 = vld [vmem:[#allocation3] sm:$0x1]  ;;  %s2198_s3 = scalar_lea.vmem %s2347_s16, %s1681_s22 }
  0x13   : > { %1788 = vmatpush3.bf16.msra.mxu1 %v1888_v13  ;;  %v1706_v45 = vld [vmem:[#allocation4] ss:$0 sm:$0xff]  ;;  %v823_v46 = vpack.c.bf16 %v821_v44, %v821_v44 }
  0x14   : > { %1789 = vmatprep.subr.bf16.mxu1 %v1972_v3 }
  0x15   : > { %1778 = vmatpush3.bf16.msra.mxu0 %v1885_v11 }
  0x16   : > { %1795 = vmatprep.subr.bf16.mxu0 %v1972_v3 }
  0x17   : > { %1790 = vmatpush3.bf16.msra.mxu1 %v1889_v14 }
  0x18   : > { %1780 = vmatmul.mubr.msk.bf16.vlgmr.msra.gmra.mrb[0].mxu0 %vm562_vm1, %v522_v12  ;;  %1803 = vmatprep.subr.bf16.mxu1 %v1972_v3 }
  0x19   : > { %1799 = vmatprep.mubr.msk.bf16.mxu0 %vm1973_vm0, %v1972_v3  ;;  %1796 = vmatpush3.bf16.msra.mxu0 %v1890_v40 }
  0x1a   : > { %1797 = vmatprep.subr.bf16.mxu0 %v1972_v3 }
  0x1d   : > { %1798 = vmatpush3.bf16.msra.mxu0 %v1891_v41 }
  0x1e   : > { %1811 = vmatprep.subr.bf16.mxu0 %v1972_v3 }
  0x8b   : > { %v615_v19 = vpop.permute.xlu0 %614 }
  0x8f   : > { %v711_v29 = vpop.permute.xlu0 %710 }
  0xeb   : > { %v600_v16 = vpop.f32.mrb[0].mxu0 }
  0xec   : > { %v601_v17 = vadd.f32 %v1682_v15, %v600_v16  ;;  %v1781_v18 = vpop.f32.mrb[1].mxu0 }
  0xed   : > { %v603_v20 = vpop.f32.mrb[2].mxu0 }
  0xee   : > { %vm607_vm2 = vcmp.gt.f32.partialorder %v601_v17, 0.0  ;;  %v617_v21 = vmul.f32 %v615_v19, %v601_v17  ;;  %v1782_v22 = vpop.f32.mrb[3].mxu0 }
  0xf0   : > { %v618_v23 = vsel %vm607_vm2, %v601_v17, %v617_v21 }
  0xf1   : > { %v619_v24 = vpack.c.bf16 %v618_v23, %v618_v23 }
  0xf3   : > { %1792 = vmatmul.mubr.msk.bf16.vlgmr.msra.gmra.mrb[0].mxu1 %vm562_vm1, %v619_v24 }
  0xf4   : > { %1807 = vmatprep.mubr.msk.bf16.mxu1 %vm1973_vm0, %v1972_v3  ;;  %1804 = vmatpush3.bf16.msra.mxu1 %v2149_v42 }
  0xf5   : > { %1805 = vmatprep.subr.bf16.mxu1 %v1972_v3 }
  0xf8   : > { %1806 = vmatpush3.bf16.msra.mxu1 %v2156_v43 }
  0xf9   : > { %1819 = vmatprep.subr.bf16.mxu1 %v1972_v3 }
  0xfb   : > { %1808 = vmatmul.mubr.msk.bf16.vlgmr.msra.gmra.mrb[4].mxu1 %vm717_vm4, %v823_v46 }
  0xfc   : > { %1820 = vmatpush3.bf16.msra.mxu1 %v2149_v42  ;;  %1823 = vmatprep.mubr.msk.bf16.mxu1 %vm1973_vm0, %v1972_v3 }
  0xfd   : > { %1821 = vmatprep.subr.bf16.mxu1 %v1972_v3 }
 0x100   : > { %1822 = vmatpush3.bf16.msra.mxu1 %v2156_v43 }
 0x101   : > { %1835 = vmatprep.subr.bf16.mxu1 %v1972_v3 }
 0x1c6   : > { %v696_v26 = vpop.f32.mrb[0].mxu1 }
 0x1c7   : > { %v697_v27 = vadd.f32 %v1689_v25, %v696_v26  ;;  %v1793_v28 = vpop.f32.mrb[1].mxu1 }
 0x1c8   : > { %v699_v30 = vpop.f32.mrb[2].mxu1 }
 0x1c9   : > { %v713_v31 = vmul.f32 %v711_v29, %v697_v27  ;;  %v1794_v32 = vpop.f32.mrb[3].mxu1  ;;  %vm703_vm3 = vcmp.gt.f32.partialorder %v697_v27, 0.0 }
 0x1cb   : > { %v714_v33 = vsel %vm703_vm3, %v697_v27, %v713_v31 }
 0x1cc   : > { %v718_v34 = vsel %vm717_vm4, %v714_v33, 0.0 }
 0x1cd   : > { %719 = vadd.xlane.f32.xlu1 %v718_v34 }
 0x1ce   : > { %v873_v57 = vpop.f32.mrb[4].mxu1 }
 0x1cf   : > { %v1809_v58 = vpop.f32.mrb[5].mxu1 }
 0x1d0   : > { %v876_v59 = vpop.f32.mrb[6].mxu1 }
 0x1d1   : > { %v1810_v60 = vpop.f32.mrb[7].mxu1 }
 0x25a   : > { %v720_v35 = vpop.xlane.xlu1 %719 }
 0x25b   : > { %v722_v36 = vmul.f32 0.03125, %v720_v35 }
 0x25d   : > { %v723_v37 = vsub.f32 %v714_v33, %v722_v36 }
 0x25f   : > { %v724_v38 = vmul.f32 %v723_v37, %v723_v37 }
 0x261   : > { %v725_v39 = vsel %vm717_vm4, %v724_v38, 0.0 }
 0x262   : > { %726 = vadd.xlane.f32.xlu1 %v725_v39 }
 0x273   : > { %893 = vrot.lane.b32.xlu1 %v1706_v45, %s1975_s28 }
 0x2ef   : > { %v727_v47 = vpop.xlane.xlu1 %726 }
 0x2f0   : > { %v728_v48 = vmul.f32 0.03125, %v727_v47 }
 0x2f2   : > { %v729_v49 = vadd.f32 1e-05, %v728_v48 }
 0x2f3   : > { %v894_v13 = vpop.permute.xlu1 %893 }
 0x2f4   : > { %1894 = vrsqrt.f32 %v729_v49 }
 0x2fe   : > { %v1895_v50 = vpop.eup %1894 }
 0x2ff   : > { %v731_v52 = vmul.f32 %v1895_v50, %v723_v37 }
 0x301   : > { %v738_v54 = vmul.f32 %v1696_v51, %v731_v52 }
 0x303   : > { %v2175_v55 = vadd.f32 %v1697_v53, %v738_v54 }
 0x305   : > { %v746_v56 = vpack.c.bf16 %v2175_v55, %v2175_v55 }
 0x307   : > { %1800 = vmatmul.mubr.msk.bf16.vlgmr.msra.gmra.mrb[4].mxu0 %vm717_vm4, %v746_v56 }
 0x308   : > { %1812 = vmatpush3.bf16.msra.mxu0 %v2149_v42  ;;  %1815 = vmatprep.mubr.msk.bf16.mxu0 %vm1973_vm0, %v1972_v3 }
 0x309   : > { %1813 = vmatprep.subr.bf16.mxu0 %v1972_v3 }
 0x30c   : > { %1814 = vmatpush3.bf16.msra.mxu0 %v2156_v43 }
 0x30d   : > { %1827 = vmatprep.subr.bf16.mxu0 %v1972_v3 }
 0x3da   : > { %v807_v62 = vpop.f32.mrb[4].mxu0 }
 0x3db   : > { %v808_v63 = vadd.f32 %v1698_v61, %v807_v62  ;;  %v1801_v0 = vpop.f32.mrb[5].mxu0 }
 0x3dc   : > { %v810_v1 = vpop.f32.mrb[6].mxu0 }
 0x3dd   : > { %813 = vst [vmem:[#allocation2] sm:$0xff] %v808_v63  ;;  %v1802_v2 = vpop.f32.mrb[7].mxu0 }
 0x3e4   : > { %v822_v4 = vld [vmem:[#allocation2] sm:$0x1]  ;;  %v925_v25 = vld [vmem:[#allocation2 + $0x1] sm:$0x1]  ;;  %v1016_v52 = vld [vmem:[#allocation2 + $0x2] sm:$0x1] }
 0x3e5   : > { %v879_v5 = vadd.f32 %v873_v57, %v822_v4 }
 0x3e7   : > { %1896 = vtanh.f32 %v879_v5  ;;  %v1705_v7 = vmul.f32 -1.442695, %v879_v5 }
 0x3e9   : > { %1898 = vpow2.f32 %v1705_v7 }
 0x3f1   : > { %v1897_v6 = vpop.eup %1896 }
 0x3f2   : > { %898 = vrot.lane.b32.xlu0 %v1897_v6, %s1976_s20 }
 0x3f3   : > { %v1899_v8 = vpop.eup %1898 }
 0x3f4   : > { %v883_v9 = vadd.f32 1.0, %v1899_v8 }
 0x3f6   : > { %1900 = vrcp.f32 %v883_v9 }
 0x400   : > { %v1901_v10 = vpop.eup %1900 }
 0x401   : > { %v896_v14 = vmul.f32 %v1901_v10, %v894_v13 }
 0x464   : > { %v899_v11 = vpop.permute.xlu0 %898 }
 0x465   : > { %v901_v12 = vmul.f32 %v1901_v10, %v899_v11 }
 0x467   : > { %903 = vrot.lane.b32.xlu0 %v901_v12, %s1975_s28 }
 0x4d9   : > { %v904_v15 = vpop.permute.xlu0 %903 }
 0x4da   : > { %v906_v16 = vadd.f32 %v904_v15, %v896_v14  ;;  %v1107_v15 = vld [vmem:[#allocation2 + $0x3] sm:$0x1] }
 0x4dc   : > { %1902 = vtanh.f32 %v906_v16 }
 0x4e6   : > { %v1903_v17 = vpop.eup %1902 }
 0x4e7   : > { %909 = vrot.lane.b32.xlu0 %v1903_v17, %s1976_s20 }
 0x559   : > { %v910_v18 = vpop.permute.xlu0 %909 }
 0x55a   : > { %v912_v19 = vmul.f32 %v1901_v10, %v910_v18 }
 0x55c   : > { %914 = vrot.lane.b32.xlu0 %v912_v19, %s1975_s28 }
 0x560   : > { %919 = vrot.lane.b32.xlu0 %v906_v16, %s1977_s21 }
 0x5ce   : > { %v915_v20 = vpop.permute.xlu0 %914 }
 0x5cf   : > { %917 = vst.msk [vmem:[#allocation3] sm:$0x1] %vm818_vm5, %v915_v20  ;;  %923 = vst.msk [vmem:[%s2198_s3] sm:$0x1] %vm818_vm5, %v915_v20 }
 0x5d2   : > { %v920_v21 = vpop.permute.xlu0 %919 }
 0x5d3   : > { %922 = vst.msk [vmem:[#allocation4] sm:$0x1] %vm818_vm5, %v920_v21 }
 0x5d6   : > { %v924_v22 = vld [vmem:[#allocation3] sm:$0x1] }
 0x5d7   : > { %v926_v23 = vpack.c.bf16 %v924_v22, %v924_v22 }
 0x5d9   : > { %1816 = vmatmul.mubr.msk.bf16.vlgmr.msra.gmra.mrb[8].mxu0 %vm717_vm4, %v926_v23 }
 0x5da   : > { %v1709_v24 = vld [vmem:[#allocation4] ss:$0 sm:$0xff]  ;;  %1828 = vmatpush3.bf16.msra.mxu0 %v2149_v42  ;;  %1831 = vmatprep.mubr.msk.bf16.mxu0 %vm1973_vm0, %v1972_v3 }
 0x5db   : > { %984 = vrot.lane.b32.xlu0 %v1709_v24, %s1975_s28  ;;  %1829 = vmatprep.subr.bf16.mxu0 %v1972_v3 }
 0x5de   : > { %1830 = vmatpush3.bf16.msra.mxu0 %v2156_v43 }
 0x5df   : > { %1843 = vmatprep.subr.bf16.mxu0 %v1972_v3 }
 0x64d   : > { %v985_v38 = vpop.permute.xlu0 %984 }
 0x6ac   : > { %v964_v26 = vpop.f32.mrb[8].mxu0 }
 0x6ad   : > { %v970_v27 = vadd.f32 %v964_v26, %v925_v25  ;;  %v1817_v28 = vpop.f32.mrb[9].mxu0 }
 0x6ae   : > { %v967_v29 = vpop.f32.mrb[10].mxu0 }
 0x6af   : > { %1904 = vtanh.f32 %v970_v27  ;;  %v1818_v30 = vpop.f32.mrb[11].mxu0  ;;  %v1708_v32 = vmul.f32 -1.442695, %v970_v27 }
 0x6b1   : > { %1906 = vpow2.f32 %v1708_v32 }
 0x6b9   : > { %v1905_v31 = vpop.eup %1904 }
 0x6ba   : > { %989 = vrot.lane.b32.xlu1 %v1905_v31, %s1976_s20 }
 0x6bb   : > { %v1907_v33 = vpop.eup %1906 }
 0x6bc   : > { %v974_v34 = vadd.f32 1.0, %v1907_v33 }
 0x6be   : > { %1908 = vrcp.f32 %v974_v34 }
 0x6c8   : > { %v1909_v35 = vpop.eup %1908 }
 0x6c9   : > { %v987_v39 = vmul.f32 %v1909_v35, %v985_v38 }
 0x72c   : > { %v990_v36 = vpop.permute.xlu1 %989 }
 0x72d   : > { %v992_v37 = vmul.f32 %v1909_v35, %v990_v36 }
 0x72f   : > { %994 = vrot.lane.b32.xlu1 %v992_v37, %s1975_s28 }
 0x7a1   : > { %v995_v40 = vpop.permute.xlu1 %994 }
 0x7a2   : > { %v997_v41 = vadd.f32 %v995_v40, %v987_v39  ;;  %v1198_v40 = vld [vmem:[#allocation2 + $0x4] sm:$0x1] }
 0x7a4   : > { %1910 = vtanh.f32 %v997_v41 }
 0x7ae   : > { %v1911_v44 = vpop.eup %1910 }
 0x7af   : > { %1000 = vrot.lane.b32.xlu0 %v1911_v44, %s1976_s20 }
 0x7b3   : > { %1010 = vrot.lane.b32.xlu0 %v997_v41, %s1977_s21 }
 0x821   : > { %v1001_v45 = vpop.permute.xlu0 %1000 }
 0x822   : > { %v1003_v46 = vmul.f32 %v1909_v35, %v1001_v45 }
 0x824   : > { %1005 = vrot.lane.b32.xlu1 %v1003_v46, %s1975_s28 }
 0x825   : > { %v1011_v47 = vpop.permute.xlu0 %1010 }
 0x826   : > { %1013 = vst.msk [vmem:[#allocation4] sm:$0x1] %vm818_vm5, %v1011_v47 }
 0x82d   : > { %v1712_v48 = vld [vmem:[#allocation4] ss:$0 sm:$0xff] }
 0x82e   : > { %1075 = vrot.lane.b32.xlu0 %v1712_v48, %s1975_s28 }
 0x896   : > { %v1006_v49 = vpop.permute.xlu1 %1005 }
 0x897   : > { %1008 = vst.msk [vmem:[#allocation3] sm:$0x1] %vm818_vm5, %v1006_v49  ;;  %1014 = vst.msk [vmem:[%s2198_s3 + $0x1] sm:$0x1] %vm818_vm5, %v1006_v49 }
 0x89e   : > { %v1015_v50 = vld [vmem:[#allocation3] sm:$0x1] }
 0x89f   : > { %v1017_v51 = vpack.c.bf16 %v1015_v50, %v1015_v50 }
 0x8a0   : > { %v1076_v2 = vpop.permute.xlu0 %1075 }
 0x8a1   : > { %1824 = vmatmul.mubr.msk.bf16.vlgmr.msra.gmra.mrb[8].mxu1 %vm717_vm4, %v1017_v51 }
 0x8a2   : > { %1836 = vmatpush3.bf16.msra.mxu1 %v2149_v42  ;;  %1839 = vmatprep.mubr.msk.bf16.mxu1 %vm1973_vm0, %v1972_v3 }
 0x8a3   : > { %1837 = vmatprep.subr.bf16.mxu1 %v1972_v3 }
 0x8a6   : > { %1838 = vmatpush3.bf16.msra.mxu1 %v2156_v43 }
 0x8a7   : > { %1851 = vmatprep.subr.bf16.mxu1 %v1972_v3 }
 0x974   : > { %v1055_v53 = vpop.f32.mrb[8].mxu1 }
 0x975   : > { %v1061_v54 = vadd.f32 %v1055_v53, %v1016_v52  ;;  %v1825_v56 = vpop.f32.mrb[9].mxu1 }
 0x976   : > { %v1058_v57 = vpop.f32.mrb[10].mxu1 }
 0x977   : > { %1912 = vtanh.f32 %v1061_v54  ;;  %v1826_v58 = vpop.f32.mrb[11].mxu1  ;;  %v1711_v60 = vmul.f32 -1.442695, %v1061_v54 }
 0x979   : > { %1914 = vpow2.f32 %v1711_v60 }
 0x981   : > { %v1913_v59 = vpop.eup %1912 }
 0x982   : > { %1080 = vrot.lane.b32.xlu1 %v1913_v59, %s1976_s20 }
 0x983   : > { %v1915_v61 = vpop.eup %1914 }
 0x984   : > { %v1065_v62 = vadd.f32 1.0, %v1915_v61 }
 0x986   : > { %1916 = vrcp.f32 %v1065_v62 }
 0x990   : > { %v1917_v63 = vpop.eup %1916 }
 0x991   : > { %v1078_v4 = vmul.f32 %v1917_v63, %v1076_v2 }
 0x9f4   : > { %v1081_v0 = vpop.permute.xlu1 %1080 }
 0x9f5   : > { %v1083_v1 = vmul.f32 %v1917_v63, %v1081_v0 }
 0x9f7   : > { %1085 = vrot.lane.b32.xlu1 %v1083_v1, %s1975_s28 }
 0xa69   : > { %v1086_v5 = vpop.permute.xlu1 %1085 }
 0xa6a   : > { %v1088_v6 = vadd.f32 %v1086_v5, %v1078_v4  ;;  %v1289_v5 = vld [vmem:[#allocation2 + $0x5] sm:$0x1] }
 0xa6c   : > { %1918 = vtanh.f32 %v1088_v6 }
 0xa76   : > { %v1919_v7 = vpop.eup %1918 }
 0xa77   : > { %1091 = vrot.lane.b32.xlu0 %v1919_v7, %s1976_s20 }
 0xa7b   : > { %1101 = vrot.lane.b32.xlu0 %v1088_v6, %s1977_s21 }
 0xae9   : > { %v1092_v8 = vpop.permute.xlu0 %1091 }
 0xaea   : > { %v1094_v9 = vmul.f32 %v1917_v63, %v1092_v8 }
 0xaec   : > { %1096 = vrot.lane.b32.xlu1 %v1094_v9, %s1975_s28 }
 0xaed   : > { %v1102_v10 = vpop.permute.xlu0 %1101 }
 0xaee   : > { %1104 = vst.msk [vmem:[#allocation4] sm:$0x1] %vm818_vm5, %v1102_v10 }
 0xaf5   : > { %v1715_v11 = vld [vmem:[#allocation4] ss:$0 sm:$0xff] }
 0xaf6   : > { %1166 = vrot.lane.b32.xlu0 %v1715_v11, %s1975_s28 }
 0xb5e   : > { %v1097_v12 = vpop.permute.xlu1 %1096 }
 0xb5f   : > { %1099 = vst.msk [vmem:[#allocation3] sm:$0x1] %vm818_vm5, %v1097_v12  ;;  %1105 = vst.msk [vmem:[%s2198_s3 + $0x2] sm:$0x1] %vm818_vm5, %v1097_v12 }
 0xb66   : > { %v1106_v13 = vld [vmem:[#allocation3] sm:$0x1] }
 0xb67   : > { %v1108_v14 = vpack.c.bf16 %v1106_v13, %v1106_v13 }
 0xb68   : > { %v1167_v28 = vpop.permute.xlu0 %1166 }
 0xb69   : > { %1832 = vmatmul.mubr.msk.bf16.vlgmr.msra.gmra.mrb[12].mxu0 %vm717_vm4, %v1108_v14 }
 0xb6a   : > { %1844 = vmatpush3.bf16.msra.mxu0 %v2149_v42  ;;  %1847 = vmatprep.mubr.msk.bf16.mxu0 %vm1973_vm0, %v1972_v3 }
 0xb6b   : > { %1845 = vmatprep.subr.bf16.mxu0 %v1972_v3 }
 0xb6e   : > { %1846 = vmatpush3.bf16.msra.mxu0 %v2156_v43 }
 0xb6f   : > { %1859 = vmatprep.subr.bf16.mxu0 %v1972_v3 }
 0xc3c   : > { %v1146_v16 = vpop.f32.mrb[12].mxu0 }
 0xc3d   : > { %v1152_v17 = vadd.f32 %v1146_v16, %v1107_v15  ;;  %v1833_v18 = vpop.f32.mrb[13].mxu0 }
 0xc3e   : > { %v1149_v19 = vpop.f32.mrb[14].mxu0 }
 0xc3f   : > { %1920 = vtanh.f32 %v1152_v17  ;;  %v1834_v20 = vpop.f32.mrb[15].mxu0  ;;  %v1714_v22 = vmul.f32 -1.442695, %v1152_v17 }
 0xc41   : > { %1922 = vpow2.f32 %v1714_v22 }
 0xc49   : > { %v1921_v21 = vpop.eup %1920 }
 0xc4a   : > { %1171 = vrot.lane.b32.xlu1 %v1921_v21, %s1976_s20 }
 0xc4b   : > { %v1923_v23 = vpop.eup %1922 }
 0xc4c   : > { %v1156_v24 = vadd.f32 1.0, %v1923_v23 }
 0xc4e   : > { %1924 = vrcp.f32 %v1156_v24 }
 0xc58   : > { %v1925_v25 = vpop.eup %1924 }
 0xc59   : > { %v1169_v29 = vmul.f32 %v1925_v25, %v1167_v28 }
 0xcbc   : > { %v1172_v26 = vpop.permute.xlu1 %1171 }
 0xcbd   : > { %v1174_v27 = vmul.f32 %v1925_v25, %v1172_v26 }
 0xcbf   : > { %1176 = vrot.lane.b32.xlu1 %v1174_v27, %s1975_s28  ;;  %v1380_v27 = vld [vmem:[#allocation2 + $0x6] sm:$0x1] }
 0xd31   : > { %v1177_v30 = vpop.permute.xlu1 %1176 }
 0xd32   : > { %v1179_v31 = vadd.f32 %v1177_v30, %v1169_v29 }
 0xd34   : > { %1926 = vtanh.f32 %v1179_v31 }
 0xd3e   : > { %v1927_v32 = vpop.eup %1926 }
 0xd3f   : > { %1182 = vrot.lane.b32.xlu0 %v1927_v32, %s1976_s20 }
 0xd43   : > { %1192 = vrot.lane.b32.xlu0 %v1179_v31, %s1977_s21 }
 0xdb1   : > { %v1183_v33 = vpop.permute.xlu0 %1182 }
 0xdb2   : > { %v1185_v34 = vmul.f32 %v1925_v25, %v1183_v33 }
 0xdb4   : > { %1187 = vrot.lane.b32.xlu1 %v1185_v34, %s1975_s28 }
 0xdb5   : > { %v1193_v35 = vpop.permute.xlu0 %1192 }
 0xdb6   : > { %1195 = vst.msk [vmem:[#allocation4] sm:$0x1] %vm818_vm5, %v1193_v35 }
 0xdbd   : > { %v1718_v36 = vld [vmem:[#allocation4] ss:$0 sm:$0xff] }
 0xdbe   : > { %1257 = vrot.lane.b32.xlu0 %v1718_v36, %s1975_s28 }
 0xe26   : > { %v1188_v37 = vpop.permute.xlu1 %1187 }
 0xe27   : > { %1190 = vst.msk [vmem:[#allocation3] sm:$0x1] %vm818_vm5, %v1188_v37  ;;  %1196 = vst.msk [vmem:[%s2198_s3 + $0x3] sm:$0x1] %vm818_vm5, %v1188_v37 }
 0xe2e   : > { %v1197_v38 = vld [vmem:[#allocation3] sm:$0x1] }
 0xe2f   : > { %v1199_v39 = vpack.c.bf16 %v1197_v38, %v1197_v38 }
 0xe30   : > { %v1258_v56 = vpop.permute.xlu0 %1257 }
 0xe31   : > { %1840 = vmatmul.mubr.msk.bf16.vlgmr.msra.gmra.mrb[12].mxu1 %vm717_vm4, %v1199_v39 }
 0xe32   : > { %1852 = vmatpush3.bf16.msra.mxu1 %v2149_v42  ;;  %1855 = vmatprep.mubr.msk.bf16.mxu1 %vm1973_vm0, %v1972_v3 }
 0xe33   : > { %1853 = vmatprep.subr.bf16.mxu1 %v1972_v3 }
 0xe36   : > { %1854 = vmatpush3.bf16.msra.mxu1 %v2156_v43 }
 0xf04   : > { %v1237_v41 = vpop.f32.mrb[12].mxu1 }
 0xf05   : > { %v1243_v44 = vadd.f32 %v1237_v41, %v1198_v40  ;;  %v1841_v45 = vpop.f32.mrb[13].mxu1 }
 0xf06   : > { %v1240_v46 = vpop.f32.mrb[14].mxu1 }
 0xf07   : > { %1928 = vtanh.f32 %v1243_v44  ;;  %v1842_v47 = vpop.f32.mrb[15].mxu1  ;;  %v1717_v49 = vmul.f32 -1.442695, %v1243_v44 }
 0xf09   : > { %1930 = vpow2.f32 %v1717_v49 }
 0xf11   : > { %v1929_v48 = vpop.eup %1928 }
 0xf12   : > { %1262 = vrot.lane.b32.xlu1 %v1929_v48, %s1976_s20 }
 0xf13   : > { %v1931_v50 = vpop.eup %1930 }
 0xf14   : > { %v1247_v51 = vadd.f32 1.0, %v1931_v50 }
 0xf16   : > { %1932 = vrcp.f32 %v1247_v51 }
 0xf20   : > { %v1933_v52 = vpop.eup %1932 }
 0xf21   : > { %v1260_v57 = vmul.f32 %v1933_v52, %v1258_v56 }
 0xf84   : > { %v1263_v53 = vpop.permute.xlu1 %1262 }
 0xf85   : > { %v1265_v54 = vmul.f32 %v1933_v52, %v1263_v53 }
 0xf87   : > { %1267 = vrot.lane.b32.xlu1 %v1265_v54, %s1975_s28  ;;  %v1471_v54 = vld [vmem:[#allocation2 + $0x7] sm:$0x1] }
 0xff9   : > { %v1268_v58 = vpop.permute.xlu1 %1267 }
 0xffa   : > { %v1270_v59 = vadd.f32 %v1268_v58, %v1260_v57 }
 0xffc   : > { %1934 = vtanh.f32 %v1270_v59 }
0x1006   : > { %v1935_v60 = vpop.eup %1934 }
0x1007   : > { %1273 = vrot.lane.b32.xlu0 %v1935_v60, %s1976_s20 }
0x100b   : > { %1283 = vrot.lane.b32.xlu0 %v1270_v59, %s1977_s21 }
0x1079   : > { %v1274_v61 = vpop.permute.xlu0 %1273 }
0x107a   : > { %v1276_v62 = vmul.f32 %v1933_v52, %v1274_v61 }
0x107c   : > { %1278 = vrot.lane.b32.xlu1 %v1276_v62, %s1975_s28 }
0x107d   : > { %v1284_v63 = vpop.permute.xlu0 %1283 }
0x107e   : > { %1286 = vst.msk [vmem:[#allocation4] sm:$0x1] %vm818_vm5, %v1284_v63 }
0x1085   : > { %v1721_v0 = vld [vmem:[#allocation4] ss:$0 sm:$0xff] }
0x1086   : > { %1348 = vrot.lane.b32.xlu0 %v1721_v0, %s1975_s28 }
0x10ee   : > { %v1279_v1 = vpop.permute.xlu1 %1278 }
0x10ef   : > { %1281 = vst.msk [vmem:[#allocation3] sm:$0x1] %vm818_vm5, %v1279_v1  ;;  %1287 = vst.msk [vmem:[%s2198_s3 + $0x4] sm:$0x1] %vm818_vm5, %v1279_v1 }
0x10f6   : > { %v1288_v2 = vld [vmem:[#allocation3] sm:$0x1] }
0x10f7   : > { %v1290_v4 = vpack.c.bf16 %v1288_v2, %v1288_v2 }
0x10f9   : > { %1848 = vmatmul.mubr.msk.bf16.vlgmr.msra.gmra.mrb[16].mxu0 %vm717_vm4, %v1290_v4 }
0x10fa   : > { %1860 = vmatpush3.bf16.msra.mxu0 %v2149_v42  ;;  %1863 = vmatprep.mubr.msk.bf16.mxu0 %vm1973_vm0, %v1972_v3 }
0x10fb   : > { %1861 = vmatprep.subr.bf16.mxu0 %v1972_v3 }
0x10fe   : > { %1862 = vmatpush3.bf16.msra.mxu0 %v2156_v43  ;;  %v1349_v43 = vpop.permute.xlu0 %1348 }
0x11cc   : > { %v1328_v6 = vpop.f32.mrb[16].mxu0 }
0x11cd   : > { %v1334_v7 = vadd.f32 %v1328_v6, %v1289_v5  ;;  %v1849_v8 = vpop.f32.mrb[17].mxu0 }
0x11ce   : > { %v1331_v9 = vpop.f32.mrb[18].mxu0 }
0x11cf   : > { %1936 = vtanh.f32 %v1334_v7  ;;  %v1850_v10 = vpop.f32.mrb[19].mxu0  ;;  %v1720_v12 = vmul.f32 -1.442695, %v1334_v7 }
0x11d1   : > { %1938 = vpow2.f32 %v1720_v12 }
0x11d9   : > { %v1937_v11 = vpop.eup %1936 }
0x11da   : > { %1353 = vrot.lane.b32.xlu1 %v1937_v11, %s1976_s20 }
0x11db   : > { %v1939_v42 = vpop.eup %1938 }
0x11dc   : > { %v1338_v13 = vadd.f32 1.0, %v1939_v42 }
0x11de   : > { %1940 = vrcp.f32 %v1338_v13 }
0x11e8   : > { %v1941_v14 = vpop.eup %1940 }
0x11e9   : > { %v1351_v16 = vmul.f32 %v1941_v14, %v1349_v43 }
0x124c   : > { %v1354_v15 = vpop.permute.xlu1 %1353 }
0x124d   : > { %v1356_v3 = vmul.f32 %v1941_v14, %v1354_v15 }
0x124f   : > { %1358 = vrot.lane.b32.xlu1 %v1356_v3, %s1975_s28 }
0x12c1   : > { %v1359_v17 = vpop.permute.xlu1 %1358 }
0x12c2   : > { %v1361_v18 = vadd.f32 %v1359_v17, %v1351_v16 }
0x12c4   : > { %1942 = vtanh.f32 %v1361_v18 }
0x12ce   : > { %v1943_v19 = vpop.eup %1942 }
0x12cf   : > { %1364 = vrot.lane.b32.xlu0 %v1943_v19, %s1976_s20 }
0x12d3   : > { %1374 = vrot.lane.b32.xlu0 %v1361_v18, %s1977_s21 }
0x1341   : > { %v1365_v20 = vpop.permute.xlu0 %1364 }
0x1342   : > { %v1367_v21 = vmul.f32 %v1941_v14, %v1365_v20 }
0x1344   : > { %1369 = vrot.lane.b32.xlu1 %v1367_v21, %s1975_s28 }
0x1345   : > { %v1375_v22 = vpop.permute.xlu0 %1374 }
0x1346   : > { %1377 = vst.msk [vmem:[#allocation4] sm:$0x1] %vm818_vm5, %v1375_v22  ;;  %v1728_v22 = vld [vmem:[%s2343_s12] ss:$0 sm:$0xff] }
0x134d   : > { %v1724_v23 = vld [vmem:[#allocation4] ss:$0 sm:$0xff] }
0x134e   : > { %1439 = vrot.lane.b32.xlu0 %v1724_v23, %s1975_s28 }
0x13b6   : > { %v1370_v24 = vpop.permute.xlu1 %1369 }
0x13b7   : > { %1372 = vst.msk [vmem:[#allocation3] sm:$0x1] %vm818_vm5, %v1370_v24  ;;  %1378 = vst.msk [vmem:[%s2198_s3 + $0x5] sm:$0x1] %vm818_vm5, %v1370_v24  ;;  %v1729_v24 = vld [vmem:[%s2344_s13] ss:$0 sm:$0xff] }
0x13be   : > { %v1379_v25 = vld [vmem:[#allocation3] sm:$0x1] }
0x13bf   : > { %v1381_v26 = vpack.c.bf16 %v1379_v25, %v1379_v25 }
0x13c0   : > { %v1440_v40 = vpop.permute.xlu0 %1439 }
0x13c1   : > { %1856 = vmatmul.mubr.msk.bf16.vlgmr.msra.gmra.mrb[16].mxu1 %vm717_vm4, %v1381_v26 }
0x1494   : > { %v1419_v28 = vpop.f32.mrb[16].mxu1 }
0x1495   : > { %v1425_v29 = vadd.f32 %v1419_v28, %v1380_v27  ;;  %v1857_v30 = vpop.f32.mrb[17].mxu1 }
0x1496   : > { %v1422_v31 = vpop.f32.mrb[18].mxu1 }
0x1497   : > { %1944 = vtanh.f32 %v1425_v29  ;;  %v1858_v32 = vpop.f32.mrb[19].mxu1  ;;  %v1723_v34 = vmul.f32 -1.442695, %v1425_v29 }
0x1499   : > { %1946 = vpow2.f32 %v1723_v34 }
0x14a1   : > { %v1945_v33 = vpop.eup %1944 }
0x14a2   : > { %1444 = vrot.lane.b32.xlu1 %v1945_v33, %s1976_s20 }
0x14a3   : > { %v1947_v35 = vpop.eup %1946 }
0x14a4   : > { %v1429_v36 = vadd.f32 1.0, %v1947_v35 }
0x14a6   : > { %1948 = vrcp.f32 %v1429_v36 }
0x14b0   : > { %v1949_v37 = vpop.eup %1948 }
0x14b1   : > { %v1442_v41 = vmul.f32 %v1949_v37, %v1440_v40 }
0x1514   : > { %v1445_v38 = vpop.permute.xlu1 %1444 }
0x1515   : > { %v1447_v39 = vmul.f32 %v1949_v37, %v1445_v38 }
0x1517   : > { %1449 = vrot.lane.b32.xlu1 %v1447_v39, %s1975_s28  ;;  %v1731_v39 = vld [vmem:[%s2346_s15] ss:$0 sm:$0xff] }
0x1589   : > { %v1450_v44 = vpop.permute.xlu1 %1449 }
0x158a   : > { %v1452_v45 = vadd.f32 %v1450_v44, %v1442_v41 }
0x158c   : > { %1950 = vtanh.f32 %v1452_v45 }
0x1596   : > { %v1951_v46 = vpop.eup %1950 }
0x1597   : > { %1455 = vrot.lane.b32.xlu0 %v1951_v46, %s1976_s20 }
0x159b   : > { %1465 = vrot.lane.b32.xlu0 %v1452_v45, %s1977_s21 }
0x1609   : > { %v1456_v47 = vpop.permute.xlu0 %1455 }
0x160a   : > { %v1458_v48 = vmul.f32 %v1949_v37, %v1456_v47 }
0x160c   : > { %1460 = vrot.lane.b32.xlu1 %v1458_v48, %s1975_s28 }
0x160d   : > { %v1466_v49 = vpop.permute.xlu0 %1465 }
0x160e   : > { %1468 = vst.msk [vmem:[#allocation4] sm:$0x1] %vm818_vm5, %v1466_v49 }
0x1615   : > { %v1727_v50 = vld [vmem:[#allocation4] ss:$0 sm:$0xff] }
0x1616   : > { %1530 = vrot.lane.b32.xlu0 %v1727_v50, %s1975_s28 }
0x167e   : > { %v1461_v51 = vpop.permute.xlu1 %1460 }
0x167f   : > { %1463 = vst.msk [vmem:[#allocation3] sm:$0x1] %vm818_vm5, %v1461_v51  ;;  %1469 = vst.msk [vmem:[%s2198_s3 + $0x6] sm:$0x1] %vm818_vm5, %v1461_v51 }
0x1686   : > { %v1470_v52 = vld [vmem:[#allocation3] sm:$0x1] }
0x1687   : > { %v1472_v53 = vpack.c.bf16 %v1470_v52, %v1470_v52 }
0x1688   : > { %v1531_v5 = vpop.permute.xlu0 %1530 }
0x1689   : > { %1864 = vmatmul.mubr.msk.bf16.vlgmr.msra.gmra.mrb[20].mxu0 %vm717_vm4, %v1472_v53 }
0x175c   : > { %v1510_v56 = vpop.f32.mrb[20].mxu0 }
0x175d   : > { %v1516_v57 = vadd.f32 %v1510_v56, %v1471_v54  ;;  %v1865_v58 = vpop.f32.mrb[21].mxu0 }
0x175e   : > { %v1513_v59 = vpop.f32.mrb[22].mxu0 }
0x175f   : > { %1952 = vtanh.f32 %v1516_v57  ;;  %v1866_v60 = vpop.f32.mrb[23].mxu0  ;;  %v1726_v62 = vmul.f32 -1.442695, %v1516_v57 }
0x1761   : > { %1954 = vpow2.f32 %v1726_v62 }
0x1769   : > { %v1953_v61 = vpop.eup %1952 }
0x176a   : > { %1535 = vrot.lane.b32.xlu1 %v1953_v61, %s1976_s20 }
0x176b   : > { %v1955_v63 = vpop.eup %1954 }
0x176c   : > { %v1520_v0 = vadd.f32 1.0, %v1955_v63 }
0x176e   : > { %1956 = vrcp.f32 %v1520_v0 }
0x1778   : > { %v1957_v1 = vpop.eup %1956 }
0x1779   : > { %v1533_v6 = vmul.f32 %v1957_v1, %v1531_v5 }
0x17dc   : > { %v1536_v2 = vpop.permute.xlu1 %1535 }
0x17dd   : > { %v1538_v4 = vmul.f32 %v1957_v1, %v1536_v2 }
0x17df   : > { %1540 = vrot.lane.b32.xlu1 %v1538_v4, %s1975_s28 }
0x1851   : > { %v1541_v7 = vpop.permute.xlu1 %1540 }
0x1852   : > { %v1543_v8 = vadd.f32 %v1541_v7, %v1533_v6 }
0x1854   : > { %1958 = vtanh.f32 %v1543_v8 }
0x185e   : > { %v1959_v9 = vpop.eup %1958 }
0x185f   : > { %1546 = vrot.lane.b32.xlu0 %v1959_v9, %s1976_s20 }
0x18d1   : > { %v1547_v10 = vpop.permute.xlu0 %1546 }
0x18d2   : > { %v1549_v11 = vmul.f32 %v1957_v1, %v1547_v10 }
0x18d4   : > { %1551 = vrot.lane.b32.xlu1 %v1549_v11, %s1975_s28 }
0x1946   : > { %v1552_v12 = vpop.permute.xlu1 %1551 }
0x1947   : > { %1554 = vst.msk [vmem:[#allocation3] sm:$0x1] %vm818_vm5, %v1552_v12  ;;  %1560 = vst.msk [vmem:[%s2198_s3 + $0x7] sm:$0x1] %vm818_vm5, %v1552_v12 }
0x194e   : > { %v1561_v42 = vld [vmem:[%s2198_s3] sm:$0xff] }
0x194f   : > { %v1564_v13 = vsel %vm717_vm4, %v1561_v42, 0.0 }
0x1950   : > { %1565 = vadd.xlane.f32.xlu0 %v1564_v13 }
0x19dd   : > { %v1566_v14 = vpop.xlane.xlu0 %1565 }
0x19de   : > { %v1567_v15 = vmul.f32 0.03125, %v1566_v14 }
0x19e0   : > { %v1568_v3 = vsub.f32 %v1561_v42, %v1567_v15 }
0x19e2   : > { %v1569_v43 = vmul.f32 %v1568_v3, %v1568_v3 }
0x19e4   : > { %v1570_v16 = vsel %vm717_vm4, %v1569_v43, 0.0 }
0x19e5   : > { %1571 = vadd.xlane.f32.xlu1 %v1570_v16 }
0x19f6   : > { %1556 = vrot.lane.b32.xlu1 %v1543_v8, %s1977_s21 }
0x1a72   : > { %v1572_v17 = vpop.xlane.xlu1 %1571 }
0x1a73   : > { %v1573_v18 = vmul.f32 0.03125, %v1572_v17 }
0x1a75   : > { %v1574_v19 = vadd.f32 1e-05, %v1573_v18 }
0x1a76   : > { %v1557_v20 = vpop.permute.xlu1 %1556 }
0x1a77   : > { %1960 = vrsqrt.f32 %v1574_v19  ;;  %1559 = vst.msk [vmem:[#allocation4] sm:$0x1] %vm818_vm5, %v1557_v20 }
0x1a81   : > { %v1961_v21 = vpop.eup %1960 }
0x1a82   : > { %v1576_v23 = vmul.f32 %v1961_v21, %v1568_v3 }
0x1a84   : > { %v1583_v25 = vmul.f32 %v1728_v22, %v1576_v23 }
0x1a86   : > { %v1590_v26 = vadd.f32 %v1729_v24, %v1583_v25 }
0x1a88   : > { %v1591_v27 = vadd.f32 %v1590_v26, %v2175_v55  ;;  %v1730_v55 = vld [vmem:[%s2345_s14] ss:$0 sm:$0xff] }
0x1a8a   : > { %v1594_v28 = vsel %vm717_vm4, %v1591_v27, 0.0 }
0x1a8b   : > { %1595 = vadd.xlane.f32.xlu0 %v1594_v28 }
0x1b18   : > { %v1596_v29 = vpop.xlane.xlu0 %1595 }
0x1b19   : > { %v1597_v30 = vmul.f32 0.03125, %v1596_v29 }
0x1b1b   : > { %v1598_v31 = vsub.f32 %v1591_v27, %v1597_v30 }
0x1b1d   : > { %v1599_v32 = vmul.f32 %v1598_v31, %v1598_v31 }
0x1b1f   : > { %v1600_v33 = vsel %vm717_vm4, %v1599_v32, 0.0 }
0x1b20   : > { %1601 = vadd.xlane.f32.xlu0 %v1600_v33 }
0x1bad   : > { %v1602_v34 = vpop.xlane.xlu0 %1601 }
0x1bae   : > { %v1603_v35 = vmul.f32 0.03125, %v1602_v34 }
0x1bb0   : > { %v1604_v36 = vadd.f32 1e-05, %v1603_v35 }
0x1bb2   : > { %1962 = vrsqrt.f32 %v1604_v36 }
0x1bbc   : > { %v1963_v37 = vpop.eup %1962 }
0x1bbd   : > { %v1606_v38 = vmul.f32 %v1963_v37, %v1598_v31 }
0x1bbf   : > { %v1613_v40 = vmul.f32 %v1730_v55, %v1606_v38 }
0x1bc1   : > { %v1620_v41 = vadd.f32 %v1731_v39, %v1613_v40 }
0x1bc3   : > { %1621 = vst.msk [vmem:[%s2198_s3] sm:$0xff] %vm717_vm4, %v1620_v41 }
0x1bc4 PF: > { %s30_s25 = sadd.s32 1, %s1970_s25  }
0x1bc5   : > { %p27_p4 = scmp.ge.s32.totalorder %s30_s25, 4  }
0x1bc7   :  { %29 = sbr.rel (!%p27_p4) target bundleno = 3 (0x3), region = 114 }

// kernel: e3net_forward.12
= control target key start
LH: loop header
LB: loop body
LE: loop exit
PB: predicated region body
PF: predicated region fallthrough
CT: control target
= control target key end

     0   :  { %s2044_s25 = smov 0   ;;  %s2301_s0 = inlined_call_operand.vmem [shape: f32[2,8,32], index: 0, kind: input, shape index: {}]   ;;  %s2302_s1 = inlined_call_operand.vmem [shape: bf16[32,64], index: 1, kind: input, shape index: {}]   ;;  %s2303_s2 = inlined_call_operand.vmem [shape: f32[1,64], index: 2, kind: input, shape index: {}]   ;;  %s2304_s3 = inlined_call_operand.<no memory space> [shape: f32[1,1], index: 3, kind: input, shape index: {}]   ;;  %s2305_s4 = inlined_call_operand.vmem [shape: bf16[64,32], index: 4, kind: input, shape index: {}]   ;;  %s2306_s5 = inlined_call_operand.vmem [shape: f32[1,32], index: 5, kind: input, shape index: {}]   ;;  %s2307_s7 = inlined_call_operand.vmem [shape: f32[1,32], index: 7, kind: input, shape index: {}]   ;;  %s2308_s8 = inlined_call_operand.vmem [shape: f32[1,32], index: 8, kind: input, shape index: {}]   ;;  %s2309_s9 = inlined_call_operand.vmem [shape: bf16[32,128], index: 9, kind: input, shape index: {}]   ;;  %s2310_s10 = inlined_call_operand.vmem [shape: f32[1,128], index: 10, kind: input, shape index: {}]   ;;  %s2311_s11 = inlined_call_operand.vmem [shape: bf16[32,128], index: 11, kind: input, shape index: {}]   ;;  %s2312_s12 = inlined_call_operand.vmem [shape: f32[1,32], index: 12, kind: input, shape index: {}]   ;;  %s2313_s13 = inlined_call_operand.vmem [shape: f32[1,32], index: 13, kind: input, shape index: {}]   ;;  %s2314_s14 = inlined_call_operand.vmem [shape: f32[1,32], index: 14, kind: input, shape index: {}]   ;;  %s2315_s15 = inlined_call_operand.vmem [shape: f32[1,32], index: 15, kind: input, shape index: {}]   ;;  %s2316_s16 = inlined_call_operand.vmem [shape: f32[2,8,32], index: 16, kind: output, shape index: {}]   ;;  %s2317_s6 = inlined_call_operand.<no memory space> [shape: f32[1,1], index: 6, kind: input, shape index: {}]  }
   0x1   :  { %2318 = sst [smem:[#allocation7_spill]] %s2301_s0  ;;  %v21_v0 = vstv %s2304_s3  ;;  %v23_v1 = vstv %s2317_s6 }
   0x2   :  { %22 = vst [vmem:[#allocation5] sm:$0x1] %v21_v0  ;;  %24 = vst [vmem:[#allocation6] sm:$0x1] %v23_v1 }
   0x3 LB: > { %s1660_s26 = sadd.s32 4294967295, %s1945_s25   ;;  %p1664_p0 = scmp.ge.s32.totalorder %s1945_s25, 1  ;;  %s1945_s25 = sphi %s2044_s25, %s30_s25  }
   0x4   : > { %p465_p1 = scmp.lt.s32.totalorder %s1945_s25, 3 }
   0x6   : > { %p466_p2 = pnand %p1664_p0, %p465_p1 }
   0x7   : > { %v1859_v2 = vld [vmem:[%s2302_s1] sm:$0xff] (!%p466_p2)   ;;  %v1947_v3 = vmov (!%p466_p2), 0.0   ;;  %v1860_v4 = vld [vmem:[%s2302_s1 + $0x8] sm:$0xff] (!%p466_p2)   ;;  %vm1948_vm0 = vmmov (!%p466_p2), 0   ;;  %p513_p3 = scmp.lt.s32.totalorder (!%p466_p2), %s1660_s26, 1  ;;  %v1949_v7 = vmov (!%p466_p2), 0  }
   0x8   : > { %469 = sbr.rel (%p466_p2) target bundleno = 7105 (0x1bc1), region = 84  ;;  %1752 = vmatprep.subr.bf16.mxu0 (!%p466_p2), %v1947_v3  ;;  %1760 = vmatprep.subr.bf16.mxu1 (!%p466_p2), %v1947_v3  ;;  %v1861_v6 = vld [vmem:[%s2305_s4] sm:$0xff] (!%p466_p2)   ;;  %v1862_v8 = vld [vmem:[%s2305_s4 + $0x8] sm:$0xff] (!%p466_p2)   ;;  %s2319_s21 = sld [smem:[#allocation7_spill]] (!%p466_p2)  ;;  %vm547_vm1 = vcmask (!%p466_p2), 261120   ;;  %v1863_v12 = vld [vmem:[%s2305_s4 + $0x10] sm:$0xff] (!%p466_p2)  }
   0x9   : > { %1753 = vmatpush3.bf16.msra.mxu0 (!%p466_p2), %v1859_v2  ;;  %1756 = vmatprep.mubr.msk.bf16.mxu0 (!%p466_p2), %vm1948_vm0, %v1947_v3  ;;  %v1671_v5 = vld [vmem:[#allocation5] ss:$0 sm:$0xff] (!%p466_p2)  ;;  %v1678_v9 = vld [vmem:[#allocation6] ss:$0 sm:$0xff] (!%p466_p2)  ;;  %v1864_v13 = vld [vmem:[%s2305_s4 + $0x18] sm:$0xff] (!%p466_p2)   ;;  %vm644_vm3 = vcmask (!%p466_p2), 523264  }
   0xa   : > { %1754 = vmatprep.subr.bf16.mxu0 (!%p466_p2), %v1947_v3  ;;  %1858 = vset.pattern.permute.xlu0 (!%p466_p2), %v1949_v7  ;;  %v1667_v14 = vld [vmem:[%s2303_s2] ss:$0 sm:$0xff] (!%p466_p2)  ;;  %v1866_v40 = vld [vmem:[%s2309_s9 + $0x8] sm:$0xff] (!%p466_p2)   ;;  %vm803_vm5 = vcmask (!%p466_p2), 253952   ;;  %s1950_s3 = smov (!%p466_p2), 32   ;;  %s1951_s17 = smov (!%p466_p2), 64  }
   0xb   : > { %599 = vperm.xlu0 (!%p466_p2), %1858, %v1671_v5   ;;  %1761 = vmatpush3.bf16.msra.mxu1 (!%p466_p2), %v1861_v6  ;;  %v1672_v24 = vld [vmem:[%s2306_s5] ss:$0 sm:$0xff] (!%p466_p2)  ;;  %804 = vst.msk [vmem:[#allocation3] sm:$0x1] (!%p466_p2), %vm803_vm5, %v1947_v3  ;;  %805 = vst.msk [vmem:[#allocation4] sm:$0x1] (!%p466_p2), %vm803_vm5, %v1947_v3 }
   0xc   : > { %1762 = vmatprep.subr.bf16.mxu1 (!%p466_p2), %v1947_v3  ;;  %1768 = vmatprep.mubr.msk.bf16.mxu1 (!%p466_p2), %vm1948_vm0, %v1947_v3  ;;  %v1865_v39 = vld [vmem:[%s2309_s9] sm:$0xff] (!%p466_p2)   ;;  %v2125_v42 = vld [vmem:[%s2311_s11 + $0x8] sm:$0xff] (!%p466_p2)   ;;  %s1952_s19 = smov (!%p466_p2), 96  }
   0xd   : > { %1755 = vmatpush3.bf16.msra.mxu0 (!%p466_p2), %v1860_v4  ;;  %v2118_v41 = vld [vmem:[%s2311_s11] sm:$0xff] (!%p466_p2)  }
   0xe   : > { %1772 = vmatprep.subr.bf16.mxu0 (!%p466_p2), %v1947_v3  ;;  %v1679_v48 = vld [vmem:[%s2307_s7] ss:$0 sm:$0xff] (!%p466_p2) }
   0xf   : > { %s2321_s26 = smov (!%p513_p3, %s1660_s26), 1  ;;  %696 = vperm.xlu0 %1858, %v1678_v9   ;;  %1763 = vmatpush3.bf16.msra.mxu1 %v1862_v8  ;;  %v1680_v50 = vld [vmem:[%s2308_s8] ss:$0 sm:$0xff] }
  0x10   : > { %s1665_s18 = sshll.u32 %s2321_s26, 3  ;;  %1764 = vmatprep.subr.bf16.mxu1 %v1947_v3  ;;  %v1681_v56 = vld [vmem:[%s2310_s10] ss:$0 sm:$0xff] }
  0x11   : > { %s516_s22 = scalar_lea.vmem %s2319_s21, %s1665_s18 }
  0x12   : > { %v522_v10 = vld [vmem:[%s516_s22] sm:$0xff]  ;;  %v1689_v43 = vld [vmem:[#allocation4] ss:$0 sm:$0xff]  ;;  %v806_v54 = vld [vmem:[#allocation3] sm:$0x1]  ;;  %s2167_s22 = scalar_lea.vmem %s2316_s16, %s1665_s18 }
  0x13   : > { %v523_v11 = vpack.c.bf16 %v522_v10, %v522_v10  ;;  %1765 = vmatpush3.bf16.msra.mxu1 %v1863_v12  ;;  %v808_v55 = vpack.c.bf16 %v806_v54, %v806_v54 }
  0x14   : > { %1766 = vmatprep.subr.bf16.mxu1 %v1947_v3 }
  0x15   : > { %1757 = vmatmul.mubr.msk.bf16.vlgmr.msra.gmra.mrb[0].mxu0 %vm547_vm1, %v523_v11 }
  0x16   : > { %1776 = vmatprep.mubr.msk.bf16.mxu0 %vm1948_vm0, %v1947_v3  ;;  %1773 = vmatpush3.bf16.msra.mxu0 %v1865_v39 }
  0x17   : > { %1767 = vmatpush3.bf16.msra.mxu1 %v1864_v13  ;;  %1774 = vmatprep.subr.bf16.mxu0 %v1947_v3 }
  0x18   : > { %1788 = vmatprep.subr.bf16.mxu1 %v1947_v3 }
  0x1a   : > { %1775 = vmatpush3.bf16.msra.mxu0 %v1866_v40 }
  0x1b   : > { %1780 = vmatprep.subr.bf16.mxu0 %v1947_v3 }
  0x8a   : > { %v600_v18 = vpop.permute.xlu0 %599 }
  0x8e   : > { %v697_v28 = vpop.permute.xlu0 %696 }
  0xe8   : > { %v585_v15 = vpop.f32.mrb[0].mxu0 }
  0xe9   : > { %v586_v16 = vadd.f32 %v1667_v14, %v585_v15  ;;  %v1758_v17 = vpop.f32.mrb[1].mxu0 }
  0xea   : > { %v588_v19 = vpop.f32.mrb[2].mxu0 }
  0xeb   : > { %vm592_vm2 = vcmp.gt.f32.partialorder %v586_v16, 0.0  ;;  %v602_v20 = vmul.f32 %v600_v18, %v586_v16  ;;  %v1759_v21 = vpop.f32.mrb[3].mxu0 }
  0xed   : > { %v603_v22 = vsel %vm592_vm2, %v586_v16, %v602_v20 }
  0xee   : > { %v604_v23 = vpack.c.bf16 %v603_v22, %v603_v22 }
  0xf0   : > { %1769 = vmatmul.mubr.msk.bf16.vlgmr.msra.gmra.mrb[0].mxu1 %vm644_vm3, %v604_v23 }
  0xf1   : > { %1792 = vmatprep.mubr.msk.bf16.mxu1 %vm1948_vm0, %v1947_v3  ;;  %1789 = vmatpush3.bf16.msra.mxu1 %v2118_v41 }
  0xf2   : > { %1790 = vmatprep.subr.bf16.mxu1 %v1947_v3 }
  0xf5   : > { %1791 = vmatpush3.bf16.msra.mxu1 %v2125_v42 }
  0xf6   : > { %1804 = vmatprep.subr.bf16.mxu1 %v1947_v3 }
 0x1c3   : > { %v682_v25 = vpop.f32.mrb[0].mxu1 }
 0x1c4   : > { %v683_v26 = vadd.f32 %v1672_v24, %v682_v25  ;;  %v1770_v27 = vpop.f32.mrb[1].mxu1 }
 0x1c5   : > { %v685_v29 = vpop.f32.mrb[2].mxu1 }
 0x1c6   : > { %v699_v30 = vmul.f32 %v697_v28, %v683_v26  ;;  %v1771_v31 = vpop.f32.mrb[3].mxu1  ;;  %vm689_vm4 = vcmp.gt.f32.partialorder %v683_v26, 0.0 }
 0x1c8   : > { %v700_v32 = vsel %vm689_vm4, %v683_v26, %v699_v30 }
 0x1c9   : > { %v703_v33 = vsel %vm547_vm1, %v700_v32, 0.0 }
 0x1ca   : > { %704 = vadd.xlane.f32.xlu1 %v703_v33 }
 0x257   : > { %v705_v34 = vpop.xlane.xlu1 %704 }
 0x258   : > { %v707_v35 = vmul.f32 0.03125, %v705_v34 }
 0x25a   : > { %v708_v36 = vsub.f32 %v700_v32, %v707_v35 }
 0x25c   : > { %v709_v37 = vmul.f32 %v708_v36, %v708_v36 }
 0x25e   : > { %v710_v38 = vsel %vm547_vm1, %v709_v37, 0.0 }
 0x25f   : > { %711 = vadd.xlane.f32.xlu1 %v710_v38 }
 0x270   : > { %878 = vrot.lane.b32.xlu1 %v1689_v43, %s1950_s3 }
 0x2ec   : > { %v712_v44 = vpop.xlane.xlu1 %711 }
 0x2ed   : > { %v713_v45 = vmul.f32 0.03125, %v712_v44 }
 0x2ef   : > { %v714_v46 = vadd.f32 1e-05, %v713_v45 }
 0x2f0   : > { %v879_v12 = vpop.permute.xlu1 %878 }
 0x2f1   : > { %1869 = vrsqrt.f32 %v714_v46 }
 0x2fb   : > { %v1870_v47 = vpop.eup %1869 }
 0x2fc   : > { %v716_v49 = vmul.f32 %v1870_v47, %v708_v36 }
 0x2fe   : > { %v723_v51 = vmul.f32 %v1679_v48, %v716_v49 }
 0x300   : > { %v2136_v52 = vadd.f32 %v1680_v50, %v723_v51 }
 0x302   : > { %v731_v53 = vpack.c.bf16 %v2136_v52, %v2136_v52 }
 0x304   : > { %1777 = vmatmul.mubr.msk.bf16.vlgmr.msra.gmra.mrb[4].mxu0 %vm547_vm1, %v731_v53 }
 0x305   : > { %1781 = vmatpush3.bf16.msra.mxu0 %v2118_v41  ;;  %1784 = vmatprep.mubr.msk.bf16.mxu0 %vm1948_vm0, %v1947_v3 }
 0x306   : > { %1782 = vmatprep.subr.bf16.mxu0 %v1947_v3 }
 0x309   : > { %1783 = vmatpush3.bf16.msra.mxu0 %v2125_v42 }
 0x30a   : > { %1796 = vmatprep.subr.bf16.mxu0 %v1947_v3 }
 0x30c   : > { %1785 = vmatmul.mubr.msk.bf16.vlgmr.msra.gmra.mrb[8].mxu0 %vm547_vm1, %v808_v55 }
 0x30d   : > { %1797 = vmatpush3.bf16.msra.mxu0 %v2118_v41  ;;  %1800 = vmatprep.mubr.msk.bf16.mxu0 %vm1948_vm0, %v1947_v3 }
 0x30e   : > { %1798 = vmatprep.subr.bf16.mxu0 %v1947_v3 }
 0x311   : > { %1799 = vmatpush3.bf16.msra.mxu0 %v2125_v42 }
 0x312   : > { %1812 = vmatprep.subr.bf16.mxu0 %v1947_v3 }
 0x3d7   : > { %v792_v57 = vpop.f32.mrb[4].mxu0 }
 0x3d8   : > { %v793_v58 = vadd.f32 %v1681_v56, %v792_v57  ;;  %v1778_v59 = vpop.f32.mrb[5].mxu0 }
 0x3d9   : > { %v795_v60 = vpop.f32.mrb[6].mxu0 }
 0x3da   : > { %798 = vst [vmem:[#allocation2] sm:$0xff] %v793_v58  ;;  %v1779_v61 = vpop.f32.mrb[7].mxu0 }
 0x3df   : > { %v858_v62 = vpop.f32.mrb[8].mxu0 }
 0x3e0   : > { %v1786_v63 = vpop.f32.mrb[9].mxu0 }
 0x3e1   : > { %v807_v0 = vld [vmem:[#allocation2] sm:$0x1]  ;;  %v861_v1 = vpop.f32.mrb[10].mxu0  ;;  %v910_v24 = vld [vmem:[#allocation2 + $0x1] sm:$0x1] }
 0x3e2   : > { %v864_v2 = vadd.f32 %v858_v62, %v807_v0  ;;  %v1787_v4 = vpop.f32.mrb[11].mxu0  ;;  %v1001_v51 = vld [vmem:[#allocation2 + $0x2] sm:$0x1] }
 0x3e4   : > { %1871 = vtanh.f32 %v864_v2  ;;  %v1688_v6 = vmul.f32 -1.442695, %v864_v2 }
 0x3e6   : > { %1873 = vpow2.f32 %v1688_v6 }
 0x3ee   : > { %v1872_v5 = vpop.eup %1871 }
 0x3ef   : > { %883 = vrot.lane.b32.xlu0 %v1872_v5, %s1951_s17 }
 0x3f0   : > { %v1874_v7 = vpop.eup %1873 }
 0x3f1   : > { %v868_v8 = vadd.f32 1.0, %v1874_v7 }
 0x3f3   : > { %1875 = vrcp.f32 %v868_v8 }
 0x3fd   : > { %v1876_v9 = vpop.eup %1875 }
 0x3fe   : > { %v881_v13 = vmul.f32 %v1876_v9, %v879_v12 }
 0x461   : > { %v884_v10 = vpop.permute.xlu0 %883 }
 0x462   : > { %v886_v11 = vmul.f32 %v1876_v9, %v884_v10 }
 0x464   : > { %888 = vrot.lane.b32.xlu0 %v886_v11, %s1950_s3 }
 0x4d6   : > { %v889_v14 = vpop.permute.xlu0 %888 }
 0x4d7   : > { %v891_v15 = vadd.f32 %v889_v14, %v881_v13  ;;  %v1092_v14 = vld [vmem:[#allocation2 + $0x3] sm:$0x1] }
 0x4d9   : > { %1877 = vtanh.f32 %v891_v15 }
 0x4e3   : > { %v1878_v16 = vpop.eup %1877 }
 0x4e4   : > { %894 = vrot.lane.b32.xlu0 %v1878_v16, %s1951_s17 }
 0x556   : > { %v895_v17 = vpop.permute.xlu0 %894 }
 0x557   : > { %v897_v18 = vmul.f32 %v1876_v9, %v895_v17 }
 0x559   : > { %899 = vrot.lane.b32.xlu0 %v897_v18, %s1950_s3 }
 0x55d   : > { %904 = vrot.lane.b32.xlu0 %v891_v15, %s1952_s19 }
 0x5cb   : > { %v900_v19 = vpop.permute.xlu0 %899 }
 0x5cc   : > { %902 = vst.msk [vmem:[#allocation3] sm:$0x1] %vm803_vm5, %v900_v19  ;;  %908 = vst.msk [vmem:[%s2167_s22] sm:$0x1] %vm803_vm5, %v900_v19 }
 0x5cf   : > { %v905_v20 = vpop.permute.xlu0 %904 }
 0x5d0   : > { %907 = vst.msk [vmem:[#allocation4] sm:$0x1] %vm803_vm5, %v905_v20 }
 0x5d3   : > { %v909_v21 = vld [vmem:[#allocation3] sm:$0x1] }
 0x5d4   : > { %v911_v22 = vpack.c.bf16 %v909_v21, %v909_v21 }
 0x5d6   : > { %1793 = vmatmul.mubr.msk.bf16.vlgmr.msra.gmra.mrb[4].mxu1 %vm547_vm1, %v911_v22 }
 0x5d7   : > { %v1692_v23 = vld [vmem:[#allocation4] ss:$0 sm:$0xff]  ;;  %1805 = vmatpush3.bf16.msra.mxu1 %v2118_v41  ;;  %1808 = vmatprep.mubr.msk.bf16.mxu1 %vm1948_vm0, %v1947_v3 }
 0x5d8   : > { %969 = vrot.lane.b32.xlu0 %v1692_v23, %s1950_s3  ;;  %1806 = vmatprep.subr.bf16.mxu1 %v1947_v3 }
 0x5db   : > { %1807 = vmatpush3.bf16.msra.mxu1 %v2125_v42 }
 0x5dc   : > { %1820 = vmatprep.subr.bf16.mxu1 %v1947_v3 }
 0x64a   : > { %v970_v37 = vpop.permute.xlu0 %969 }
 0x6a9   : > { %v949_v25 = vpop.f32.mrb[4].mxu1 }
 0x6aa   : > { %v955_v26 = vadd.f32 %v949_v25, %v910_v24  ;;  %v1794_v27 = vpop.f32.mrb[5].mxu1 }
 0x6ab   : > { %v952_v28 = vpop.f32.mrb[6].mxu1 }
 0x6ac   : > { %1879 = vtanh.f32 %v955_v26  ;;  %v1795_v29 = vpop.f32.mrb[7].mxu1  ;;  %v1691_v31 = vmul.f32 -1.442695, %v955_v26 }
 0x6ae   : > { %1881 = vpow2.f32 %v1691_v31 }
 0x6b6   : > { %v1880_v30 = vpop.eup %1879 }
 0x6b7   : > { %974 = vrot.lane.b32.xlu1 %v1880_v30, %s1951_s17 }
 0x6b8   : > { %v1882_v32 = vpop.eup %1881 }
 0x6b9   : > { %v959_v33 = vadd.f32 1.0, %v1882_v32 }
 0x6bb   : > { %1883 = vrcp.f32 %v959_v33 }
 0x6c5   : > { %v1884_v34 = vpop.eup %1883 }
 0x6c6   : > { %v972_v38 = vmul.f32 %v1884_v34, %v970_v37 }
 0x729   : > { %v975_v35 = vpop.permute.xlu1 %974 }
 0x72a   : > { %v977_v36 = vmul.f32 %v1884_v34, %v975_v35 }
 0x72c   : > { %979 = vrot.lane.b32.xlu1 %v977_v36, %s1950_s3 }
 0x79e   : > { %v980_v39 = vpop.permute.xlu1 %979 }
 0x79f   : > { %v982_v40 = vadd.f32 %v980_v39, %v972_v38  ;;  %v1183_v39 = vld [vmem:[#allocation2 + $0x4] sm:$0x1] }
 0x7a1   : > { %1885 = vtanh.f32 %v982_v40 }
 0x7ab   : > { %v1886_v43 = vpop.eup %1885 }
 0x7ac   : > { %985 = vrot.lane.b32.xlu0 %v1886_v43, %s1951_s17 }
 0x7b0   : > { %995 = vrot.lane.b32.xlu0 %v982_v40, %s1952_s19 }
 0x81e   : > { %v986_v44 = vpop.permute.xlu0 %985 }
 0x81f   : > { %v988_v45 = vmul.f32 %v1884_v34, %v986_v44 }
 0x821   : > { %990 = vrot.lane.b32.xlu1 %v988_v45, %s1950_s3 }
 0x822   : > { %v996_v46 = vpop.permute.xlu0 %995 }
 0x823   : > { %998 = vst.msk [vmem:[#allocation4] sm:$0x1] %vm803_vm5, %v996_v46 }
 0x82a   : > { %v1695_v47 = vld [vmem:[#allocation4] ss:$0 sm:$0xff] }
 0x82b   : > { %1060 = vrot.lane.b32.xlu0 %v1695_v47, %s1950_s3 }
 0x893   : > { %v991_v48 = vpop.permute.xlu1 %990 }
 0x894   : > { %993 = vst.msk [vmem:[#allocation3] sm:$0x1] %vm803_vm5, %v991_v48  ;;  %999 = vst.msk [vmem:[%s2167_s22 + $0x1] sm:$0x1] %vm803_vm5, %v991_v48 }
 0x89b   : > { %v1000_v49 = vld [vmem:[#allocation3] sm:$0x1] }
 0x89c   : > { %v1002_v50 = vpack.c.bf16 %v1000_v49, %v1000_v49 }
 0x89d   : > { %v1061_v1 = vpop.permute.xlu0 %1060 }
 0x89e   : > { %1801 = vmatmul.mubr.msk.bf16.vlgmr.msra.gmra.mrb[12].mxu0 %vm547_vm1, %v1002_v50 }
 0x89f   : > { %1813 = vmatpush3.bf16.msra.mxu0 %v2118_v41  ;;  %1816 = vmatprep.mubr.msk.bf16.mxu0 %vm1948_vm0, %v1947_v3 }
 0x8a0   : > { %1814 = vmatprep.subr.bf16.mxu0 %v1947_v3 }
 0x8a3   : > { %1815 = vmatpush3.bf16.msra.mxu0 %v2125_v42 }
 0x8a4   : > { %1828 = vmatprep.subr.bf16.mxu0 %v1947_v3 }
 0x971   : > { %v1040_v53 = vpop.f32.mrb[12].mxu0 }
 0x972   : > { %v1046_v54 = vadd.f32 %v1040_v53, %v1001_v51  ;;  %v1802_v55 = vpop.f32.mrb[13].mxu0 }
 0x973   : > { %v1043_v56 = vpop.f32.mrb[14].mxu0 }
 0x974   : > { %1887 = vtanh.f32 %v1046_v54  ;;  %v1803_v57 = vpop.f32.mrb[15].mxu0  ;;  %v1694_v59 = vmul.f32 -1.442695, %v1046_v54 }
 0x976   : > { %1889 = vpow2.f32 %v1694_v59 }
 0x97e   : > { %v1888_v58 = vpop.eup %1887 }
 0x97f   : > { %1065 = vrot.lane.b32.xlu1 %v1888_v58, %s1951_s17 }
 0x980   : > { %v1890_v60 = vpop.eup %1889 }
 0x981   : > { %v1050_v61 = vadd.f32 1.0, %v1890_v60 }
 0x983   : > { %1891 = vrcp.f32 %v1050_v61 }
 0x98d   : > { %v1892_v62 = vpop.eup %1891 }
 0x98e   : > { %v1063_v2 = vmul.f32 %v1892_v62, %v1061_v1 }
 0x9f1   : > { %v1066_v63 = vpop.permute.xlu1 %1065 }
 0x9f2   : > { %v1068_v0 = vmul.f32 %v1892_v62, %v1066_v63 }
 0x9f4   : > { %1070 = vrot.lane.b32.xlu1 %v1068_v0, %s1950_s3 }
 0xa66   : > { %v1071_v4 = vpop.permute.xlu1 %1070 }
 0xa67   : > { %v1073_v5 = vadd.f32 %v1071_v4, %v1063_v2  ;;  %v1274_v4 = vld [vmem:[#allocation2 + $0x5] sm:$0x1] }
 0xa69   : > { %1893 = vtanh.f32 %v1073_v5 }
 0xa73   : > { %v1894_v6 = vpop.eup %1893 }
 0xa74   : > { %1076 = vrot.lane.b32.xlu0 %v1894_v6, %s1951_s17 }
 0xa78   : > { %1086 = vrot.lane.b32.xlu0 %v1073_v5, %s1952_s19 }
 0xae6   : > { %v1077_v7 = vpop.permute.xlu0 %1076 }
 0xae7   : > { %v1079_v8 = vmul.f32 %v1892_v62, %v1077_v7 }
 0xae9   : > { %1081 = vrot.lane.b32.xlu1 %v1079_v8, %s1950_s3 }
 0xaea   : > { %v1087_v9 = vpop.permute.xlu0 %1086 }
 0xaeb   : > { %1089 = vst.msk [vmem:[#allocation4] sm:$0x1] %vm803_vm5, %v1087_v9 }
 0xaf2   : > { %v1698_v10 = vld [vmem:[#allocation4] ss:$0 sm:$0xff] }
 0xaf3   : > { %1151 = vrot.lane.b32.xlu0 %v1698_v10, %s1950_s3 }
 0xb5b   : > { %v1082_v11 = vpop.permute.xlu1 %1081 }
 0xb5c   : > { %1084 = vst.msk [vmem:[#allocation3] sm:$0x1] %vm803_vm5, %v1082_v11  ;;  %1090 = vst.msk [vmem:[%s2167_s22 + $0x2] sm:$0x1] %vm803_vm5, %v1082_v11 }
 0xb63   : > { %v1091_v12 = vld [vmem:[#allocation3] sm:$0x1] }
 0xb64   : > { %v1093_v13 = vpack.c.bf16 %v1091_v12, %v1091_v12 }
 0xb65   : > { %v1152_v27 = vpop.permute.xlu0 %1151 }
 0xb66   : > { %1809 = vmatmul.mubr.msk.bf16.vlgmr.msra.gmra.mrb[8].mxu1 %vm547_vm1, %v1093_v13 }
 0xb67   : > { %1821 = vmatpush3.bf16.msra.mxu1 %v2118_v41  ;;  %1824 = vmatprep.mubr.msk.bf16.mxu1 %vm1948_vm0, %v1947_v3 }
 0xb68   : > { %1822 = vmatprep.subr.bf16.mxu1 %v1947_v3 }
 0xb6b   : > { %1823 = vmatpush3.bf16.msra.mxu1 %v2125_v42 }
 0xb6c   : > { %1836 = vmatprep.subr.bf16.mxu1 %v1947_v3 }
 0xc39   : > { %v1131_v15 = vpop.f32.mrb[8].mxu1 }
 0xc3a   : > { %v1137_v16 = vadd.f32 %v1131_v15, %v1092_v14  ;;  %v1810_v17 = vpop.f32.mrb[9].mxu1 }
 0xc3b   : > { %v1134_v18 = vpop.f32.mrb[10].mxu1 }
 0xc3c   : > { %1895 = vtanh.f32 %v1137_v16  ;;  %v1811_v19 = vpop.f32.mrb[11].mxu1  ;;  %v1697_v21 = vmul.f32 -1.442695, %v1137_v16 }
 0xc3e   : > { %1897 = vpow2.f32 %v1697_v21 }
 0xc46   : > { %v1896_v20 = vpop.eup %1895 }
 0xc47   : > { %1156 = vrot.lane.b32.xlu1 %v1896_v20, %s1951_s17 }
 0xc48   : > { %v1898_v22 = vpop.eup %1897 }
 0xc49   : > { %v1141_v23 = vadd.f32 1.0, %v1898_v22 }
 0xc4b   : > { %1899 = vrcp.f32 %v1141_v23 }
 0xc55   : > { %v1900_v24 = vpop.eup %1899 }
 0xc56   : > { %v1154_v28 = vmul.f32 %v1900_v24, %v1152_v27 }
 0xcb9   : > { %v1157_v25 = vpop.permute.xlu1 %1156 }
 0xcba   : > { %v1159_v26 = vmul.f32 %v1900_v24, %v1157_v25 }
 0xcbc   : > { %1161 = vrot.lane.b32.xlu1 %v1159_v26, %s1950_s3  ;;  %v1365_v26 = vld [vmem:[#allocation2 + $0x6] sm:$0x1] }
 0xd2e   : > { %v1162_v29 = vpop.permute.xlu1 %1161 }
 0xd2f   : > { %v1164_v30 = vadd.f32 %v1162_v29, %v1154_v28 }
 0xd31   : > { %1901 = vtanh.f32 %v1164_v30 }
 0xd3b   : > { %v1902_v31 = vpop.eup %1901 }
 0xd3c   : > { %1167 = vrot.lane.b32.xlu0 %v1902_v31, %s1951_s17 }
 0xd40   : > { %1177 = vrot.lane.b32.xlu0 %v1164_v30, %s1952_s19 }
 0xdae   : > { %v1168_v32 = vpop.permute.xlu0 %1167 }
 0xdaf   : > { %v1170_v33 = vmul.f32 %v1900_v24, %v1168_v32 }
 0xdb1   : > { %1172 = vrot.lane.b32.xlu1 %v1170_v33, %s1950_s3 }
 0xdb2   : > { %v1178_v34 = vpop.permute.xlu0 %1177 }
 0xdb3   : > { %1180 = vst.msk [vmem:[#allocation4] sm:$0x1] %vm803_vm5, %v1178_v34 }
 0xdba   : > { %v1701_v35 = vld [vmem:[#allocation4] ss:$0 sm:$0xff] }
 0xdbb   : > { %1242 = vrot.lane.b32.xlu0 %v1701_v35, %s1950_s3 }
 0xe23   : > { %v1173_v36 = vpop.permute.xlu1 %1172 }
 0xe24   : > { %1175 = vst.msk [vmem:[#allocation3] sm:$0x1] %vm803_vm5, %v1173_v36  ;;  %1181 = vst.msk [vmem:[%s2167_s22 + $0x3] sm:$0x1] %vm803_vm5, %v1173_v36 }
 0xe2b   : > { %v1182_v37 = vld [vmem:[#allocation3] sm:$0x1] }
 0xe2c   : > { %v1184_v38 = vpack.c.bf16 %v1182_v37, %v1182_v37 }
 0xe2d   : > { %v1243_v55 = vpop.permute.xlu0 %1242 }
 0xe2e   : > { %1817 = vmatmul.mubr.msk.bf16.vlgmr.msra.gmra.mrb[16].mxu0 %vm547_vm1, %v1184_v38 }
 0xe2f   : > { %1829 = vmatpush3.bf16.msra.mxu0 %v2118_v41  ;;  %1832 = vmatprep.mubr.msk.bf16.mxu0 %vm1948_vm0, %v1947_v3 }
 0xe30   : > { %1830 = vmatprep.subr.bf16.mxu0 %v1947_v3 }
 0xe33   : > { %1831 = vmatpush3.bf16.msra.mxu0 %v2125_v42 }
 0xf01   : > { %v1222_v40 = vpop.f32.mrb[16].mxu0 }
 0xf02   : > { %v1228_v43 = vadd.f32 %v1222_v40, %v1183_v39  ;;  %v1818_v44 = vpop.f32.mrb[17].mxu0 }
 0xf03   : > { %v1225_v45 = vpop.f32.mrb[18].mxu0 }
 0xf04   : > { %1903 = vtanh.f32 %v1228_v43  ;;  %v1819_v46 = vpop.f32.mrb[19].mxu0  ;;  %v1700_v48 = vmul.f32 -1.442695, %v1228_v43 }
 0xf06   : > { %1905 = vpow2.f32 %v1700_v48 }
 0xf0e   : > { %v1904_v47 = vpop.eup %1903 }
 0xf0f   : > { %1247 = vrot.lane.b32.xlu1 %v1904_v47, %s1951_s17 }
 0xf10   : > { %v1906_v49 = vpop.eup %1905 }
 0xf11   : > { %v1232_v50 = vadd.f32 1.0, %v1906_v49 }
 0xf13   : > { %1907 = vrcp.f32 %v1232_v50 }
 0xf1d   : > { %v1908_v51 = vpop.eup %1907 }
 0xf1e   : > { %v1245_v56 = vmul.f32 %v1908_v51, %v1243_v55 }
 0xf81   : > { %v1248_v53 = vpop.permute.xlu1 %1247 }
 0xf82   : > { %v1250_v54 = vmul.f32 %v1908_v51, %v1248_v53 }
 0xf84   : > { %1252 = vrot.lane.b32.xlu1 %v1250_v54, %s1950_s3  ;;  %v1456_v54 = vld [vmem:[#allocation2 + $0x7] sm:$0x1] }
 0xff6   : > { %v1253_v57 = vpop.permute.xlu1 %1252 }
 0xff7   : > { %v1255_v58 = vadd.f32 %v1253_v57, %v1245_v56 }
 0xff9   : > { %1909 = vtanh.f32 %v1255_v58 }
0x1003   : > { %v1910_v59 = vpop.eup %1909 }
0x1004   : > { %1258 = vrot.lane.b32.xlu0 %v1910_v59, %s1951_s17 }
0x1008   : > { %1268 = vrot.lane.b32.xlu0 %v1255_v58, %s1952_s19 }
0x1076   : > { %v1259_v60 = vpop.permute.xlu0 %1258 }
0x1077   : > { %v1261_v61 = vmul.f32 %v1908_v51, %v1259_v60 }
0x1079   : > { %1263 = vrot.lane.b32.xlu1 %v1261_v61, %s1950_s3 }
0x107a   : > { %v1269_v62 = vpop.permute.xlu0 %1268 }
0x107b   : > { %1271 = vst.msk [vmem:[#allocation4] sm:$0x1] %vm803_vm5, %v1269_v62 }
0x1082   : > { %v1704_v63 = vld [vmem:[#allocation4] ss:$0 sm:$0xff] }
0x1083   : > { %1333 = vrot.lane.b32.xlu0 %v1704_v63, %s1950_s3 }
0x10eb   : > { %v1264_v0 = vpop.permute.xlu1 %1263 }
0x10ec   : > { %1266 = vst.msk [vmem:[#allocation3] sm:$0x1] %vm803_vm5, %v1264_v0  ;;  %1272 = vst.msk [vmem:[%s2167_s22 + $0x4] sm:$0x1] %vm803_vm5, %v1264_v0 }
0x10f3   : > { %v1273_v1 = vld [vmem:[#allocation3] sm:$0x1] }
0x10f4   : > { %v1275_v2 = vpack.c.bf16 %v1273_v1, %v1273_v1 }
0x10f6   : > { %1825 = vmatmul.mubr.msk.bf16.vlgmr.msra.gmra.mrb[12].mxu1 %vm547_vm1, %v1275_v2 }
0x10f7   : > { %1837 = vmatpush3.bf16.msra.mxu1 %v2118_v41  ;;  %1840 = vmatprep.mubr.msk.bf16.mxu1 %vm1948_vm0, %v1947_v3 }
0x10f8   : > { %1838 = vmatprep.subr.bf16.mxu1 %v1947_v3 }
0x10fb   : > { %1839 = vmatpush3.bf16.msra.mxu1 %v2125_v42  ;;  %v1334_v42 = vpop.permute.xlu0 %1333 }
0x11c9   : > { %v1313_v5 = vpop.f32.mrb[12].mxu1 }
0x11ca   : > { %v1319_v6 = vadd.f32 %v1313_v5, %v1274_v4  ;;  %v1826_v7 = vpop.f32.mrb[13].mxu1 }
0x11cb   : > { %v1316_v8 = vpop.f32.mrb[14].mxu1 }
0x11cc   : > { %1911 = vtanh.f32 %v1319_v6  ;;  %v1827_v9 = vpop.f32.mrb[15].mxu1  ;;  %v1703_v11 = vmul.f32 -1.442695, %v1319_v6 }
0x11ce   : > { %1913 = vpow2.f32 %v1703_v11 }
0x11d6   : > { %v1912_v10 = vpop.eup %1911 }
0x11d7   : > { %1338 = vrot.lane.b32.xlu1 %v1912_v10, %s1951_s17 }
0x11d8   : > { %v1914_v41 = vpop.eup %1913 }
0x11d9   : > { %v1323_v12 = vadd.f32 1.0, %v1914_v41 }
0x11db   : > { %1915 = vrcp.f32 %v1323_v12 }
0x11e5   : > { %v1916_v13 = vpop.eup %1915 }
0x11e6   : > { %v1336_v15 = vmul.f32 %v1916_v13, %v1334_v42 }
0x1249   : > { %v1339_v14 = vpop.permute.xlu1 %1338 }
0x124a   : > { %v1341_v3 = vmul.f32 %v1916_v13, %v1339_v14 }
0x124c   : > { %1343 = vrot.lane.b32.xlu1 %v1341_v3, %s1950_s3 }
0x12be   : > { %v1344_v16 = vpop.permute.xlu1 %1343 }
0x12bf   : > { %v1346_v17 = vadd.f32 %v1344_v16, %v1336_v15 }
0x12c1   : > { %1917 = vtanh.f32 %v1346_v17 }
0x12cb   : > { %v1918_v18 = vpop.eup %1917 }
0x12cc   : > { %1349 = vrot.lane.b32.xlu0 %v1918_v18, %s1951_s17 }
0x12d0   : > { %1359 = vrot.lane.b32.xlu0 %v1346_v17, %s1952_s19 }
0x133e   : > { %v1350_v19 = vpop.permute.xlu0 %1349 }
0x133f   : > { %v1352_v20 = vmul.f32 %v1916_v13, %v1350_v19 }
0x1341   : > { %1354 = vrot.lane.b32.xlu1 %v1352_v20, %s1950_s3 }
0x1342   : > { %v1360_v21 = vpop.permute.xlu0 %1359 }
0x1343   : > { %1362 = vst.msk [vmem:[#allocation4] sm:$0x1] %vm803_vm5, %v1360_v21  ;;  %v1711_v21 = vld [vmem:[%s2312_s12] ss:$0 sm:$0xff] }
0x134a   : > { %v1707_v22 = vld [vmem:[#allocation4] ss:$0 sm:$0xff] }
0x134b   : > { %1424 = vrot.lane.b32.xlu0 %v1707_v22, %s1950_s3 }
0x13b3   : > { %v1355_v23 = vpop.permute.xlu1 %1354 }
0x13b4   : > { %1357 = vst.msk [vmem:[#allocation3] sm:$0x1] %vm803_vm5, %v1355_v23  ;;  %1363 = vst.msk [vmem:[%s2167_s22 + $0x5] sm:$0x1] %vm803_vm5, %v1355_v23  ;;  %v1712_v23 = vld [vmem:[%s2313_s13] ss:$0 sm:$0xff] }
0x13bb   : > { %v1364_v24 = vld [vmem:[#allocation3] sm:$0x1] }
0x13bc   : > { %v1366_v25 = vpack.c.bf16 %v1364_v24, %v1364_v24 }
0x13bd   : > { %v1425_v39 = vpop.permute.xlu0 %1424 }
0x13be   : > { %1833 = vmatmul.mubr.msk.bf16.vlgmr.msra.gmra.mrb[20].mxu0 %vm547_vm1, %v1366_v25 }
0x1491   : > { %v1404_v27 = vpop.f32.mrb[20].mxu0 }
0x1492   : > { %v1410_v28 = vadd.f32 %v1404_v27, %v1365_v26  ;;  %v1834_v29 = vpop.f32.mrb[21].mxu0 }
0x1493   : > { %v1407_v30 = vpop.f32.mrb[22].mxu0 }
0x1494   : > { %1919 = vtanh.f32 %v1410_v28  ;;  %v1835_v31 = vpop.f32.mrb[23].mxu0  ;;  %v1706_v33 = vmul.f32 -1.442695, %v1410_v28 }
0x1496   : > { %1921 = vpow2.f32 %v1706_v33 }
0x149e   : > { %v1920_v32 = vpop.eup %1919 }
0x149f   : > { %1429 = vrot.lane.b32.xlu1 %v1920_v32, %s1951_s17 }
0x14a0   : > { %v1922_v34 = vpop.eup %1921 }
0x14a1   : > { %v1414_v35 = vadd.f32 1.0, %v1922_v34 }
0x14a3   : > { %1923 = vrcp.f32 %v1414_v35 }
0x14ad   : > { %v1924_v36 = vpop.eup %1923 }
0x14ae   : > { %v1427_v40 = vmul.f32 %v1924_v36, %v1425_v39 }
0x1511   : > { %v1430_v37 = vpop.permute.xlu1 %1429 }
0x1512   : > { %v1432_v38 = vmul.f32 %v1924_v36, %v1430_v37 }
0x1514   : > { %1434 = vrot.lane.b32.xlu1 %v1432_v38, %s1950_s3  ;;  %v1714_v38 = vld [vmem:[%s2315_s15] ss:$0 sm:$0xff] }
0x1586   : > { %v1435_v43 = vpop.permute.xlu1 %1434 }
0x1587   : > { %v1437_v44 = vadd.f32 %v1435_v43, %v1427_v40 }
0x1589   : > { %1925 = vtanh.f32 %v1437_v44 }
0x1593   : > { %v1926_v45 = vpop.eup %1925 }
0x1594   : > { %1440 = vrot.lane.b32.xlu0 %v1926_v45, %s1951_s17 }
0x1598   : > { %1450 = vrot.lane.b32.xlu0 %v1437_v44, %s1952_s19 }
0x1606   : > { %v1441_v46 = vpop.permute.xlu0 %1440 }
0x1607   : > { %v1443_v47 = vmul.f32 %v1924_v36, %v1441_v46 }
0x1609   : > { %1445 = vrot.lane.b32.xlu1 %v1443_v47, %s1950_s3 }
0x160a   : > { %v1451_v48 = vpop.permute.xlu0 %1450 }
0x160b   : > { %1453 = vst.msk [vmem:[#allocation4] sm:$0x1] %vm803_vm5, %v1451_v48 }
0x1612   : > { %v1710_v49 = vld [vmem:[#allocation4] ss:$0 sm:$0xff] }
0x1613   : > { %1515 = vrot.lane.b32.xlu0 %v1710_v49, %s1950_s3 }
0x167b   : > { %v1446_v50 = vpop.permute.xlu1 %1445 }
0x167c   : > { %1448 = vst.msk [vmem:[#allocation3] sm:$0x1] %vm803_vm5, %v1446_v50  ;;  %1454 = vst.msk [vmem:[%s2167_s22 + $0x6] sm:$0x1] %vm803_vm5, %v1446_v50 }
0x1683   : > { %v1455_v51 = vld [vmem:[#allocation3] sm:$0x1] }
0x1684   : > { %v1457_v53 = vpack.c.bf16 %v1455_v51, %v1455_v51 }
0x1685   : > { %v1516_v4 = vpop.permute.xlu0 %1515 }
0x1686   : > { %1841 = vmatmul.mubr.msk.bf16.vlgmr.msra.gmra.mrb[16].mxu1 %vm547_vm1, %v1457_v53 }
0x1759   : > { %v1495_v55 = vpop.f32.mrb[16].mxu1 }
0x175a   : > { %v1501_v56 = vadd.f32 %v1495_v55, %v1456_v54  ;;  %v1842_v57 = vpop.f32.mrb[17].mxu1 }
0x175b   : > { %v1498_v58 = vpop.f32.mrb[18].mxu1 }
0x175c   : > { %1927 = vtanh.f32 %v1501_v56  ;;  %v1843_v59 = vpop.f32.mrb[19].mxu1  ;;  %v1709_v61 = vmul.f32 -1.442695, %v1501_v56 }
0x175e   : > { %1929 = vpow2.f32 %v1709_v61 }
0x1766   : > { %v1928_v60 = vpop.eup %1927 }
0x1767   : > { %1520 = vrot.lane.b32.xlu1 %v1928_v60, %s1951_s17 }
0x1768   : > { %v1930_v62 = vpop.eup %1929 }
0x1769   : > { %v1505_v63 = vadd.f32 1.0, %v1930_v62 }
0x176b   : > { %1931 = vrcp.f32 %v1505_v63 }
0x1775   : > { %v1932_v0 = vpop.eup %1931 }
0x1776   : > { %v1518_v5 = vmul.f32 %v1932_v0, %v1516_v4 }
0x17d9   : > { %v1521_v1 = vpop.permute.xlu1 %1520 }
0x17da   : > { %v1523_v2 = vmul.f32 %v1932_v0, %v1521_v1 }
0x17dc   : > { %1525 = vrot.lane.b32.xlu1 %v1523_v2, %s1950_s3 }
0x184e   : > { %v1526_v6 = vpop.permute.xlu1 %1525 }
0x184f   : > { %v1528_v7 = vadd.f32 %v1526_v6, %v1518_v5 }
0x1851   : > { %1933 = vtanh.f32 %v1528_v7 }
0x185b   : > { %v1934_v8 = vpop.eup %1933 }
0x185c   : > { %1531 = vrot.lane.b32.xlu0 %v1934_v8, %s1951_s17 }
0x18ce   : > { %v1532_v9 = vpop.permute.xlu0 %1531 }
0x18cf   : > { %v1534_v10 = vmul.f32 %v1932_v0, %v1532_v9 }
0x18d1   : > { %1536 = vrot.lane.b32.xlu1 %v1534_v10, %s1950_s3 }
0x1943   : > { %v1537_v11 = vpop.permute.xlu1 %1536 }
0x1944   : > { %1539 = vst.msk [vmem:[#allocation3] sm:$0x1] %vm803_vm5, %v1537_v11  ;;  %1545 = vst.msk [vmem:[%s2167_s22 + $0x7] sm:$0x1] %vm803_vm5, %v1537_v11 }
0x194b   : > { %v1546_v41 = vld [vmem:[%s2167_s22] sm:$0xff] }
0x194c   : > { %v1549_v12 = vsel %vm547_vm1, %v1546_v41, 0.0 }
0x194d   : > { %1550 = vadd.xlane.f32.xlu0 %v1549_v12 }
0x19da   : > { %v1551_v13 = vpop.xlane.xlu0 %1550 }
0x19db   : > { %v1552_v14 = vmul.f32 0.03125, %v1551_v13 }
0x19dd   : > { %v1553_v3 = vsub.f32 %v1546_v41, %v1552_v14 }
0x19df   : > { %v1554_v42 = vmul.f32 %v1553_v3, %v1553_v3 }
0x19e1   : > { %v1555_v15 = vsel %vm547_vm1, %v1554_v42, 0.0 }
0x19e2   : > { %1556 = vadd.xlane.f32.xlu1 %v1555_v15 }
0x19f3   : > { %1541 = vrot.lane.b32.xlu1 %v1528_v7, %s1952_s19 }
0x1a6f   : > { %v1557_v16 = vpop.xlane.xlu1 %1556 }
0x1a70   : > { %v1558_v17 = vmul.f32 0.03125, %v1557_v16 }
0x1a72   : > { %v1559_v18 = vadd.f32 1e-05, %v1558_v17 }
0x1a73   : > { %v1542_v19 = vpop.permute.xlu1 %1541 }
0x1a74   : > { %1935 = vrsqrt.f32 %v1559_v18  ;;  %1544 = vst.msk [vmem:[#allocation4] sm:$0x1] %vm803_vm5, %v1542_v19 }
0x1a7e   : > { %v1936_v20 = vpop.eup %1935 }
0x1a7f   : > { %v1561_v22 = vmul.f32 %v1936_v20, %v1553_v3 }
0x1a81   : > { %v1568_v24 = vmul.f32 %v1711_v21, %v1561_v22 }
0x1a83   : > { %v1575_v25 = vadd.f32 %v1712_v23, %v1568_v24 }
0x1a85   : > { %v1576_v26 = vadd.f32 %v1575_v25, %v2136_v52  ;;  %v1713_v52 = vld [vmem:[%s2314_s14] ss:$0 sm:$0xff] }
0x1a87   : > { %v1579_v27 = vsel %vm547_vm1, %v1576_v26, 0.0 }
0x1a88   : > { %1580 = vadd.xlane.f32.xlu0 %v1579_v27 }
0x1b15   : > { %v1581_v28 = vpop.xlane.xlu0 %1580 }
0x1b16   : > { %v1582_v29 = vmul.f32 0.03125, %v1581_v28 }
0x1b18   : > { %v1583_v30 = vsub.f32 %v1576_v26, %v1582_v29 }
0x1b1a   : > { %v1584_v31 = vmul.f32 %v1583_v30, %v1583_v30 }
0x1b1c   : > { %v1585_v32 = vsel %vm547_vm1, %v1584_v31, 0.0 }
0x1b1d   : > { %1586 = vadd.xlane.f32.xlu0 %v1585_v32 }
0x1baa   : > { %v1587_v33 = vpop.xlane.xlu0 %1586 }
0x1bab   : > { %v1588_v34 = vmul.f32 0.03125, %v1587_v33 }
0x1bad   : > { %v1589_v35 = vadd.f32 1e-05, %v1588_v34 }
0x1baf   : > { %1937 = vrsqrt.f32 %v1589_v35 }
0x1bb9   : > { %v1938_v36 = vpop.eup %1937 }
0x1bba   : > { %v1591_v37 = vmul.f32 %v1938_v36, %v1583_v30 }
0x1bbc   : > { %v1598_v39 = vmul.f32 %v1713_v52, %v1591_v37 }
0x1bbe   : > { %v1605_v40 = vadd.f32 %v1714_v38, %v1598_v39 }
0x1bc0   : > { %1606 = vst.msk [vmem:[%s2167_s22] sm:$0xff] %vm547_vm1, %v1605_v40 }
0x1bc1 PF: > { %s30_s25 = sadd.s32 1, %s1945_s25  }
0x1bc2   : > { %p27_p4 = scmp.ge.s32.totalorder %s30_s25, 4  }
0x1bc4   :  { %29 = sbr.rel (!%p27_p4) target bundleno = 3 (0x3), region = 114 }

// kernel: e3net_forward.15
= control target key start
LH: loop header
LB: loop body
LE: loop exit
PB: predicated region body
PF: predicated region fallthrough
CT: control target
= control target key end

     0   :  { %s914_s0 = inlined_call_operand.vmem [shape: f32[2,8,32], index: 0, kind: input, shape index: {}]   ;;  %s915_s1 = inlined_call_operand.vmem [shape: bf16[32,64], index: 1, kind: input, shape index: {}]   ;;  %s916_s2 = inlined_call_operand.vmem [shape: f32[1,64], index: 2, kind: input, shape index: {}]   ;;  %s917_s3 = inlined_call_operand.vmem [shape: f32[2,8,64], index: 3, kind: input, shape index: {}]   ;;  %s918_s4 = inlined_call_operand.vmem [shape: bf16[64,16], index: 4, kind: input, shape index: {}]   ;;  %s919_s5 = inlined_call_operand.<no memory space> [shape: f32[1,1], index: 5, kind: input, shape index: {}]   ;;  %s920_s6 = inlined_call_operand.hbm [shape: f32[2,1,72], index: 6, kind: output, shape index: {}]  }
   0x1   :  { %v11_v0 = vstv %s919_s5 }
   0x2   :  { %12 = vst [vmem:[#allocation2] sm:$0x1] %v11_v0 }
   0x3   :  { %13 = vsyncpa [#allocation4], 0 }
   0x4   :  { %15 = vsyncpa [#allocation4 + $0x1], 0  ;;  %s782_s23 = smov 0   ;;  %s784_s24 = smov 0  }
   0x5   :  { %s786_s25 = smov 0   ;;  %s788_s26 = smov 0  }
   0x6 LB: > { %s803_s5 = sadd.s32 4294967295, %s732_s26   ;;  %s563_s27 = sadd.s32 4294967294, %s732_s26   ;;  %s732_s26 = sphi %s788_s26, %s926_s26   ;;  %s728_s25 = sphi %s786_s25, %s925_s25   ;;  %s724_s24 = sphi %s784_s24, %s924_s24   ;;  %s720_s23 = sphi %s782_s23, %s923_s23  }
   0x7   : > { %s807_s28 = sadd.s32 1, %s732_s26   ;;  %s164_s29 = sadd.s32 1, %s728_s25 }
   0x8   : > { %s161_s30 = ssub.s32 %s732_s26, %s807_s28  ;;  %p174_p0 = scmp.ne.s32.totalorder %s728_s25, %s724_s24 }
   0x9   : > { %p162_p1 = scmp.eq.s32.totalorder %s161_s30, 0  ;;  %p175_p2 = scmp.eq.s32.totalorder %s803_s5, 1 }
   0xa   : > { %p180_p3 = scmp.ne.s32.totalorder %s724_s24, %s720_s23  ;;  %p181_p4 = scmp.eq.s32.totalorder %s563_s27, 1 }
   0xb   : > { %s818_s7 = scalar_select %p162_p1, %s728_s25, %s164_s29  }
   0xc   : > { %p820_p5 = por %p175_p2, %p174_p0  ;;  %p824_p6 = por %p181_p4, %p180_p3 }
   0xd   : > { %p566_p7 = scmp.ge.s32.totalorder %s732_s26, 1  ;;  %p225_p8 = scmp.lt.s32.totalorder %s732_s26, 3 }
   0xf   : > { %p226_p9 = pnand %p566_p7, %p225_p8 }
  0x10   : > { %v660_v1 = vld [vmem:[%s915_s1] sm:$0xff] (!%p226_p9)   ;;  %v734_v2 = vmov (!%p226_p9), 0.0   ;;  %v661_v3 = vld [vmem:[%s915_s1 + $0x8] sm:$0xff] (!%p226_p9)   ;;  %vm735_vm0 = vmmov (!%p226_p9), 0   ;;  %p257_p10 = scmp.lt.s32.totalorder (!%p226_p9), %s803_s5, 1  ;;  %vm291_vm1 = vcmask (!%p226_p9), 261120  }
  0x11   : > { %229 = sbr.rel (%p226_p9) target bundleno = 638 (0x27e), region = 44  ;;  %590 = vmatprep.subr.bf16.mxu0 (!%p226_p9), %v734_v2  ;;  %598 = vmatprep.subr.bf16.mxu1 (!%p226_p9), %v734_v2  ;;  %v662_v6 = vld [vmem:[%s918_s4] sm:$0xff] (!%p226_p9)   ;;  %v663_v7 = vld [vmem:[%s918_s4 + $0x8] sm:$0xff] (!%p226_p9)   ;;  %v664_v8 = vld [vmem:[%s918_s4 + $0x10] sm:$0xff] (!%p226_p9)   ;;  %vm376_vm2 = vcmask (!%p226_p9), 523264   ;;  %s736_s17 = smov (!%p226_p9), 24  }
  0x12   : > { %591 = vmatpush3.bf16.msra.mxu0 (!%p226_p9), %v660_v1  ;;  %594 = vmatprep.mubr.msk.bf16.mxu0 (!%p226_p9), %vm735_vm0, %v734_v2  ;;  %v665_v9 = vld [vmem:[%s918_s4 + $0x18] sm:$0xff] (!%p226_p9)   ;;  %v569_v10 = vld [vmem:[%s916_s2] ss:$0 sm:$0xff] (!%p226_p9)  ;;  %s739_s19 = smov (!%p226_p9), 16   ;;  %s740_s20 = smov (!%p226_p9), 48   ;;  %vm428_vm3 = vcmask (!%p226_p9), 64512  }
  0x13   : > { %592 = vmatprep.subr.bf16.mxu0 (!%p226_p9), %v734_v2  ;;  %606 = vmatprep.mubr.msk.bf16.mxu1 (!%p226_p9), %vm735_vm0, %v734_v2  ;;  %v477_v23 = vld [vmem:[#allocation2] sm:$0x1] (!%p226_p9)  ;;  %s741_s21 = smov (!%p226_p9), 40   ;;  %s742_s22 = smov (!%p226_p9), 56   ;;  %vm430_vm4 = vcmask (!%p226_p9), 195584   ;;  %vm420_vm5 = vcmask (!%p226_p9), 130048  }
  0x14   : > { %599 = vmatpush3.bf16.msra.mxu1 (!%p226_p9), %v662_v6  ;;  %610 = vpush (!%p226_p9), %v477_v23  ;;  %vm445_vm6 = vcmask (!%p226_p9), 326656   ;;  %vm453_vm7 = vcmask (!%p226_p9), 392192   ;;  %vm461_vm8 = vcmask (!%p226_p9), 457728   ;;  %s255_s27 = sand.u32 (!%p226_p9), 1, %s724_s24   ;;  %s579_s30 = sshll.u32 (!%p226_p9), %s803_s5, 4  ;;  %vm481_vm9 = vcmask (!%p226_p9), 581632  }
  0x15   : > { %600 = vmatprep.subr.bf16.mxu1 (!%p226_p9), %v734_v2  ;;  %s256_s10 = scalar_lea.vmem (!%p226_p9), [#allocation3], %s255_s27 }
  0x16   : > { %593 = vmatpush3.bf16.msra.mxu0 (!%p226_p9), %v661_v3  ;;  %s496_s11 = sshll.u32 (!%p226_p9), %s256_s10, 4  ;;  %s874_s11 = int_to_ptr.vmem [resolvable:$true] %s496_s11 }
  0x18   : > { %s838_s14 = scalar_select %p257_p10, %s803_s5, 1  ;;  %601 = vmatpush3.bf16.msra.mxu1 %v663_v7 }
  0x19   : > { %602 = vmatprep.subr.bf16.mxu1 %v734_v2  ;;  %s743_s5 = smov [#allocation3]  }
  0x1a   : > { %s567_s15 = sshll.u32 %s838_s14, 3  ;;  %s872_s14 = scalar_lea.hbm %s920_s6, %s579_s30 }
  0x1b   : > { %s260_s18 = scalar_lea.vmem %s914_s0, %s567_s15  ;;  %s264_s16 = scalar_lea.vmem %s917_s3, %s567_s15 }
  0x1c   : > { %v266_v4 = vld [vmem:[%s260_s18] sm:$0xff]  ;;  %603 = vmatpush3.bf16.msra.mxu1 %v664_v8  ;;  %s737_s18 = smov 8   ;;  %s738_s15 = smov 32  }
  0x1d   : > { %v267_v5 = vpack.c.bf16 %v266_v4, %v266_v4  ;;  %604 = vmatprep.subr.bf16.mxu1 %v734_v2  ;;  %v341_v19 = vld [vmem:[%s264_s16] sm:$0xff]  ;;  %s484_s16 = scalar_lea.sflag [#allocation4], %s255_s27 }
  0x1f   : > { %595 = vmatmul.mubr.msk.bf16.vlgmr.msra.gmra.mrb[0].mxu0 %vm291_vm1, %v267_v5 }
  0x20   : > { %605 = vmatpush3.bf16.msra.mxu1 %v665_v9 }
  0x45   : > { %s611_s29 = spop %610 }
  0x46   : > { %v479_v62 = vstv %s611_s29 }
  0xf2   : > { %v329_v11 = vpop.f32.mrb[0].mxu0 }
  0xf3   : > { %v330_v12 = vadd.f32 %v569_v10, %v329_v11  ;;  %v596_v13 = vpop.f32.mrb[1].mxu0 }
  0xf4   : > { %v332_v14 = vpop.f32.mrb[2].mxu0 }
  0xf5   : > { %v573_v15 = vmul.f32 -1.442695, %v330_v12  ;;  %v597_v16 = vpop.f32.mrb[3].mxu0 }
  0xf7   : > { %666 = vpow2.f32 %v573_v15 }
 0x101   : > { %v667_v17 = vpop.eup %666 }
 0x102   : > { %v338_v18 = vadd.f32 1.0, %v667_v17 }
 0x104   : > { %668 = vrcp.f32 %v338_v18 }
 0x10e   : > { %v669_v20 = vpop.eup %668 }
 0x10f   : > { %v342_v21 = vmul.f32 %v669_v20, %v341_v19 }
 0x111   : > { %v343_v22 = vpack.c.bf16 %v342_v21, %v342_v21 }
 0x113   : > { %607 = vmatmul.mubr.msk.bf16.vlgmr.msra.gmra.mrb[0].mxu1 %vm376_vm2, %v343_v22 }
 0x1e6   : > { %v414_v24 = vpop.f32.mrb[0].mxu1 }
 0x1e7   : > { %v608_v25 = vpop.f32.mrb[1].mxu1  ;;  %v440_v26 = vrot.slane %v414_v24, 3  ;;  %v424_v27 = vrot.slane %v414_v24, 1  ;;  %v448_v30 = vrot.slane %v414_v24, 4  ;;  %v433_v31 = vrot.slane %v414_v24, 2 }
 0x1e8   : > { %v417_v28 = vpop.f32.mrb[2].mxu1  ;;  %v464_v32 = vrot.slane %v414_v24, 6  ;;  %v456_v33 = vrot.slane %v414_v24, 5  ;;  %v471_v34 = vrot.slane %v414_v24, 7  ;;  %v421_v41 = vsel %vm420_vm5, %v414_v24, 0.0 }
 0x1e9   : > { %441 = vrot.lane.b32.xlu1 %v440_v26, %s736_s17  ;;  %425 = vrot.lane.b32.xlu0 %v424_v27, %s737_s18  ;;  %v609_v29 = vpop.f32.mrb[3].mxu1  ;;  %s670_s17 = scalar_lea.vmem %s874_s11, 16  ;;  %s674_s18 = sshll.u32 %s743_s5, 4  ;;  %s675_s18 = int_to_ptr.vmem [resolvable:$false] %s674_s18 }
 0x1ea   : > { %p671_p11 = scmp.ne.s32.totalorder %s874_s11, %s670_s17  ;;  %p677_p0 = scmp.lt.s32.totalorder %s874_s11, %s675_s18 }
 0x1ec   : > { %p672_p12 = pnand %p671_p11, %p820_p5 }
 0x1ed   : > { %449 = vrot.lane.b32.xlu1 %v448_v30, %s738_s15  ;;  %434 = vrot.lane.b32.xlu0 %v433_v31, %s739_s19  ;;  %s676_s15 = scalar_lea.vmem %s675_s18, 32 }
 0x1ee   : > { %p673_p13 = pneg %p672_p12  ;;  %p678_p1 = scmp.lt.s32.totalorder %s676_s15, %s670_s17 }
 0x1f0   : > { %p679_p2 = por %p678_p1, %p677_p0 }
 0x1f1   : > { %465 = vrot.lane.b32.xlu1 %v464_v32, %s740_s20  ;;  %457 = vrot.lane.b32.xlu0 %v456_v33, %s741_s21 }
 0x1f2   : > { %p680_p3 = pnand %p679_p2, %p673_p13 }
 0x1f5   : > { %472 = vrot.lane.b32.xlu0 %v471_v34, %s742_s22 }
 0x25b   : > { %v442_v35 = vpop.permute.xlu1 %441  ;;  %v426_v36 = vpop.permute.xlu0 %425 }
 0x25c   : > { %v429_v37 = vsel %vm428_vm3, 0.0, %v426_v36  ;;  %v444_v42 = vsel %vm430_vm4, 0.0, %v442_v35 }
 0x25d   : > { %v431_v38 = vsel %vm430_vm4, %v429_v37, 0.0  ;;  %v446_v48 = vsel %vm445_vm6, %v444_v42, 0.0 }
 0x25e   : > { %v432_v43 = vadd.f32 %v431_v38, %v421_v41 }
 0x25f   : > { %v450_v39 = vpop.permute.xlu1 %449  ;;  %v435_v40 = vpop.permute.xlu0 %434 }
 0x260   : > { %v437_v44 = vsel %vm420_vm5, 0.0, %v435_v40  ;;  %v452_v46 = vsel %vm291_vm1, 0.0, %v450_v39 }
 0x261   : > { %v438_v45 = vsel %vm291_vm1, %v437_v44, 0.0  ;;  %v454_v53 = vsel %vm453_vm7, %v452_v46, 0.0 }
 0x262   : > { %v439_v47 = vadd.f32 %v438_v45, %v432_v43 }
 0x263   : > { %v466_v49 = vpop.permute.xlu1 %465  ;;  %v458_v50 = vpop.permute.xlu0 %457 }
 0x264   : > { %v447_v51 = vadd.f32 %v446_v48, %v439_v47  ;;  %v460_v52 = vsel %vm445_vm6, 0.0, %v458_v50  ;;  %v468_v54 = vsel %vm453_vm7, 0.0, %v466_v49 }
 0x265   : > { %v462_v56 = vsel %vm461_vm8, %v460_v52, 0.0  ;;  %v469_v59 = vsel %vm376_vm2, %v468_v54, 0.0 }
 0x266   : > { %v455_v55 = vadd.f32 %v454_v53, %v447_v51 }
 0x267   : > { %v473_v58 = vpop.permute.xlu0 %472 }
 0x268   : > { %v463_v57 = vadd.f32 %v462_v56, %v455_v55  ;;  %v475_v61 = vsel %vm461_vm8, 0.0, %v473_v58 }
 0x26a   : > { %v470_v60 = vadd.f32 %v469_v59, %v463_v57 }
 0x26c   : > { %v476_v63 = vadd.f32 %v475_v61, %v470_v60 }
 0x26e   : > { %v480_v0 = vadd.f32 %v479_v62, %v476_v63 }
 0x270   : > { %482 = vst.msk [vmem:[%s256_s10] sm:$0x1] %vm481_vm9, %v480_v0 }
 0x271   : > { %683 = shalt.err (!%p680_p3)
}
 0x272   : > { %s684_s19 = scalar_lea.hbm %s872_s14, 16  ;;  %s688_s22 = scalar_lea.hbm %s920_s6, 32 }
 0x273   : > { %p685_p4 = scmp.ne.s32.totalorder %s872_s14, %s684_s19  ;;  %p689_p9 = scmp.lt.u32.totalorder %s872_s14, %s920_s6 }
 0x274   : > { %p690_p10 = scmp.lt.u32.totalorder %s688_s22, %s684_s19  ;;  %p692_p12 = scmp.lt.u32.totalorder %s684_s19, %s872_s14 }
 0x275   : > { %p686_p7 = pnand %p685_p4, %p820_p5 }
 0x276   : > { %p691_p11 = por %p690_p10, %p689_p9 }
 0x277   : > { %p687_p8 = pneg %p686_p7 }
 0x278   : > { %p693_p13 = por %p692_p12, %p691_p11 }
 0x27a   : > { %p694_p0 = pnand %p693_p13, %p687_p8 }
 0x27c   : > { %697 = shalt.err (!%p694_p0)
}
 0x27d   : > { %612 = dma.vmem_to_hbm [thread:$0]  (%p820_p5), %s874_s11, 16, %s872_s14, %s484_s16  }
 0x27e PF: > { %p618_p1 = scmp.ge.s32.totalorder %s732_s26, 2  ;;  %s508_s30 = sand.u32 1, %s720_s23  }
 0x27f   : > { %s509_s10 = scalar_lea.sflag [#allocation4], %s508_s30 }
 0x280   : > { %p615_p2 = pnand %p618_p1, %p824_p6 }
 0x282   : > { %715 = dma.done.wait (!%p615_p2), %s509_s10, 16  }
 0x283   : > { %717 = vsyncadd (!%p615_p2), %s509_s10, 4294967280  ;;  %p18_p3 = scmp.ge.s32.totalorder %s807_s28, 4   ;;  %s923_s23 = smov %s724_s24 }
 0x284   : > { %s924_s24 = smov %s728_s25  ;;  %s925_s25 = smov %s818_s7 }
 0x285   : > { %s926_s26 = smov %s807_s28  ;;  %20 = sbr.rel (!%p18_p3) target bundleno = 6 (0x6), region = 82 }
 0x28c   :  { %513 = vsyncpa [#allocation4], 1 }
 0x28d   :  { %515 = vsyncpa [#allocation4 + $0x1], 1 }

</bundles_post_ra>
